<compile_context>
chip_gen: v7x
topology: tpu7x:2x2x1
jax: 0.10.0
libtpu: 0.0.40
codegen_flags: <defaults>
</compile_context>

<pallas_src>
import functools

import jax
import jax.numpy as jnp
import numpy as np
from jax import lax
from jax.experimental import pallas as pl
from jax.experimental.pallas import tpu as pltpu


def _round_up(x: int, m: int) -> int:
    return (x + m - 1) // m * m


def _bottleneck_kernel(x_ref, w1_ref, s1_ref, b1_ref,
                       w2_ref, s2_ref, b2_ref,
                       w3_ref, s3_ref, b3_ref,
                       *rest, H, W, has_downsample):
    """Fused bottleneck for one batch element (channel dims 128-padded).

    x_ref : (H*W, Cin_p)         bf16 lane-dense input block
    w1_ref: (Cin_p, Cw_p)        bf16 1x1 conv1
    w2_ref: (3, 3*Cw_p, Cw_p)    bf16 3x3 conv2, [di, dj*Cw_p + cin, cout]
    w3_ref: (Cw_p, Cout_p)       bf16 1x1 conv3
    wd_ref: (Cin_p, Cout_p)      bf16 downsample 1x1 conv (only if has_downsample)
    s*/b* : (1, C)               f32 folded BatchNorm scale / bias
    o_ref : (H*W, Cout_p)        f32 output block
    stage_ref: (H*W+16, Cw_p)    f32 scratch, h1 with 8 zero rows above/below
    wide_ref : (H*W+2W, 3*Cw_p)  bf16 scratch, W-im2col of h1 with one zero
                                 image row above/below
    """
    if has_downsample:
        wd_ref, sd_ref, bd_ref = rest[0], rest[1], rest[2]
    o_ref, stage_ref, wide_ref = rest[-3], rest[-2], rest[-1]

    HW = H * W
    cwp = w1_ref.shape[1]

    x = x_ref[...]                                          # bf16 (HW, Cin_p)

    # ---- conv1 (1x1) + bn1 + relu (f32 epilogue) ----
    h1 = jnp.dot(x, w1_ref[...], preferred_element_type=jnp.float32)
    h1 = jnp.maximum(h1 * s1_ref[...] + b1_ref[...], 0.0)

    # ---- W-direction im2col of h1 (done once, on the flattened view) ----
    # f32 staging copy of h1 with zero guard rows; the two +-1 row reads below
    # are the only non-tile-aligned accesses in the whole kernel.
    stage_ref[0:8, :] = jnp.zeros((8, cwp), jnp.float32)
    stage_ref[8 + HW:16 + HW, :] = jnp.zeros((8, cwp), jnp.float32)
    stage_ref[8:8 + HW, :] = h1

    col = lax.broadcasted_iota(jnp.int32, (HW, 1), 0) % W    # column index j
    left = jnp.where(col == 0, 0.0, stage_ref[7:7 + HW, :])        # h1[i, j-1]
    right = jnp.where(col == W - 1, 0.0, stage_ref[9:9 + HW, :])   # h1[i, j+1]

    # Wide scratch rows [W, W+HW) hold [left | mid | right]; the two W-row
    # borders are re-zeroed every step (cheap, and stays correct when the batch
    # grid is sharded across TensorCores, unlike a program_id==0 guard).
    wide_ref[0:W, :] = jnp.zeros((W, 3 * cwp), jnp.bfloat16)
    wide_ref[W + HW:2 * W + HW, :] = jnp.zeros((W, 3 * cwp), jnp.bfloat16)
    wide_ref[W:W + HW, 0:cwp] = left.astype(jnp.bfloat16)
    wide_ref[W:W + HW, cwp:2 * cwp] = h1.astype(jnp.bfloat16)
    wide_ref[W:W + HW, 2 * cwp:3 * cwp] = right.astype(jnp.bfloat16)

    # ---- conv2 (3x3, pad=1): 3 MXU matmuls, 3*Cw_p contraction, bn2 + relu ----
    acc = jnp.dot(wide_ref[0:HW, :], w2_ref[0],
                  preferred_element_type=jnp.float32)
    acc += jnp.dot(wide_ref[W:W + HW, :], w2_ref[1],
                   preferred_element_type=jnp.float32)
    acc += jnp.dot(wide_ref[2 * W:2 * W + HW, :], w2_ref[2],
                   preferred_element_type=jnp.float32)
    h2 = jnp.maximum(acc * s2_ref[...] + b2_ref[...], 0.0).astype(jnp.bfloat16)

    # ---- conv3 (1x1) + bn3 ----
    h3 = jnp.dot(h2, w3_ref[...], preferred_element_type=jnp.float32)
    h3 = h3 * s3_ref[...] + b3_ref[...]

    # ---- residual branch (identity case specialized away: no eye-matmul) ----
    if has_downsample:
        ds = jnp.dot(x, wd_ref[...], preferred_element_type=jnp.float32)
        ds = ds * sd_ref[...] + bd_ref[...]
    else:
        ds = x.astype(jnp.float32)

    # ---- residual add + relu, lane-dense f32 store ----
    o_ref[...] = jnp.maximum(h3 + ds, 0.0).astype(o_ref.dtype)


def bottleneck_pallas(x_nchw, params):
    """x_nchw: (N, Cin, H, W) f32.  params: 9-tuple (identity residual) or
    12-tuple (1x1-conv + BN downsample).  Returns (N, Cout, H, W) f32."""
    has_downsample = len(params) == 12
    if has_downsample:
        (w1, s1, b1, w2, s2, b2, w3, s3, b3, wd, sd, bd) = params
    else:
        (w1, s1, b1, w2, s2, b2, w3, s3, b3) = params

    N, Cin, H, W = x_nchw.shape
    HW = H * W
    Cw = w1.shape[1]
    Cout = w3.shape[1]
    # Pad every channel dim to a multiple of 128: lane-dense matmuls and an
    # unmasked output store.  For real ResNet widths (>=256) these are no-ops.
    cin_p, cw_p, cout_p = (_round_up(c, 128) for c in (Cin, Cw, Cout))

    # NCHW -> lane-dense (N, H*W, Cin_p) bf16 (all reshapes in the wrapper).
    x = jnp.transpose(x_nchw, (0, 2, 3, 1)).reshape(N, HW, Cin)
    x = jnp.pad(x, ((0, 0), (0, 0), (0, cin_p - Cin))).astype(jnp.bfloat16)

    def pad_w(w, rows, cols):      # matmul weights -> bf16, zero-padded
        return jnp.pad(w, ((0, rows - w.shape[0]),
                           (0, cols - w.shape[1]))).astype(jnp.bfloat16)

    def pad_sb(v, cols):           # folded BN scale/bias -> f32, zero-padded
        return jnp.pad(v, ((0, 0), (0, cols - v.shape[1])))

    w1p = pad_w(w1, cin_p, cw_p)
    w3p = pad_w(w3, cw_p, cout_p)
    # (3, 3, Cw, Cw) HWIO -> (3, 3*Cw_p, Cw_p): one weight slab per H-tap with
    # the three W-taps concatenated along the contraction dim.
    w2p = jnp.pad(w2, ((0, 0), (0, 0), (0, cw_p - Cw), (0, cw_p - Cw)))
    w2p = w2p.astype(jnp.bfloat16).reshape(3, 3 * cw_p, cw_p)

    args = [x, w1p, pad_sb(s1, cw_p), pad_sb(b1, cw_p),
            w2p, pad_sb(s2, cw_p), pad_sb(b2, cw_p),
            w3p, pad_sb(s3, cout_p), pad_sb(b3, cout_p)]
    if has_downsample:
        args += [pad_w(wd, cin_p, cout_p), pad_sb(sd, cout_p), pad_sb(bd, cout_p)]

    def whole(a):
        nd = a.ndim
        return pl.BlockSpec(a.shape, lambda n, _nd=nd: (0,) * _nd)

    in_specs = [pl.BlockSpec((None, HW, cin_p), lambda n: (n, 0, 0))]
    in_specs += [whole(a) for a in args[1:]]
    out_specs = pl.BlockSpec((None, HW, cout_p), lambda n: (n, 0, 0))

    kernel = functools.partial(_bottleneck_kernel, H=H, W=W,
                               has_downsample=has_downsample)

    out = pl.pallas_call(
        kernel,
        out_shape=jax.ShapeDtypeStruct((N, HW, cout_p), jnp.float32),
        grid_spec=pltpu.PrefetchScalarGridSpec(
            num_scalar_prefetch=0,
            grid=(N,),
            in_specs=in_specs,
            out_specs=out_specs,
            scratch_shapes=[
                pltpu.VMEM((HW + 16, cw_p), jnp.float32),        # h1 staging
                pltpu.VMEM((HW + 2 * W, 3 * cw_p), jnp.bfloat16),  # W-im2col
            ],
        ),
        compiler_params=pltpu.CompilerParams(
            dimension_semantics=("parallel",),
            vmem_limit_bytes=32 * 1024 * 1024,
        ),
    )(*args)

    out = out[:, :, :Cout].reshape(N, H, W, Cout)
    return jnp.transpose(out, (0, 3, 1, 2))


# ----------------------- parameter construction (glue) -----------------------

def _fold_bn(gamma, beta, mean, var, eps=1e-5):
    scale = gamma / jnp.sqrt(var + eps)
    bias = beta - mean * scale
    return scale.reshape(1, -1), bias.reshape(1, -1)


def _bn_params(key, c):
    kg, kb, km, kv = jax.random.split(key, 4)
    gamma = jax.random.uniform(kg, (c,), jnp.float32, 0.5, 1.5)
    beta = 0.1 * jax.random.normal(kb, (c,), jnp.float32)
    mean = 0.1 * jax.random.normal(km, (c,), jnp.float32)
    var = jax.random.uniform(kv, (c,), jnp.float32, 0.5, 1.5)
    return _fold_bn(gamma, beta, mean, var)


def make_bottleneck_params(key, in_channels, out_channels,
                           base_width=64, groups=1, expansion=1):
    """Weights in channel-last form: 1x1 as (Cin, Cout), 3x3 as (kh, kw, Cin, Cout)."""
    width = int(out_channels * (base_width / 64.0)) * groups
    c_final = out_channels * expansion
    residual_c = out_channels if in_channels != out_channels else in_channels
    # The reference module's residual add only shape-checks under this condition.
    assert c_final == residual_c, "Bottleneck residual add requires expansion == 1"

    ks = jax.random.split(key, 8)
    w1 = jax.random.normal(ks[0], (in_channels, width), jnp.float32) / np.sqrt(in_channels)
    w2 = jax.random.normal(ks[1], (3, 3, width, width), jnp.float32) / np.sqrt(9 * width)
    w3 = jax.random.normal(ks[2], (width, c_final), jnp.float32) / np.sqrt(width)
    s1, b1 = _bn_params(ks[3], width)
    s2, b2 = _bn_params(ks[4], width)
    s3, b3 = _bn_params(ks[5], c_final)

    params = (w1, s1, b1, w2, s2, b2, w3, s3, b3)
    if in_channels != out_channels:
        wd = jax.random.normal(ks[6], (in_channels, out_channels), jnp.float32) / np.sqrt(in_channels)
        sd, bd = _bn_params(ks[7], out_channels)
        params = params + (wd, sd, bd)
    return params


# ----------------------------- pure-JAX reference ----------------------------

def bottleneck_ref(x_nchw, params):
    """XLA reference using the same bf16-operand / f32-accumulate policy."""
    has_downsample = len(params) == 12
    if has_downsample:
        (w1, s1, b1, w2, s2, b2, w3, s3, b3, wd, sd, bd) = params
    else:
        (w1, s1, b1, w2, s2, b2, w3, s3, b3) = params

    bf = lambda a: a.astype(jnp.bfloat16)
    f32 = jnp.float32
    x = bf(jnp.transpose(x_nchw, (0, 2, 3, 1)))

    h = jnp.einsum('nhwc,cd->nhwd', x, bf(w1), preferred_element_type=f32)
    h = jnp.maximum(h * s1[0] + b1[0], 0.0)
    h = lax.conv_general_dilated(bf(h), bf(w2), (1, 1), [(1, 1), (1, 1)],
                                 dimension_numbers=('NHWC', 'HWIO', 'NHWC'),
                                 preferred_element_type=f32)
    h = jnp.maximum(h * s2[0] + b2[0], 0.0)
    h = jnp.einsum('nhwc,cd->nhwd', bf(h), bf(w3), preferred_element_type=f32)
    h = h * s3[0] + b3[0]
    if has_downsample:
        ds = jnp.einsum('nhwc,cd->nhwd', x, bf(wd), preferred_element_type=f32)
        ds = ds * sd[0] + bd[0]
    else:
        ds = x.astype(f32)
    out = jnp.maximum(h + ds, 0.0)
    return jnp.transpose(out, (0, 3, 1, 2))


if __name__ == "__main__":
    key = jax.random.PRNGKey(0)
    k1, k2, k3, k4 = jax.random.split(key, 4)
    fwd = jax.jit(bottleneck_pallas)

    # Config 1: in != out -> 1x1-conv + BN downsample branch.
    x1 = jax.random.normal(k1, (2, 8, 16, 16), jnp.float32)
    p1 = make_bottleneck_params(k2, in_channels=8, out_channels=16)
    out1 = jax.block_until_ready(fwd(x1, p1))
    ref1 = jax.block_until_ready(bottleneck_ref(x1, p1))
    np.testing.assert_allclose(np.asarray(out1), np.asarray(ref1),
                               rtol=1e-2, atol=1e-2)

    # Config 2: in == out -> identity residual (downsample matmul specialized away).
    x2 = jax.random.normal(k3, (2, 16, 16, 16), jnp.float32)
    p2 = make_bottleneck_params(k4, in_channels=16, out_channels=16)
    out2 = jax.block_until_ready(fwd(x2, p2))
    ref2 = jax.block_until_ready(bottleneck_ref(x2, p2))
    np.testing.assert_allclose(np.asarray(out2), np.asarray(ref2),
                               rtol=1e-2, atol=1e-2)

    print("KERNEL_OK")
</pallas_src>

<mosaic_0001>
module attributes {stable_mosaic.version = 11 : i64} {
  func.func @_bottleneck_kernel(%arg0: i32, %arg1: memref<1x256x128xbf16, #tpu.memory_space<vmem>>, %arg2: memref<128x128xbf16, #tpu.memory_space<vmem>>, %arg3: memref<1x128xf32, #tpu.memory_space<vmem>>, %arg4: memref<1x128xf32, #tpu.memory_space<vmem>>, %arg5: memref<3x384x128xbf16, #tpu.memory_space<vmem>>, %arg6: memref<1x128xf32, #tpu.memory_space<vmem>>, %arg7: memref<1x128xf32, #tpu.memory_space<vmem>>, %arg8: memref<128x128xbf16, #tpu.memory_space<vmem>>, %arg9: memref<1x128xf32, #tpu.memory_space<vmem>>, %arg10: memref<1x128xf32, #tpu.memory_space<vmem>>, %arg11: memref<128x128xbf16, #tpu.memory_space<vmem>>, %arg12: memref<1x128xf32, #tpu.memory_space<vmem>>, %arg13: memref<1x128xf32, #tpu.memory_space<vmem>>, %arg14: memref<1x256x128xf32, #tpu.memory_space<vmem>>, %arg15: memref<272x128xf32, #tpu.memory_space<vmem>>, %arg16: memref<288x384xbf16, #tpu.memory_space<vmem>>) attributes {dimension_semantics = [#tpu.dimension_semantics<parallel>], iteration_bounds = array<i64: 2>, scalar_prefetch = 0 : i64, scratch_operands = 2 : i64, tpu.core_type = #tpu.core_type<tc>, window_params = [{transform_indices = @transform_0, window_bounds = array<i64: 1, 256, 128>}, {pipeline_mode = #tpu.pipeline_mode<synchronous>, transform_indices = @transform_1, window_bounds = array<i64: 128, 128>}, {pipeline_mode = #tpu.pipeline_mode<synchronous>, transform_indices = @transform_2, window_bounds = array<i64: 1, 128>}, {pipeline_mode = #tpu.pipeline_mode<synchronous>, transform_indices = @transform_3, window_bounds = array<i64: 1, 128>}, {pipeline_mode = #tpu.pipeline_mode<synchronous>, transform_indices = @transform_4, window_bounds = array<i64: 3, 384, 128>}, {pipeline_mode = #tpu.pipeline_mode<synchronous>, transform_indices = @transform_5, window_bounds = array<i64: 1, 128>}, {pipeline_mode = #tpu.pipeline_mode<synchronous>, transform_indices = @transform_6, window_bounds = array<i64: 1, 128>}, {pipeline_mode = #tpu.pipeline_mode<synchronous>, transform_indices = @transform_7, window_bounds = array<i64: 128, 128>}, {pipeline_mode = #tpu.pipeline_mode<synchronous>, transform_indices = @transform_8, window_bounds = array<i64: 1, 128>}, {pipeline_mode = #tpu.pipeline_mode<synchronous>, transform_indices = @transform_9, window_bounds = array<i64: 1, 128>}, {pipeline_mode = #tpu.pipeline_mode<synchronous>, transform_indices = @transform_10, window_bounds = array<i64: 128, 128>}, {pipeline_mode = #tpu.pipeline_mode<synchronous>, transform_indices = @transform_11, window_bounds = array<i64: 1, 128>}, {pipeline_mode = #tpu.pipeline_mode<synchronous>, transform_indices = @transform_12, window_bounds = array<i64: 1, 128>}, {transform_indices = @transform_13, window_bounds = array<i64: 1, 256, 128>}]} {
    %c0 = arith.constant 0 : index
    %c0_0 = arith.constant 0 : index
    %c0_1 = arith.constant 0 : index
    %0 = vector.load %arg1[%c0, %c0_0, %c0_1] : memref<1x256x128xbf16, #tpu.memory_space<vmem>>, vector<1x256x128xbf16>
    %1 = vector.shape_cast %0 : vector<1x256x128xbf16> to vector<256x128xbf16>
    %c0_2 = arith.constant 0 : index
    %c0_3 = arith.constant 0 : index
    %2 = vector.load %arg2[%c0_2, %c0_3] : memref<128x128xbf16, #tpu.memory_space<vmem>>, vector<128x128xbf16>
    %cst = arith.constant dense<0.000000e+00> : vector<256x128xf32>
    %3 = tpu.matmul %1, %2, %cst {dimension_numbers = #tpu.dot_dimension_numbers<[1], [0], [0], [1], [0, 0, 1, 1], [], []>} : vector<256x128xbf16>, vector<128x128xbf16>, vector<256x128xf32> -> vector<256x128xf32>
    %c0_4 = arith.constant 0 : index
    %c0_5 = arith.constant 0 : index
    %4 = vector.load %arg3[%c0_4, %c0_5] : memref<1x128xf32, #tpu.memory_space<vmem>>, vector<1x128xf32>
    %5 = vector.broadcast %4 : vector<1x128xf32> to vector<256x128xf32>
    %6 = arith.mulf %3, %5 : vector<256x128xf32>
    %c0_6 = arith.constant 0 : index
    %c0_7 = arith.constant 0 : index
    %7 = vector.load %arg4[%c0_6, %c0_7] : memref<1x128xf32, #tpu.memory_space<vmem>>, vector<1x128xf32>
    %8 = vector.broadcast %7 : vector<1x128xf32> to vector<256x128xf32>
    %9 = arith.addf %6, %8 : vector<256x128xf32>
    %cst_8 = arith.constant 0.000000e+00 : f32
    %10 = vector.broadcast %cst_8 : f32 to vector<256x128xf32>
    %11 = arith.maximumf %9, %10 : vector<256x128xf32>
    %cst_9 = arith.constant 0.000000e+00 : f32
    %12 = vector.broadcast %cst_9 : f32 to vector<8x128xf32>
    %c0_10 = arith.constant 0 : index
    %c0_11 = arith.constant 0 : index
    %13 = vector.load %arg15[%c0_10, %c0_11] : memref<272x128xf32, #tpu.memory_space<vmem>>, vector<8x128xf32>
    tpu.vector_store %arg15[%c0_10, %c0_11], %12 {strides = array<i32>} : memref<272x128xf32, #tpu.memory_space<vmem>>, vector<8x128xf32>,
    %cst_12 = arith.constant 0.000000e+00 : f32
    %14 = vector.broadcast %cst_12 : f32 to vector<8x128xf32>
    %c264 = arith.constant 264 : index
    %c0_13 = arith.constant 0 : index
    %15 = vector.load %arg15[%c264, %c0_13] : memref<272x128xf32, #tpu.memory_space<vmem>>, vector<8x128xf32>
    tpu.vector_store %arg15[%c264, %c0_13], %14 {strides = array<i32>} : memref<272x128xf32, #tpu.memory_space<vmem>>, vector<8x128xf32>,
    %c8 = arith.constant 8 : index
    %c0_14 = arith.constant 0 : index
    %16 = vector.load %arg15[%c8, %c0_14] : memref<272x128xf32, #tpu.memory_space<vmem>>, vector<256x128xf32>
    tpu.vector_store %arg15[%c8, %c0_14], %11 {strides = array<i32>} : memref<272x128xf32, #tpu.memory_space<vmem>>, vector<256x128xf32>,
    %17 = tpu.iota {dimensions = array<i32: 0>} : vector<256x1xi32>
    %c16_i32 = arith.constant 16 : i32
    %c0_i32 = arith.constant 0 : i32
    %18 = arith.cmpi eq, %c16_i32, %c0_i32 : i32
    %c1_i32 = arith.constant 1 : i32
    %19 = arith.select %18, %c1_i32, %c16_i32 : i32
    %20 = vector.broadcast %19 : i32 to vector<256x1xi32>
    %21 = arith.remsi %17, %20 : vector<256x1xi32>
    %c0_i32_15 = arith.constant 0 : i32
    %22 = vector.broadcast %c0_i32_15 : i32 to vector<256x1xi32>
    %23 = arith.cmpi ne, %21, %22 : vector<256x1xi32>
    %c0_i32_16 = arith.constant 0 : i32
    %24 = vector.broadcast %c0_i32_16 : i32 to vector<256x1xi32>
    %25 = arith.cmpi slt, %21, %24 : vector<256x1xi32>
    %c0_i32_17 = arith.constant 0 : i32
    %26 = arith.cmpi slt, %19, %c0_i32_17 : i32
    %27 = vector.broadcast %26 : i1 to vector<256x1xi1>
    %28 = vector.broadcast %27 : vector<256x1xi1> to vector<256x1xi1>
    %29 = arith.xori %25, %28 : vector<256x1xi1>
    %30 = arith.andi %29, %23 : vector<256x1xi1>
    %31 = vector.broadcast %19 : i32 to vector<256x1xi32>
    %32 = arith.addi %21, %31 : vector<256x1xi32>
    %33 = arith.select %30, %32, %21 : vector<256x1xi1>, vector<256x1xi32>
    %c0_i32_18 = arith.constant 0 : i32
    %34 = vector.broadcast %c0_i32_18 : i32 to vector<256x1xi32>
    %35 = arith.cmpi eq, %33, %34 : vector<256x1xi32>
    %c7 = arith.constant 7 : index
    %c0_19 = arith.constant 0 : index
    %36 = vector.load %arg15[%c7, %c0_19] : memref<272x128xf32, #tpu.memory_space<vmem>>, vector<256x128xf32>
    %cst_20 = arith.constant 0.000000e+00 : f32
    %37 = vector.shape_cast %35 : vector<256x1xi1> to vector<256x1xi1>
    %38 = vector.broadcast %37 : vector<256x1xi1> to vector<256x128xi1>
    %39 = vector.broadcast %cst_20 : f32 to vector<256x128xf32>
    %40 = arith.select %38, %39, %36 : vector<256x128xi1>, vector<256x128xf32>
    %c15_i32 = arith.constant 15 : i32
    %41 = vector.broadcast %c15_i32 : i32 to vector<256x1xi32>
    %42 = arith.cmpi eq, %33, %41 : vector<256x1xi32>
    %c9 = arith.constant 9 : index
    %c0_21 = arith.constant 0 : index
    %43 = vector.load %arg15[%c9, %c0_21] : memref<272x128xf32, #tpu.memory_space<vmem>>, vector<256x128xf32>
    %cst_22 = arith.constant 0.000000e+00 : f32
    %44 = vector.shape_cast %42 : vector<256x1xi1> to vector<256x1xi1>
    %45 = vector.broadcast %44 : vector<256x1xi1> to vector<256x128xi1>
    %46 = vector.broadcast %cst_22 : f32 to vector<256x128xf32>
    %47 = arith.select %45, %46, %43 : vector<256x128xi1>, vector<256x128xf32>
    %cst_23 = arith.constant 0.000000e+00 : bf16
    %48 = vector.broadcast %cst_23 : bf16 to vector<16x384xbf16>
    %c0_24 = arith.constant 0 : index
    %c0_25 = arith.constant 0 : index
    %49 = vector.load %arg16[%c0_24, %c0_25] : memref<288x384xbf16, #tpu.memory_space<vmem>>, vector<16x384xbf16>
    tpu.vector_store %arg16[%c0_24, %c0_25], %48 {strides = array<i32>} : memref<288x384xbf16, #tpu.memory_space<vmem>>, vector<16x384xbf16>,
    %cst_26 = arith.constant 0.000000e+00 : bf16
    %50 = vector.broadcast %cst_26 : bf16 to vector<16x384xbf16>
    %c272 = arith.constant 272 : index
    %c0_27 = arith.constant 0 : index
    %51 = vector.load %arg16[%c272, %c0_27] : memref<288x384xbf16, #tpu.memory_space<vmem>>, vector<16x384xbf16>
    tpu.vector_store %arg16[%c272, %c0_27], %50 {strides = array<i32>} : memref<288x384xbf16, #tpu.memory_space<vmem>>, vector<16x384xbf16>,
    %52 = arith.truncf %40 : vector<256x128xf32> to vector<256x128xbf16>
    %c16 = arith.constant 16 : index
    %c0_28 = arith.constant 0 : index
    %53 = vector.load %arg16[%c16, %c0_28] : memref<288x384xbf16, #tpu.memory_space<vmem>>, vector<256x128xbf16>
    tpu.vector_store %arg16[%c16, %c0_28], %52 {strides = array<i32>} : memref<288x384xbf16, #tpu.memory_space<vmem>>, vector<256x128xbf16>,
    %54 = arith.truncf %11 : vector<256x128xf32> to vector<256x128xbf16>
    %c16_29 = arith.constant 16 : index
    %c128 = arith.constant 128 : index
    %55 = vector.load %arg16[%c16_29, %c128] : memref<288x384xbf16, #tpu.memory_space<vmem>>, vector<256x128xbf16>
    tpu.vector_store %arg16[%c16_29, %c128], %54 {strides = array<i32>} : memref<288x384xbf16, #tpu.memory_space<vmem>>, vector<256x128xbf16>,
    %56 = arith.truncf %47 : vector<256x128xf32> to vector<256x128xbf16>
    %c16_30 = arith.constant 16 : index
    %c256 = arith.constant 256 : index
    %57 = vector.load %arg16[%c16_30, %c256] : memref<288x384xbf16, #tpu.memory_space<vmem>>, vector<256x128xbf16>
    tpu.vector_store %arg16[%c16_30, %c256], %56 {strides = array<i32>} : memref<288x384xbf16, #tpu.memory_space<vmem>>, vector<256x128xbf16>,
    %c0_31 = arith.constant 0 : index
    %c0_32 = arith.constant 0 : index
    %58 = vector.load %arg16[%c0_31, %c0_32] : memref<288x384xbf16, #tpu.memory_space<vmem>>, vector<256x384xbf16>
    %c0_33 = arith.constant 0 : index
    %c0_34 = arith.constant 0 : index
    %c0_35 = arith.constant 0 : index
    %59 = vector.load %arg5[%c0_33, %c0_34, %c0_35] : memref<3x384x128xbf16, #tpu.memory_space<vmem>>, vector<1x384x128xbf16>
    %60 = vector.shape_cast %59 : vector<1x384x128xbf16> to vector<384x128xbf16>
    %cst_36 = arith.constant dense<0.000000e+00> : vector<256x128xf32>
    %61 = tpu.matmul %58, %60, %cst_36 {dimension_numbers = #tpu.dot_dimension_numbers<[1], [0], [0], [1], [0, 0, 1, 1], [], []>} : vector<256x384xbf16>, vector<384x128xbf16>, vector<256x128xf32> -> vector<256x128xf32>
    %c16_37 = arith.constant 16 : index
    %c0_38 = arith.constant 0 : index
    %62 = vector.load %arg16[%c16_37, %c0_38] : memref<288x384xbf16, #tpu.memory_space<vmem>>, vector<256x384xbf16>
    %c1 = arith.constant 1 : index
    %c0_39 = arith.constant 0 : index
    %c0_40 = arith.constant 0 : index
    %63 = vector.load %arg5[%c1, %c0_39, %c0_40] : memref<3x384x128xbf16, #tpu.memory_space<vmem>>, vector<1x384x128xbf16>
    %64 = vector.shape_cast %63 : vector<1x384x128xbf16> to vector<384x128xbf16>
    %cst_41 = arith.constant dense<0.000000e+00> : vector<256x128xf32>
    %65 = tpu.matmul %62, %64, %cst_41 {dimension_numbers = #tpu.dot_dimension_numbers<[1], [0], [0], [1], [0, 0, 1, 1], [], []>} : vector<256x384xbf16>, vector<384x128xbf16>, vector<256x128xf32> -> vector<256x128xf32>
    %66 = arith.addf %61, %65 : vector<256x128xf32>
    %c32 = arith.constant 32 : index
    %c0_42 = arith.constant 0 : index
    %67 = vector.load %arg16[%c32, %c0_42] : memref<288x384xbf16, #tpu.memory_space<vmem>>, vector<256x384xbf16>
    %c2 = arith.constant 2 : index
    %c0_43 = arith.constant 0 : index
    %c0_44 = arith.constant 0 : index
    %68 = vector.load %arg5[%c2, %c0_43, %c0_44] : memref<3x384x128xbf16, #tpu.memory_space<vmem>>, vector<1x384x128xbf16>
    %69 = vector.shape_cast %68 : vector<1x384x128xbf16> to vector<384x128xbf16>
    %cst_45 = arith.constant dense<0.000000e+00> : vector<256x128xf32>
    %70 = tpu.matmul %67, %69, %cst_45 {dimension_numbers = #tpu.dot_dimension_numbers<[1], [0], [0], [1], [0, 0, 1, 1], [], []>} : vector<256x384xbf16>, vector<384x128xbf16>, vector<256x128xf32> -> vector<256x128xf32>
    %71 = arith.addf %66, %70 : vector<256x128xf32>
    %c0_46 = arith.constant 0 : index
    %c0_47 = arith.constant 0 : index
    %72 = vector.load %arg6[%c0_46, %c0_47] : memref<1x128xf32, #tpu.memory_space<vmem>>, vector<1x128xf32>
    %73 = vector.broadcast %72 : vector<1x128xf32> to vector<256x128xf32>
    %74 = arith.mulf %71, %73 : vector<256x128xf32>
    %c0_48 = arith.constant 0 : index
    %c0_49 = arith.constant 0 : index
    %75 = vector.load %arg7[%c0_48, %c0_49] : memref<1x128xf32, #tpu.memory_space<vmem>>, vector<1x128xf32>
    %76 = vector.broadcast %75 : vector<1x128xf32> to vector<256x128xf32>
    %77 = arith.addf %74, %76 : vector<256x128xf32>
    %cst_50 = arith.constant 0.000000e+00 : f32
    %78 = vector.broadcast %cst_50 : f32 to vector<256x128xf32>
    %79 = arith.maximumf %77, %78 : vector<256x128xf32>
    %80 = arith.truncf %79 : vector<256x128xf32> to vector<256x128xbf16>
    %c0_51 = arith.constant 0 : index
    %c0_52 = arith.constant 0 : index
    %81 = vector.load %arg8[%c0_51, %c0_52] : memref<128x128xbf16, #tpu.memory_space<vmem>>, vector<128x128xbf16>
    %cst_53 = arith.constant dense<0.000000e+00> : vector<256x128xf32>
    %82 = tpu.matmul %80, %81, %cst_53 {dimension_numbers = #tpu.dot_dimension_numbers<[1], [0], [0], [1], [0, 0, 1, 1], [], []>} : vector<256x128xbf16>, vector<128x128xbf16>, vector<256x128xf32> -> vector<256x128xf32>
    %c0_54 = arith.constant 0 : index
    %c0_55 = arith.constant 0 : index
    %83 = vector.load %arg9[%c0_54, %c0_55] : memref<1x128xf32, #tpu.memory_space<vmem>>, vector<1x128xf32>
    %84 = vector.broadcast %83 : vector<1x128xf32> to vector<256x128xf32>
    %85 = arith.mulf %82, %84 : vector<256x128xf32>
    %c0_56 = arith.constant 0 : index
    %c0_57 = arith.constant 0 : index
    %86 = vector.load %arg10[%c0_56, %c0_57] : memref<1x128xf32, #tpu.memory_space<vmem>>, vector<1x128xf32>
    %87 = vector.broadcast %86 : vector<1x128xf32> to vector<256x128xf32>
    %88 = arith.addf %85, %87 : vector<256x128xf32>
    %c0_58 = arith.constant 0 : index
    %c0_59 = arith.constant 0 : index
    %89 = vector.load %arg11[%c0_58, %c0_59] : memref<128x128xbf16, #tpu.memory_space<vmem>>, vector<128x128xbf16>
    %cst_60 = arith.constant dense<0.000000e+00> : vector<256x128xf32>
    %90 = tpu.matmul %1, %89, %cst_60 {dimension_numbers = #tpu.dot_dimension_numbers<[1], [0], [0], [1], [0, 0, 1, 1], [], []>} : vector<256x128xbf16>, vector<128x128xbf16>, vector<256x128xf32> -> vector<256x128xf32>
    %c0_61 = arith.constant 0 : index
    %c0_62 = arith.constant 0 : index
    %91 = vector.load %arg12[%c0_61, %c0_62] : memref<1x128xf32, #tpu.memory_space<vmem>>, vector<1x128xf32>
    %92 = vector.broadcast %91 : vector<1x128xf32> to vector<256x128xf32>
    %93 = arith.mulf %90, %92 : vector<256x128xf32>
    %c0_63 = arith.constant 0 : index
    %c0_64 = arith.constant 0 : index
    %94 = vector.load %arg13[%c0_63, %c0_64] : memref<1x128xf32, #tpu.memory_space<vmem>>, vector<1x128xf32>
    %95 = vector.broadcast %94 : vector<1x128xf32> to vector<256x128xf32>
    %96 = arith.addf %93, %95 : vector<256x128xf32>
    %97 = arith.addf %88, %96 : vector<256x128xf32>
    %cst_65 = arith.constant 0.000000e+00 : f32
    %98 = vector.broadcast %cst_65 : f32 to vector<256x128xf32>
    %99 = arith.maximumf %97, %98 : vector<256x128xf32>
    %c0_66 = arith.constant 0 : index
    %c0_67 = arith.constant 0 : index
    %c0_68 = arith.constant 0 : index
    %100 = vector.load %arg14[%c0_66, %c0_67, %c0_68] : memref<1x256x128xf32, #tpu.memory_space<vmem>>, vector<1x256x128xf32>
    %101 = vector.shape_cast %100 : vector<1x256x128xf32> to vector<256x128xf32>
    %102 = vector.shape_cast %99 : vector<256x128xf32> to vector<1x256x128xf32>
    tpu.vector_store %arg14[%c0_66, %c0_67, %c0_68], %102 {strides = array<i32>} : memref<1x256x128xf32, #tpu.memory_space<vmem>>, vector<1x256x128xf32>,
    return
  }
  func.func @transform_0(%arg0: i32) -> (i32, i32, i32) {
    %c0_i32 = arith.constant 0 : i32
    %c0_i32_0 = arith.constant 0 : i32
    %c0_i32_1 = arith.constant 0 : i32
    return %arg0, %c0_i32, %c0_i32_0 : i32, i32, i32
  }
  func.func @transform_1(%arg0: i32) -> (i32, i32) {
    %c0_i32 = arith.constant 0 : i32
    %c0_i32_0 = arith.constant 0 : i32
    %c0_i32_1 = arith.constant 0 : i32
    return %c0_i32, %c0_i32_0 : i32, i32
  }
  func.func @transform_2(%arg0: i32) -> (i32, i32) {
    %c0_i32 = arith.constant 0 : i32
    %c0_i32_0 = arith.constant 0 : i32
    %c0_i32_1 = arith.constant 0 : i32
    return %c0_i32, %c0_i32_0 : i32, i32
  }
  func.func @transform_3(%arg0: i32) -> (i32, i32) {
    %c0_i32 = arith.constant 0 : i32
    %c0_i32_0 = arith.constant 0 : i32
    %c0_i32_1 = arith.constant 0 : i32
    return %c0_i32, %c0_i32_0 : i32, i32
  }
  func.func @transform_4(%arg0: i32) -> (i32, i32, i32) {
    %c0_i32 = arith.constant 0 : i32
    %c0_i32_0 = arith.constant 0 : i32
    %c0_i32_1 = arith.constant 0 : i32
    %c0_i32_2 = arith.constant 0 : i32
    return %c0_i32, %c0_i32_0, %c0_i32_1 : i32, i32, i32
  }
  func.func @transform_5(%arg0: i32) -> (i32, i32) {
    %c0_i32 = arith.constant 0 : i32
    %c0_i32_0 = arith.constant 0 : i32
    %c0_i32_1 = arith.constant 0 : i32
    return %c0_i32, %c0_i32_0 : i32, i32
  }
  func.func @transform_6(%arg0: i32) -> (i32, i32) {
    %c0_i32 = arith.constant 0 : i32
    %c0_i32_0 = arith.constant 0 : i32
    %c0_i32_1 = arith.constant 0 : i32
    return %c0_i32, %c0_i32_0 : i32, i32
  }
  func.func @transform_7(%arg0: i32) -> (i32, i32) {
    %c0_i32 = arith.constant 0 : i32
    %c0_i32_0 = arith.constant 0 : i32
    %c0_i32_1 = arith.constant 0 : i32
    return %c0_i32, %c0_i32_0 : i32, i32
  }
  func.func @transform_8(%arg0: i32) -> (i32, i32) {
    %c0_i32 = arith.constant 0 : i32
    %c0_i32_0 = arith.constant 0 : i32
    %c0_i32_1 = arith.constant 0 : i32
    return %c0_i32, %c0_i32_0 : i32, i32
  }
  func.func @transform_9(%arg0: i32) -> (i32, i32) {
    %c0_i32 = arith.constant 0 : i32
    %c0_i32_0 = arith.constant 0 : i32
    %c0_i32_1 = arith.constant 0 : i32
    return %c0_i32, %c0_i32_0 : i32, i32
  }
  func.func @transform_10(%arg0: i32) -> (i32, i32) {
    %c0_i32 = arith.constant 0 : i32
    %c0_i32_0 = arith.constant 0 : i32
    %c0_i32_1 = arith.constant 0 : i32
    return %c0_i32, %c0_i32_0 : i32, i32
  }
  func.func @transform_11(%arg0: i32) -> (i32, i32) {
    %c0_i32 = arith.constant 0 : i32
    %c0_i32_0 = arith.constant 0 : i32
    %c0_i32_1 = arith.constant 0 : i32
    return %c0_i32, %c0_i32_0 : i32, i32
  }
  func.func @transform_12(%arg0: i32) -> (i32, i32) {
    %c0_i32 = arith.constant 0 : i32
    %c0_i32_0 = arith.constant 0 : i32
    %c0_i32_1 = arith.constant 0 : i32
    return %c0_i32, %c0_i32_0 : i32, i32
  }
  func.func @transform_13(%arg0: i32) -> (i32, i32, i32) {
    %c0_i32 = arith.constant 0 : i32
    %c0_i32_0 = arith.constant 0 : i32
    %c0_i32_1 = arith.constant 0 : i32
    return %arg0, %c0_i32, %c0_i32_0 : i32, i32, i32
  }
}

</mosaic_0001>

<bundles_post_ra>
// kernel: bottleneck_pallas.1
= control target key start
LH: loop header
LB: loop body
LE: loop exit
PB: predicated region body
PF: predicated region fallthrough
CT: control target
= control target key end

     0   :  { %s6113_s25 = smov 0   ;;  %s8029_s0 = inlined_call_operand.vmem [shape: bf16[2,256,128], index: 0, kind: input, shape index: {}]   ;;  %s8030_s1 = inlined_call_operand.vmem [shape: bf16[128,128], index: 1, kind: input, shape index: {}]   ;;  %s8031_s2 = inlined_call_operand.vmem [shape: f32[1,128], index: 2, kind: input, shape index: {}]   ;;  %s8032_s3 = inlined_call_operand.vmem [shape: f32[1,128], index: 3, kind: input, shape index: {}]   ;;  %s8033_s4 = inlined_call_operand.vmem [shape: bf16[3,384,128], index: 4, kind: input, shape index: {}]   ;;  %s8034_s5 = inlined_call_operand.vmem [shape: f32[1,128], index: 5, kind: input, shape index: {}]   ;;  %s8035_s6 = inlined_call_operand.vmem [shape: f32[1,128], index: 6, kind: input, shape index: {}]   ;;  %s8036_s7 = inlined_call_operand.vmem [shape: bf16[128,128], index: 7, kind: input, shape index: {}]   ;;  %s8037_s8 = inlined_call_operand.vmem [shape: f32[1,128], index: 8, kind: input, shape index: {}]   ;;  %s8038_s9 = inlined_call_operand.vmem [shape: f32[1,128], index: 9, kind: input, shape index: {}]   ;;  %s8039_s10 = inlined_call_operand.vmem [shape: bf16[128,128], index: 10, kind: input, shape index: {}]   ;;  %s8040_s11 = inlined_call_operand.vmem [shape: f32[1,128], index: 11, kind: input, shape index: {}]   ;;  %s8041_s12 = inlined_call_operand.vmem [shape: f32[1,128], index: 12, kind: input, shape index: {}]   ;;  %s8042_s13 = inlined_call_operand.vmem [shape: f32[2,256,128], index: 13, kind: output, shape index: {}]  }
   0x1 LB: > { %s4336_s26 = sadd.s32 4294967295, %s6038_s25   ;;  %p4340_p0 = scmp.ge.s32.totalorder %s6038_s25, 1  ;;  %s6038_s25 = sphi %s6113_s25, %s23_s25  }
   0x2   : > { %p387_p1 = scmp.lt.s32.totalorder %s6038_s25, 3 }
   0x4   : > { %p388_p2 = pnand %p4340_p0, %p387_p1 }
   0x6   : > { %391 = sbr.rel (%p388_p2) target bundleno = 1109 (0x455), region = 72 }
   0xd   : > { %v5904_v0 = vld [vmem:[%s8030_s1] sm:$0xff]   ;;  %p431_p3 = scmp.lt.s32.totalorder %s4336_s26, 1  ;;  %v5905_v1 = vld [vmem:[%s8030_s1 + $0x8] sm:$0xff]   ;;  %v5906_v2 = vld [vmem:[%s8030_s1 + $0x10] sm:$0xff]   ;;  %v6040_v42 = vmov 0.0   ;;  %v939_v44 = vlaneseq  ;;  %vm6041_vm2 = vmmov 1  }
   0xe   : > { %5413 = vmatprep.subr.bf16.mxu0 %v5904_v0  ;;  %v5907_v3 = vld [vmem:[%s8030_s1 + $0x18] sm:$0xff]   ;;  %v5908_v5 = vld [vmem:[%s8030_s1 + $0x20] sm:$0xff]   ;;  %v5909_v6 = vld [vmem:[%s8030_s1 + $0x28] sm:$0xff]   ;;  %905 = vst [vmem:[#allocation2] sm:$0xff] %v6040_v42 }
   0xf   : > { %s8289_s26 = smov (!%p431_p3, %s4336_s26), 1  ;;  %5414 = vmatpush3.bf16.msra.mxu0 %v5904_v0  ;;  %v5910_v7 = vld [vmem:[%s8030_s1 + $0x30] sm:$0xff]   ;;  %v5911_v8 = vld [vmem:[%s8030_s1 + $0x38] sm:$0xff]   ;;  %v5928_v9 = vld [vmem:[%s8033_s4 + $0x140] sm:$0xff]   ;;  %906 = vst [vmem:[#allocation2 + $0x108] sm:$0xff] %v6040_v42  ;;  %v6229_v46 = vshrl.u32 %v939_v44, 7 }
  0x10   : > { %5415 = vmatprep.subr.bf16.mxu0 %v5905_v1  ;;  %s4563_s16 = sshll.u32 %s8289_s26, 7  ;;  %v5932_v11 = vld [vmem:[%s8033_s4 + $0x100] sm:$0xff]   ;;  %v5934_v14 = vld [vmem:[%s8033_s4 + $0x108] sm:$0xff]   ;;  %v5937_v17 = vld [vmem:[%s8033_s4 + $0x110] sm:$0xff]   ;;  %s4564_s27 = sshll.u32 %s8289_s26, 8 }
  0x11   : > { %s6136_s19 = scalar_lea.vmem %s8029_s0, %s4563_s16  ;;  %v5933_v13 = vld [vmem:[%s8033_s4 + $0xc0] sm:$0xff]   ;;  %4957 = vmatprep.subr.bf16.mxu1 %v5932_v11  ;;  %v5929_v15 = vld [vmem:[%s8033_s4 + $0x148] sm:$0xff]   ;;  %v5930_v18 = vld [vmem:[%s8033_s4 + $0x150] sm:$0xff]   ;;  %v6235_v48 = vadd.s32 8, %v6229_v46  ;;  %v976_v51 = vand.u32 15, %v6229_v46  ;;  %v6249_v54 = vadd.s32 24, %v6229_v46  ;;  %s7854_s29 = scalar_lea.vmem %s8042_s13, %s4564_s27 }
  0x12   : > { %v5912_v4 = vld [vmem:[%s6136_s19] sm:$0xff]   ;;  %v5913_v10 = vld [vmem:[%s6136_s19 + $0x8] sm:$0xff]   ;;  %v5914_v12 = vld [vmem:[%s6136_s19 + $0x10] sm:$0xff]   ;;  %4958 = vmatpush3.bf16.msra.mxu1 %v5933_v13  ;;  %v6253_v56 = vadd.s32 16, %v6229_v46  ;;  %v6256_v57 = vadd.s32 40, %v6229_v46  ;;  %v6261_v60 = vadd.s32 56, %v6229_v46 }
  0x13   : > { %5416 = vmatpush3.bf16.msra.mxu0 %v5905_v1  ;;  %5429 = vmatprep.mubr.bf16.mxu0 %v5912_v4  ;;  %v5935_v16 = vld [vmem:[%s8033_s4 + $0xc8] sm:$0xff]   ;;  %v5938_v19 = vld [vmem:[%s8033_s4 + $0xd0] sm:$0xff]   ;;  %v5915_v20 = vld [vmem:[%s6136_s19 + $0x18] sm:$0xff]   ;;  %v983_v52 = vand.u32 15, %v6235_v48  ;;  %v997_v55 = vand.u32 15, %v6249_v54  ;;  %v6265_v62 = vadd.s32 32, %v6229_v46 }
  0x14   : > { %5417 = vmatprep.subr.bf16.mxu0 %v5906_v2  ;;  %4959 = vmatprep.subr.bf16.mxu1 %v5934_v14  ;;  %v5916_v21 = vld [vmem:[%s6136_s19 + $0x20] sm:$0xff]   ;;  %v5931_v22 = vld [vmem:[%s8033_s4 + $0x158] sm:$0xff]   ;;  %v5917_v24 = vld [vmem:[%s6136_s19 + $0x28] sm:$0xff]   ;;  %v990_v58 = vand.u32 15, %v6253_v56  ;;  %v1011_v59 = vand.u32 15, %v6256_v57  ;;  %v1025_v61 = vand.u32 15, %v6261_v60 }
  0x15   : > { %v5936_v23 = vld [vmem:[%s8033_s4 + $0x160] sm:$0xff]   ;;  %v5918_v25 = vld [vmem:[%s6136_s19 + $0x30] sm:$0xff]   ;;  %v5919_v26 = vld [vmem:[%s6136_s19 + $0x38] sm:$0xff]   ;;  %v6268_v63 = vadd.s32 72, %v6229_v46  ;;  %v1004_v1 = vand.u32 15, %v6265_v62  ;;  %v6292_v11 = vadd.s32 64, %v6229_v46 }
  0x16   : > { %4960 = vmatpush3.bf16.msra.mxu1 %v5935_v16  ;;  %v5920_v27 = vld [vmem:[%s6136_s19 + $0x40] sm:$0xff]   ;;  %v5921_v28 = vld [vmem:[%s6136_s19 + $0x48] sm:$0xff]   ;;  %v5922_v29 = vld [vmem:[%s6136_s19 + $0x50] sm:$0xff]   ;;  %v6355_v42 = vadd.s32 176, %v6229_v46  ;;  %v6359_v44 = vadd.s32 192, %v6229_v46  ;;  %vm5861_vm0 = vcmp.ne.s32.totalorder %v976_v51, 0 }
  0x17   : > { %5418 = vmatpush3.bf16.msra.mxu0 %v5906_v2  ;;  %4961 = vmatprep.subr.bf16.mxu1 %v5937_v17  ;;  %v5923_v30 = vld [vmem:[%s6136_s19 + $0x58] sm:$0xff]   ;;  %v5924_v31 = vld [vmem:[%s6136_s19 + $0x60] sm:$0xff]   ;;  %v5925_v32 = vld [vmem:[%s6136_s19 + $0x68] sm:$0xff]   ;;  %v1039_v2 = vand.u32 15, %v6268_v63  ;;  %v6304_v17 = vadd.s32 80, %v6229_v46  ;;  %vm5877_vm1 = vcmp.ne.s32.totalorder %v983_v52, 15 }
  0x18   : > { %5419 = vmatprep.subr.bf16.mxu0 %v5907_v3  ;;  %v5926_v33 = vld [vmem:[%s6136_s19 + $0x70] sm:$0xff]   ;;  %v5927_v34 = vld [vmem:[%s6136_s19 + $0x78] sm:$0xff]   ;;  %v5942_v37 = vld [vmem:[%s8033_s4 + $0x120] sm:$0xff]   ;;  %vm6425_vm5 = vcmp.ne.s32.totalorder %v997_v55, 15  ;;  %vm6431_vm6 = vcmp.ne.s32.totalorder %v990_v58, 0  ;;  %vm6475_vm9 = vcmp.ne.s32.totalorder %v1011_v59, 15 }
  0x19   : > { %v5939_v35 = vld [vmem:[%s8033_s4 + $0x118] sm:$0xff]   ;;  %v5943_v38 = vld [vmem:[%s8033_s4 + $0xe0] sm:$0xff]   ;;  %v5944_v39 = vld [vmem:[%s8033_s4 + $0x128] sm:$0xff]   ;;  %vm6504_vm11 = vcmp.ne.s32.totalorder %v1025_v61, 15  ;;  %vm6530_vm12 = vcmp.ne.s32.totalorder %v1004_v1, 0  ;;  %vm6559_vm14 = vcmp.ne.s32.totalorder %v1039_v2, 15 }
  0x1a   : > { %4962 = vmatpush3.bf16.msra.mxu1 %v5938_v19  ;;  %v5940_v36 = vld [vmem:[%s8033_s4 + $0xd8] sm:$0xff]   ;;  %v5945_v40 = vld [vmem:[%s8033_s4 + $0xe8] sm:$0xff]   ;;  %v5947_v43 = vld [vmem:[%s8033_s4 + $0x130] sm:$0xff]  }
  0x1b   : > { %5420 = vmatpush3.bf16.msra.mxu0 %v5907_v3  ;;  %4963 = vmatprep.subr.bf16.mxu1 %v5939_v35  ;;  %v5941_v41 = vld [vmem:[%s8033_s4 + $0x168] sm:$0xff]   ;;  %v5948_v45 = vld [vmem:[%s8033_s4 + $0xf0] sm:$0xff]   ;;  %v5949_v47 = vld [vmem:[%s8033_s4 + $0x138] sm:$0xff]   ;;  %v6276_v3 = vadd.s32 88, %v6229_v46  ;;  %v6340_v35 = vadd.s32 128, %v6229_v46 }
  0x1c   : > { %5421 = vmatprep.subr.bf16.mxu0 %v5908_v5  ;;  %v5950_v49 = vld [vmem:[%s8033_s4 + $0xf8] sm:$0xff]   ;;  %v5946_v50 = vld [vmem:[%s8033_s4 + $0x170] sm:$0xff]   ;;  %v5952_v0 = vld [vmem:[%s8033_s4 + $0x40] sm:$0xff]  }
  0x1d   : > { %v5951_v53 = vld [vmem:[%s8033_s4 + $0x178] sm:$0xff]   ;;  %vm6410_vm3 = vmpackc.low %vm6041_vm2, %vm5861_vm0  ;;  %v5969_v48 = vld [vmem:[%s8033_s4 + $0x180] sm:$0xff]  }
  0x1e   : > { %4964 = vmatpush3.bf16.msra.mxu1 %v5940_v36  ;;  %vm6415_vm4 = vmpackc.low %vm5877_vm1, %vm6041_vm2  ;;  %v5971_v55 = vld [vmem:[%s8033_s4 + $0x1c8] sm:$0xff]   ;;  %v5974_v57 = vld [vmem:[%s8033_s4 + $0x1d0] sm:$0xff]  }
  0x1f   : > { %5422 = vmatpush3.bf16.msra.mxu0 %v5908_v5  ;;  %4965 = vmatprep.subr.bf16.mxu1 %v5942_v37  ;;  %v6280_v5 = vadd.s32 48, %v6229_v46  ;;  %v5968_v37 = vld [vmem:[%s8033_s4 + $0x1c0] sm:$0xff]   ;;  %vm6460_vm7 = vmpackc.low %vm6425_vm5, %vm6041_vm2  ;;  %v5975_v61 = vld [vmem:[%s8033_s4 + $0x190] sm:$0xff]  }
  0x20   : > { %5423 = vmatprep.subr.bf16.mxu0 %v5909_v6  ;;  %vm6469_vm8 = vmpackc.low %vm6041_vm2, %vm6431_vm6  ;;  %v5956_v62 = vld [vmem:[%s8033_s4 + $0x50] sm:$0xff]   ;;  %v5978_v63 = vld [vmem:[%s8033_s4 + $0x198] sm:$0xff]  }
  0x21   : > { %vm6494_vm10 = vmpackc.low %vm6475_vm9, %vm6041_vm2 }
  0x22   : > { %4966 = vmatpush3.bf16.msra.mxu1 %v5943_v38  ;;  %v6347_v38 = vadd.s32 144, %v6229_v46  ;;  %vm6553_vm13 = vmpackc.low %vm6504_vm11, %vm6041_vm2 }
  0x23   : > { %5424 = vmatpush3.bf16.msra.mxu0 %v5909_v6  ;;  %4967 = vmatprep.subr.bf16.mxu1 %v5944_v39  ;;  %v6283_v6 = vadd.s32 104, %v6229_v46  ;;  %vm6567_vm15 = vmpackc.low %vm6041_vm2, %vm6530_vm12 }
  0x24   : > { %5425 = vmatprep.subr.bf16.mxu0 %v5910_v7  ;;  %vm6582_vm0 = vmpackc.low %vm6559_vm14, %vm6041_vm2 }
  0x26   : > { %4968 = vmatpush3.bf16.msra.mxu1 %v5945_v40  ;;  %v6351_v40 = vadd.s32 160, %v6229_v46 }
  0x27   : > { %5426 = vmatpush3.bf16.msra.mxu0 %v5910_v7  ;;  %4969 = vmatprep.subr.bf16.mxu1 %v5947_v43 }
  0x28   : > { %5427 = vmatprep.subr.bf16.mxu0 %v5911_v8 }
  0x2a   : > { %4970 = vmatpush3.bf16.msra.mxu1 %v5948_v45 }
  0x2b   : > { %5428 = vmatpush3.bf16.msra.mxu0 %v5911_v8  ;;  %4971 = vmatprep.subr.bf16.mxu1 %v5949_v47  ;;  %v6363_v47 = vadd.s32 208, %v6229_v46 }
  0x2c   : > { %5461 = vmatprep.subr.bf16.mxu0 %v5928_v9 }
  0x2e   : > { %5430 = vmatmul.mubr.bf16.vlgmr.msra.gmra.mrb[0].mxu0 %v5913_v10  ;;  %4972 = vmatpush3.bf16.msra.mxu1 %v5950_v49 }
  0x2f   : > { %5433 = vmatprep.mubr.bf16.mxu0 %v5914_v12  ;;  %5462 = vmatpush3.bf16.msra.mxu0 %v5928_v9  ;;  %v6288_v9 = vadd.s32 120, %v6229_v46  ;;  %v6295_v12 = vadd.s32 136, %v6229_v46 }
  0x30   : > { %5463 = vmatprep.subr.bf16.mxu0 %v5929_v15  ;;  %5229 = vmatprep.subr.bf16.mxu1 %v5968_v37  ;;  %v6377_v37 = vld [vmem:[%s8032_s3] ss:$0 sm:$0xff] }
  0x33   : > { %5464 = vmatpush3.bf16.msra.mxu0 %v5929_v15  ;;  %v6300_v15 = vadd.s32 152, %v6229_v46 }
  0x34   : > { %5465 = vmatprep.subr.bf16.mxu0 %v5930_v18 }
  0x36   : > { %5434 = vmatmul.mubr.bf16.gmra.mrb[4].mxu0 %v5915_v20 }
  0x37   : > { %5437 = vmatprep.mubr.bf16.mxu0 %v5916_v21  ;;  %5466 = vmatpush3.bf16.msra.mxu0 %v5930_v18  ;;  %v6307_v18 = vadd.s32 168, %v6229_v46  ;;  %v6312_v21 = vadd.s32 184, %v6229_v46 }
  0x38   : > { %5467 = vmatprep.subr.bf16.mxu0 %v5931_v22 }
  0x3b   : > { %5468 = vmatpush3.bf16.msra.mxu0 %v5931_v22 }
  0x3c   : > { %5469 = vmatprep.subr.bf16.mxu0 %v5936_v23 }
  0x3e   : > { %5438 = vmatmul.mubr.bf16.gmra.mrb[8].mxu0 %v5917_v24  ;;  %v6319_v24 = vadd.s32 200, %v6229_v46 }
  0x3f   : > { %5441 = vmatprep.mubr.bf16.mxu0 %v5918_v25  ;;  %5470 = vmatpush3.bf16.msra.mxu0 %v5936_v23  ;;  %v6316_v23 = vadd.s32 96, %v6229_v46 }
  0x40   : > { %5471 = vmatprep.subr.bf16.mxu0 %v5941_v41 }
  0x43   : > { %5472 = vmatpush3.bf16.msra.mxu0 %v5941_v41 }
  0x44   : > { %5473 = vmatprep.subr.bf16.mxu0 %v5946_v50 }
  0x46   : > { %5442 = vmatmul.mubr.bf16.gmra.mrb[12].mxu0 %v5919_v26 }
  0x47   : > { %5445 = vmatprep.mubr.bf16.mxu0 %v5920_v27  ;;  %5474 = vmatpush3.bf16.msra.mxu0 %v5946_v50  ;;  %v6324_v27 = vadd.s32 216, %v6229_v46  ;;  %v6369_v50 = vld [vmem:[%s8031_s2] ss:$0 sm:$0xff] }
  0x48   : > { %5475 = vmatprep.subr.bf16.mxu0 %v5951_v53 }
  0x4b   : > { %5476 = vmatpush3.bf16.msra.mxu0 %v5951_v53  ;;  %v6372_v53 = vadd.s32 224, %v6229_v46 }
  0x4c   : > { %5093 = vmatprep.subr.bf16.mxu0 %v5952_v0 }
  0x4e   : > { %5446 = vmatmul.mubr.bf16.gmra.mrb[16].mxu0 %v5921_v28 }
  0x4f   : > { %5449 = vmatprep.mubr.bf16.mxu0 %v5922_v29  ;;  %v6328_v29 = vadd.s32 112, %v6229_v46 }
  0x56   : > { %5450 = vmatmul.mubr.bf16.gmra.mrb[20].mxu0 %v5923_v30  ;;  %v6331_v30 = vadd.s32 232, %v6229_v46 }
  0x57   : > { %5453 = vmatprep.mubr.bf16.mxu0 %v5924_v31 }
  0x5e   : > { %5454 = vmatmul.mubr.bf16.gmra.mrb[24].mxu0 %v5925_v32 }
  0x5f   : > { %5457 = vmatprep.mubr.bf16.mxu0 %v5926_v33  ;;  %v6336_v33 = vadd.s32 248, %v6229_v46 }
  0x66   : > { %5458 = vmatmul.mubr.bf16.gmra.mrb[28].mxu0 %v5927_v34 }
 0x101   : > { %v5431_v0 = vpop.f32.mrb[0].mxu0 }
 0x102   : > { %v804_v45 = vmul.f32 %v5431_v0, %v6369_v50  ;;  %v668_v43 = vpop.f32.mrb[1].mxu0 }
 0x103   : > { %v802_v49 = vmul.f32 %v6369_v50, %v668_v43  ;;  %v5432_v39 = vpop.f32.mrb[2].mxu0  ;;  %v6389_v43 = vadd.s32 240, %v6229_v46 }
 0x104   : > { %v843_v36 = vadd.f32 %v6377_v37, %v804_v45  ;;  %v805_v34 = vmul.f32 %v5432_v39, %v6369_v50  ;;  %v671_v32 = vpop.f32.mrb[3].mxu0 }
 0x105   : > { %v841_v31 = vadd.f32 %v6377_v37, %v802_v49  ;;  %v803_v28 = vmul.f32 %v6369_v50, %v671_v32 }
 0x106   : > { %v875_v26 = vmax.f32 %v843_v36, 0.0  ;;  %v844_v25 = vadd.f32 %v6377_v37, %v805_v34 }
 0x107   : > { %v873_v22 = vmax.f32 %v841_v31, 0.0  ;;  %v842_v0 = vadd.f32 %v6377_v37, %v803_v28 }
 0x108   : > { %909 = vst [vmem:[#allocation2 + $0x18] sm:$0xff] %v875_v26  ;;  %v876_v41 = vmax.f32 %v844_v25, 0.0 }
 0x109   : > { %907 = vst [vmem:[#allocation2 + $0x8] sm:$0xff] %v873_v22  ;;  %v874_v45 = vmax.f32 %v842_v0, 0.0  ;;  %v5435_v20 = vpop.f32.mrb[4].mxu0 }
 0x10a   : > { %910 = vst [vmem:[#allocation2 + $0x20] sm:$0xff] %v876_v41  ;;  %v808_v39 = vmul.f32 %v5435_v20, %v6369_v50  ;;  %v684_v49 = vpop.f32.mrb[5].mxu0  ;;  %v6392_v19 = vpack.c.bf16 %v876_v41, %v875_v26 }
 0x10b   : > { %908 = vst [vmem:[#allocation2 + $0x10] sm:$0xff] %v874_v45  ;;  %v806_v31 = vmul.f32 %v6369_v50, %v684_v49  ;;  %v5436_v28 = vpop.f32.mrb[6].mxu0  ;;  %v6396_v34 = vpack.c.bf16 %v874_v45, %v873_v22 }
 0x10c   : > { %v847_v25 = vadd.f32 %v6377_v37, %v808_v39  ;;  %v809_v36 = vmul.f32 %v5436_v28, %v6369_v50  ;;  %v687_v0 = vpop.f32.mrb[7].mxu0  ;;  %v8114_v28 = vmov 0 }
 0x10d   : > { %v845_v16 = vadd.f32 %v6377_v37, %v806_v31  ;;  %v807_v20 = vmul.f32 %v6369_v50, %v687_v0  ;;  %2102 = vmatprep.mubr.bf16.mxu1 %v6396_v34  ;;  %v8115_v28 = vsel %vm6415_vm4, 4294967295, %v8114_v28 }
 0x10e   : > { %v879_v26 = vmax.f32 %v847_v25, 0.0  ;;  %v848_v41 = vadd.f32 %v6377_v37, %v809_v36  ;;  %8116 = vst [vmem:[#allocation4_spill] sm:$0xff] %v8115_v28 }
 0x10f   : > { %v877_v22 = vmax.f32 %v845_v16, 0.0  ;;  %v846_v45 = vadd.f32 %v6377_v37, %v807_v20 }
 0x110   : > { %913 = vst [vmem:[#allocation2 + $0x38] sm:$0xff] %v879_v26  ;;  %v880_v39 = vmax.f32 %v848_v41, 0.0  ;;  %v1388_v31 = vld [vmem:[#allocation2 + $0x7] sm:$0xff] }
 0x111   : > { %911 = vst [vmem:[#allocation2 + $0x28] sm:$0xff] %v877_v22  ;;  %v878_v46 = vmax.f32 %v846_v45, 0.0  ;;  %v5439_v51 = vpop.f32.mrb[8].mxu0  ;;  %v1550_v20 = vld [vmem:[#allocation2 + $0x19] sm:$0xff] }
 0x112   : > { %914 = vst [vmem:[#allocation2 + $0x40] sm:$0xff] %v880_v39  ;;  %v812_v52 = vmul.f32 %v5439_v51, %v6369_v50  ;;  %v700_v16 = vpop.f32.mrb[9].mxu0  ;;  %v1389_v25 = vld [vmem:[#allocation2 + $0xf] sm:$0xff]  ;;  %v6435_v45 = vpack.c.bf16 %v880_v39, %v879_v26  ;;  %v5953_v41 = vld [vmem:[%s8033_s4] sm:$0xff]  }
 0x113   : > { %v1548_v36 = vld [vmem:[#allocation2 + $0x9] sm:$0xff]  ;;  %v1549_v0 = vld [vmem:[#allocation2 + $0x11] sm:$0xff]  ;;  %912 = vst [vmem:[#allocation2 + $0x30] sm:$0xff] %v878_v46  ;;  %v810_v51 = vmul.f32 %v6369_v50, %v700_v16  ;;  %v5440_v32 = vpop.f32.mrb[10].mxu0  ;;  %v6438_v14 = vpack.c.bf16 %v1389_v25, %v1388_v31  ;;  %v6442_v54 = vpack.c.bf16 %v878_v46, %v877_v22  ;;  %v8121_v22 = vmov 0 }
 0x114   : > { %v6440_v13 = vpack.c.bf16 %v1549_v0, %v1548_v36  ;;  %v851_v56 = vadd.f32 %v6377_v37, %v812_v52  ;;  %v813_v58 = vmul.f32 %v5440_v32, %v6369_v50  ;;  %v703_v26 = vpop.f32.mrb[11].mxu0  ;;  %v8122_v22 = vsel %vm6460_vm7, 4294967295, %v8121_v22  ;;  %v5972_v25 = vld [vmem:[%s8033_s4 + $0x188] sm:$0xff]  }
 0x115   : > { %v849_v39 = vadd.f32 %v6377_v37, %v810_v51  ;;  %v811_v16 = vmul.f32 %v6369_v50, %v703_v26  ;;  %4568 = vmatmul.mubr.msk.bf16.vlgmr.msra.gmra.mrb[0].mxu1 %vm6410_vm3, %v6438_v14  ;;  %8123 = vst [vmem:[#allocation5_spill] sm:$0xff] %v8122_v22  ;;  %v1390_v51 = vld [vmem:[#allocation2 + $0x17] sm:$0xff] }
 0x116   : > { %5477 = vmatprep.mubr.msk.bf16.mxu0 %vm6415_vm4, %v6440_v13  ;;  %v883_v32 = vmax.f32 %v851_v56, 0.0  ;;  %v852_v46 = vadd.f32 %v6377_v37, %v813_v58  ;;  %2110 = vmatprep.mubr.bf16.mxu1 %v6392_v19  ;;  %v1391_v56 = vld [vmem:[#allocation2 + $0x1f] sm:$0xff] }
 0x117   : > { %5230 = vmatpush3.bf16.msra.mxu1 %v5969_v48  ;;  %v881_v36 = vmax.f32 %v849_v39, 0.0  ;;  %v850_v0 = vadd.f32 %v6377_v37, %v811_v16  ;;  %v8129_v16 = vmov 0  ;;  %v6514_v7 = vpack.c.bf16 %v1391_v56, %v1390_v51 }
 0x118   : > { %5231 = vmatprep.subr.bf16.mxu1 %v5971_v55  ;;  %917 = vst [vmem:[#allocation2 + $0x58] sm:$0xff] %v883_v32  ;;  %v884_v59 = vmax.f32 %v852_v46, 0.0  ;;  %v1551_v48 = vld [vmem:[#allocation2 + $0x21] sm:$0xff]  ;;  %v8130_v16 = vsel %vm6494_vm10, 4294967295, %v8129_v16  ;;  %v8137_v56 = vmov 0 }
 0x119   : > { %915 = vst [vmem:[#allocation2 + $0x48] sm:$0xff] %v881_v36  ;;  %v882_v58 = vmax.f32 %v850_v0, 0.0  ;;  %v5443_v26 = vpop.f32.mrb[12].mxu0  ;;  %v6489_v39 = vpack.c.bf16 %v1551_v48, %v1550_v20  ;;  %8131 = vst [vmem:[#allocation7_spill] sm:$0xff] %v8130_v16  ;;  %v5954_v0 = vld [vmem:[%s8033_s4 + $0x48] sm:$0xff]   ;;  %v8138_v56 = vsel %vm6553_vm13, 4294967295, %v8137_v56 }
 0x11a   : > { %918 = vst [vmem:[#allocation2 + $0x60] sm:$0xff] %v884_v59  ;;  %v816_v55 = vmul.f32 %v5443_v26, %v6369_v50  ;;  %v716_v10 = vpop.f32.mrb[13].mxu0  ;;  %v1552_v46 = vld [vmem:[#allocation2 + $0x29] sm:$0xff]  ;;  %v1553_v8 = vld [vmem:[#allocation2 + $0x31] sm:$0xff]  ;;  %v6508_v52 = vpack.c.bf16 %v884_v59, %v883_v32  ;;  %8139 = vst [vmem:[#allocation9_spill] sm:$0xff] %v8138_v56 }
 0x11b   : > { %8128 = vst [vmem:[#allocation6_spill] sm:$0xff] %v6489_v39  ;;  %5232 = vmatpush3.bf16.msra.mxu1 %v5972_v25  ;;  %916 = vst [vmem:[#allocation2 + $0x50] sm:$0xff] %v882_v58  ;;  %v814_v48 = vmul.f32 %v6369_v50, %v716_v10  ;;  %v5444_v26 = vpop.f32.mrb[14].mxu0  ;;  %5478 = vmatmul.mubr.msk.bf16.vlgmr.msra.gmra.mrb[32].mxu0 %vm6460_vm7, %v6489_v39  ;;  %v6516_v4 = vpack.c.bf16 %v1553_v8, %v1552_v46  ;;  %v5955_v59 = vld [vmem:[%s8033_s4 + $0x8] sm:$0xff]   ;;  %v5957_v20 = vld [vmem:[%s8033_s4 + $0x10] sm:$0xff]   ;;  %v8171_v39 = vand.u32 15, %v6292_v11 }
 0x11c   : > { %v6518_v60 = vpack.c.bf16 %v882_v58, %v881_v36  ;;  %v855_v32 = vadd.f32 %v6377_v37, %v816_v55  ;;  %v817_v25 = vmul.f32 %v5444_v26, %v6369_v50  ;;  %5094 = vmatpush3.bf16.msra.mxu0 %v5953_v41  ;;  %v719_v10 = vpop.f32.mrb[15].mxu0  ;;  %5233 = vmatprep.subr.bf16.mxu1 %v5974_v57  ;;  %v5977_v36 = vld [vmem:[%s8033_s4 + $0x1d8] sm:$0xff]   ;;  %v5962_v58 = vld [vmem:[%s8033_s4 + $0x68] sm:$0xff]   ;;  %v5964_v11 = vld [vmem:[%s8033_s4 + $0x70] sm:$0xff]  }
 0x11d   : > { %8134 = vst [vmem:[#allocation8_spill] sm:$0xff] %v6516_v4  ;;  %v853_v51 = vadd.f32 %v6377_v37, %v814_v48  ;;  %v815_v41 = vmul.f32 %v6369_v50, %v719_v10  ;;  %4572 = vmatmul.mubr.msk.bf16.gmra.mrb[4].mxu1 %vm6469_vm8, %v6514_v7  ;;  %5481 = vmatprep.mubr.msk.bf16.mxu0 %vm6494_vm10, %v6516_v4  ;;  %v1554_v48 = vld [vmem:[#allocation2 + $0x39] sm:$0xff] }
 0x11e   : > { %v887_v1 = vmax.f32 %v855_v32, 0.0  ;;  %v856_v57 = vadd.f32 %v6377_v37, %v817_v25  ;;  %2118 = vmatprep.mubr.bf16.mxu1 %v6442_v54  ;;  %5095 = vmatprep.subr.bf16.mxu0 %v5954_v0  ;;  %v1393_v32 = vld [vmem:[#allocation2 + $0x2f] sm:$0xff]  ;;  %v5996_v0 = vld [vmem:[%s8033_s4 + $0x220] sm:$0xff]  }
 0x11f   : > { %v885_v55 = vmax.f32 %v853_v51, 0.0  ;;  %v854_v46 = vadd.f32 %v6377_v37, %v815_v41  ;;  %5234 = vmatpush3.bf16.msra.mxu1 %v5975_v61  ;;  %v8145_v61 = vmov 0  ;;  %v5958_v51 = vld [vmem:[%s8033_s4 + $0x58] sm:$0xff]   ;;  %v1392_v41 = vld [vmem:[#allocation2 + $0x27] sm:$0xff] }
 0x120   : > { %921 = vst [vmem:[#allocation2 + $0x78] sm:$0xff] %v887_v1  ;;  %v888_v2 = vmax.f32 %v856_v57, 0.0  ;;  %v1555_v26 = vld [vmem:[#allocation2 + $0x41] sm:$0xff]  ;;  %5096 = vmatpush3.bf16.msra.mxu0 %v5955_v59  ;;  %5235 = vmatprep.subr.bf16.mxu1 %v5977_v36  ;;  %v8146_v61 = vsel %vm6582_vm0, 4294967295, %v8145_v61 }
 0x121   : > { %919 = vst [vmem:[#allocation2 + $0x68] sm:$0xff] %v885_v55  ;;  %v886_v25 = vmax.f32 %v854_v46, 0.0  ;;  %v5447_v10 = vpop.f32.mrb[16].mxu0  ;;  %v6577_v8 = vpack.c.bf16 %v1555_v26, %v1554_v48  ;;  %8147 = vst [vmem:[#allocation11_spill] sm:$0xff] %v8146_v61  ;;  %5097 = vmatprep.subr.bf16.mxu0 %v5956_v62  ;;  %v8148_v48 = vand.u32 15, %v6276_v3  ;;  %v8151_v26 = vand.u32 15, %v6280_v5 }
 0x122   : > { %922 = vst [vmem:[#allocation2 + $0x80] sm:$0xff] %v888_v2  ;;  %v820_v59 = vmul.f32 %v5447_v10, %v6369_v50  ;;  %v732_v36 = vpop.f32.mrb[17].mxu0  ;;  %v1556_v57 = vld [vmem:[#allocation2 + $0x49] sm:$0xff]  ;;  %v1557_v46 = vld [vmem:[#allocation2 + $0x51] sm:$0xff]  ;;  %v6602_v16 = vpack.c.bf16 %v888_v2, %v887_v1  ;;  %v6608_v3 = vpack.c.bf16 %v1393_v32, %v1392_v41  ;;  %v5979_v5 = vld [vmem:[%s8033_s4 + $0x1e0] sm:$0xff]  }
 0x123   : > { %8144 = vst [vmem:[#allocation10_spill] sm:$0xff] %v6577_v8  ;;  %vm6592_vm1 = vcmp.ne.s32.totalorder %v8148_v48, 15  ;;  %vm6598_vm5 = vcmp.ne.s32.totalorder %v8151_v26, 0  ;;  %920 = vst [vmem:[#allocation2 + $0x70] sm:$0xff] %v886_v25  ;;  %v818_v10 = vmul.f32 %v6369_v50, %v732_v36  ;;  %v5448_v4 = vpop.f32.mrb[18].mxu0  ;;  %5482 = vmatmul.mubr.msk.bf16.gmra.mrb[36].mxu0 %vm6553_vm13, %v6577_v8  ;;  %v6610_v48 = vpack.c.bf16 %v1557_v46, %v1556_v57  ;;  %v5959_v26 = vld [vmem:[%s8033_s4 + $0x18] sm:$0xff]  }
 0x124   : > { %v6612_v22 = vpack.c.bf16 %v886_v25, %v885_v55  ;;  %v859_v1 = vadd.f32 %v6377_v37, %v820_v59  ;;  %v821_v2 = vmul.f32 %v5448_v4, %v6369_v50  ;;  %v735_v36 = vpop.f32.mrb[19].mxu0  ;;  %5098 = vmatpush3.bf16.msra.mxu0 %v5957_v20  ;;  %5236 = vmatpush3.bf16.msra.mxu1 %v5978_v63  ;;  %v5980_v55 = vld [vmem:[%s8033_s4 + $0x1a0] sm:$0xff]   ;;  %vm6636_vm6 = vmpackc.low %vm6592_vm1, %vm6041_vm2  ;;  %v8155_v4 = vmov 0  ;;  %v5981_v63 = vld [vmem:[%s8033_s4 + $0x1e8] sm:$0xff]  }
 0x125   : > { %8154 = vst [vmem:[#allocation12_spill] sm:$0xff] %v6610_v48  ;;  %v857_v32 = vadd.f32 %v6377_v37, %v818_v10  ;;  %v819_v25 = vmul.f32 %v6369_v50, %v735_v36  ;;  %4576 = vmatmul.mubr.msk.bf16.gmra.mrb[8].mxu1 %vm6567_vm15, %v6608_v3  ;;  %5485 = vmatprep.mubr.msk.bf16.mxu0 %vm6582_vm0, %v6610_v48  ;;  %v8156_v4 = vsel %vm6636_vm6, 4294967295, %v8155_v4  ;;  %v5960_v20 = vld [vmem:[%s8033_s4 + $0x60] sm:$0xff]   ;;  %vm6651_vm9 = vmpackc.low %vm6041_vm2, %vm6598_vm5  ;;  %v8160_v46 = vand.u32 15, %v6283_v6  ;;  %v5983_v36 = vld [vmem:[%s8033_s4 + $0x1a8] sm:$0xff]  }
 0x126   : > { %8157 = vst [vmem:[#allocation13_spill] sm:$0xff] %v8156_v4  ;;  %v891_v59 = vmax.f32 %v859_v1, 0.0  ;;  %v860_v41 = vadd.f32 %v6377_v37, %v821_v2  ;;  %2126 = vmatprep.mubr.bf16.mxu1 %v6435_v45  ;;  %5099 = vmatprep.subr.bf16.mxu0 %v5958_v51  ;;  %v1395_v2 = vld [vmem:[#allocation2 + $0x3f] sm:$0xff]  ;;  %v1394_v48 = vld [vmem:[#allocation2 + $0x37] sm:$0xff]  ;;  %vm6706_vm1 = vcmp.ne.s32.totalorder %v8171_v39, 0 }
 0x127   : > { %vm6657_vm11 = vcmp.ne.s32.totalorder %v8160_v46, 15  ;;  %v889_v10 = vmax.f32 %v857_v32, 0.0  ;;  %v858_v1 = vadd.f32 %v6377_v37, %v819_v25  ;;  %v5961_v62 = vld [vmem:[%s8033_s4 + $0x20] sm:$0xff]   ;;  %5237 = vmatprep.subr.bf16.mxu1 %v5979_v5  ;;  %v8164_v5 = vmov 0  ;;  %v5984_v8 = vld [vmem:[%s8033_s4 + $0x1f0] sm:$0xff]   ;;  %v5986_v39 = vld [vmem:[%s8033_s4 + $0x1f8] sm:$0xff]  }
 0x128   : > { %925 = vst [vmem:[#allocation2 + $0x98] sm:$0xff] %v891_v59  ;;  %v892_v6 = vmax.f32 %v860_v41, 0.0  ;;  %v1558_v46 = vld [vmem:[#allocation2 + $0x59] sm:$0xff]  ;;  %v1559_v61 = vld [vmem:[#allocation2 + $0x61] sm:$0xff]  ;;  %5100 = vmatpush3.bf16.msra.mxu0 %v5959_v26  ;;  %5238 = vmatpush3.bf16.msra.mxu1 %v5980_v55  ;;  %vm6673_vm12 = vmpackc.low %vm6657_vm11, %vm6041_vm2 }
 0x129   : > { %923 = vst [vmem:[#allocation2 + $0x88] sm:$0xff] %v889_v10  ;;  %v890_v51 = vmax.f32 %v858_v1, 0.0  ;;  %v5451_v32 = vpop.f32.mrb[20].mxu0  ;;  %v6668_v25 = vpack.c.bf16 %v1559_v61, %v1558_v46  ;;  %v8165_v5 = vsel %vm6673_vm12, 4294967295, %v8164_v5  ;;  %5101 = vmatprep.subr.bf16.mxu0 %v5960_v20  ;;  %5239 = vmatprep.subr.bf16.mxu1 %v5981_v63  ;;  %v8167_v1 = vand.u32 15, %v6288_v9  ;;  %v5965_v61 = vld [vmem:[%s8033_s4 + $0x30] sm:$0xff]  }
 0x12a   : > { %8166 = vst [vmem:[#allocation15_spill] sm:$0xff] %v8165_v5  ;;  %926 = vst [vmem:[#allocation2 + $0xa0] sm:$0xff] %v892_v6  ;;  %v824_v41 = vmul.f32 %v5451_v32, %v6369_v50  ;;  %v748_v56 = vpop.f32.mrb[21].mxu0  ;;  %v1560_v26 = vld [vmem:[#allocation2 + $0x69] sm:$0xff]  ;;  %v1561_v55 = vld [vmem:[#allocation2 + $0x71] sm:$0xff]  ;;  %v6687_v46 = vpack.c.bf16 %v892_v6, %v891_v59  ;;  %v6693_v32 = vpack.c.bf16 %v1395_v2, %v1394_v48 }
 0x12b   : > { %8163 = vst [vmem:[#allocation14_spill] sm:$0xff] %v6668_v25  ;;  %vm6680_vm14 = vcmp.ne.s32.totalorder %v8167_v1, 15  ;;  %924 = vst [vmem:[#allocation2 + $0x90] sm:$0xff] %v890_v51  ;;  %v822_v20 = vmul.f32 %v6369_v50, %v748_v56  ;;  %v5452_v63 = vpop.f32.mrb[22].mxu0  ;;  %5486 = vmatmul.mubr.msk.bf16.gmra.mrb[40].mxu0 %vm6636_vm6, %v6668_v25  ;;  %v6695_v9 = vpack.c.bf16 %v1561_v55, %v1560_v26  ;;  %v5963_v48 = vld [vmem:[%s8033_s4 + $0x28] sm:$0xff]   ;;  %v8177_v26 = vand.u32 15, %v6295_v12 }
 0x12c   : > { %v6697_v1 = vpack.c.bf16 %v890_v51, %v889_v10  ;;  %v863_v59 = vadd.f32 %v6377_v37, %v824_v41  ;;  %v825_v6 = vmul.f32 %v5452_v63, %v6369_v50  ;;  %v751_v56 = vpop.f32.mrb[23].mxu0  ;;  %5102 = vmatpush3.bf16.msra.mxu0 %v5961_v62  ;;  %5240 = vmatpush3.bf16.msra.mxu1 %v5983_v36  ;;  %v5985_v10 = vld [vmem:[%s8033_s4 + $0x1b0] sm:$0xff]   ;;  %vm6735_vm5 = vmpackc.low %vm6680_vm14, %vm6041_vm2  ;;  %v8174_v41 = vmov 0  ;;  %v5987_v12 = vld [vmem:[%s8033_s4 + $0x1b8] sm:$0xff]  }
 0x12d   : > { %8170 = vst [vmem:[#allocation16_spill] sm:$0xff] %v6695_v9  ;;  %v861_v2 = vadd.f32 %v6377_v37, %v822_v20  ;;  %v823_v51 = vmul.f32 %v6369_v50, %v751_v56  ;;  %4580 = vmatmul.mubr.msk.bf16.gmra.mrb[12].mxu1 %vm6651_vm9, %v6693_v32  ;;  %5489 = vmatprep.mubr.msk.bf16.mxu0 %vm6673_vm12, %v6695_v9  ;;  %v8175_v41 = vsel %vm6735_vm5, 4294967295, %v8174_v41  ;;  %vm6741_vm11 = vcmp.ne.s32.totalorder %v8177_v26, 15  ;;  %vm6749_vm12 = vmpackc.low %vm6041_vm2, %vm6706_vm1  ;;  %v8258_v31 = vld [vmem:[#allocation8_spill] sm:$0xff] }
 0x12e   : > { %v895_v62 = vmax.f32 %v863_v59, 0.0  ;;  %v864_v36 = vadd.f32 %v6377_v37, %v825_v6  ;;  %2134 = vmatprep.mubr.bf16.mxu1 %v6518_v60  ;;  %8176 = vst [vmem:[#allocation17_spill] sm:$0xff] %v8175_v41  ;;  %5103 = vmatprep.subr.bf16.mxu0 %v5962_v58  ;;  %v1562_v6 = vld [vmem:[#allocation2 + $0x79] sm:$0xff]  ;;  %vm6764_vm14 = vmpackc.low %vm6741_vm11, %vm6041_vm2  ;;  %v8265_v59 = vld [vmem:[#allocation11_spill] sm:$0xff] }
 0x12f   : > { %v893_v20 = vmax.f32 %v861_v2, 0.0  ;;  %v862_v63 = vadd.f32 %v6377_v37, %v823_v51  ;;  %5241 = vmatprep.subr.bf16.mxu1 %v5984_v8  ;;  %v1397_v2 = vld [vmem:[#allocation2 + $0x4f] sm:$0xff]  ;;  %v8183_v8 = vmov 0 }
 0x130   : > { %929 = vst [vmem:[#allocation2 + $0xb8] sm:$0xff] %v895_v62  ;;  %v896_v58 = vmax.f32 %v864_v36, 0.0  ;;  %v1563_v56 = vld [vmem:[#allocation2 + $0x81] sm:$0xff]  ;;  %5104 = vmatpush3.bf16.msra.mxu0 %v5963_v48  ;;  %5242 = vmatpush3.bf16.msra.mxu1 %v5985_v10  ;;  %v8184_v8 = vsel %vm6764_vm14, 4294967295, %v8183_v8  ;;  %v5966_v36 = vld [vmem:[%s8033_s4 + $0x78] sm:$0xff]  }
 0x131   : > { %927 = vst [vmem:[#allocation2 + $0xa8] sm:$0xff] %v893_v20  ;;  %v894_v4 = vmax.f32 %v862_v63, 0.0  ;;  %v5455_v51 = vpop.f32.mrb[24].mxu0  ;;  %v6759_v26 = vpack.c.bf16 %v1563_v56, %v1562_v6  ;;  %8185 = vst [vmem:[#allocation19_spill] sm:$0xff] %v8184_v8  ;;  %5105 = vmatprep.subr.bf16.mxu0 %v5964_v11  ;;  %5243 = vmatprep.subr.bf16.mxu1 %v5986_v39  ;;  %v1396_v63 = vld [vmem:[#allocation2 + $0x47] sm:$0xff] }
 0x132   : > { %930 = vst [vmem:[#allocation2 + $0xc0] sm:$0xff] %v896_v58  ;;  %v828_v48 = vmul.f32 %v5455_v51, %v6369_v50  ;;  %v764_v10 = vpop.f32.mrb[25].mxu0  ;;  %v1564_v6 = vld [vmem:[#allocation2 + $0x89] sm:$0xff]  ;;  %v1565_v56 = vld [vmem:[#allocation2 + $0x91] sm:$0xff]  ;;  %v6772_v5 = vpack.c.bf16 %v896_v58, %v895_v62  ;;  %v6778_v11 = vpack.c.bf16 %v1397_v2, %v1396_v63  ;;  %v8187_v58 = vand.u32 15, %v6300_v15  ;;  %v6806_v15 = vld [vmem:[%s8033_s4 + $0x80] sm:$0xff]  }
 0x133   : > { %8182 = vst [vmem:[#allocation18_spill] sm:$0xff] %v6759_v26  ;;  %928 = vst [vmem:[#allocation2 + $0xb0] sm:$0xff] %v894_v4  ;;  %v826_v55 = vmul.f32 %v6369_v50, %v764_v10  ;;  %v5456_v9 = vpop.f32.mrb[26].mxu0  ;;  %5490 = vmatmul.mubr.msk.bf16.gmra.mrb[44].mxu0 %vm6735_vm5, %v6759_v26  ;;  %v6780_v39 = vpack.c.bf16 %v1565_v56, %v1564_v6  ;;  %v6782_v25 = vpack.c.bf16 %v894_v4, %v893_v20  ;;  %v5967_v2 = vld [vmem:[%s8033_s4 + $0x38] sm:$0xff]   ;;  %v8193_v56 = vmov 0 }
 0x134   : > { %v867_v51 = vadd.f32 %v6377_v37, %v828_v48  ;;  %v829_v28 = vmul.f32 %v5456_v9, %v6369_v50  ;;  %v767_v62 = vpop.f32.mrb[27].mxu0  ;;  %vm6788_vm1 = vcmp.ne.s32.totalorder %v8187_v58, 15  ;;  %5106 = vmatpush3.bf16.msra.mxu0 %v5965_v61  ;;  %5244 = vmatpush3.bf16.msra.mxu1 %v5987_v12  ;;  %v8190_v12 = vand.u32 15, %v6304_v17  ;;  %v1398_v58 = vld [vmem:[#allocation2 + $0x57] sm:$0xff] }
 0x135   : > { %8186 = vst [vmem:[#allocation20_spill] sm:$0xff] %v6780_v39  ;;  %v865_v20 = vadd.f32 %v6377_v37, %v826_v55  ;;  %v827_v4 = vmul.f32 %v6369_v50, %v767_v62  ;;  %4584 = vmatmul.mubr.msk.bf16.gmra.mrb[16].mxu1 %vm6749_vm12, %v6778_v11  ;;  %5493 = vmatprep.mubr.msk.bf16.mxu0 %vm6764_vm14, %v6780_v39  ;;  %vm6820_vm14 = vmpackc.low %vm6788_vm1, %vm6041_vm2  ;;  %v8195_v55 = vand.u32 15, %v6307_v18  ;;  %v8202_v48 = vand.u32 15, %v6312_v21  ;;  %v8267_v18 = vld [vmem:[#allocation14_spill] sm:$0xff] }
 0x136   : > { %v899_v9 = vmax.f32 %v867_v51, 0.0  ;;  %v868_v61 = vadd.f32 %v6377_v37, %v829_v28  ;;  %2142 = vmatprep.mubr.bf16.mxu1 %v6508_v52  ;;  %vm6812_vm11 = vcmp.ne.s32.totalorder %v8190_v12, 0  ;;  %5107 = vmatprep.subr.bf16.mxu0 %v5966_v36  ;;  %v8194_v56 = vsel %vm6820_vm14, 4294967295, %v8193_v56  ;;  %v1399_v28 = vld [vmem:[#allocation2 + $0x5f] sm:$0xff] }
 0x137   : > { %v897_v63 = vmax.f32 %v865_v20, 0.0  ;;  %v866_v6 = vadd.f32 %v6377_v37, %v827_v4  ;;  %vm6826_vm5 = vcmp.ne.s32.totalorder %v8195_v55, 15  ;;  %v1566_v36 = vld [vmem:[#allocation2 + $0x99] sm:$0xff]  ;;  %vm6835_vm1 = vmpackc.low %vm6041_vm2, %vm6812_vm11  ;;  %vm6850_vm11 = vcmp.ne.s32.totalorder %v8202_v48, 15 }
 0x138   : > { %933 = vst [vmem:[#allocation2 + $0xd8] sm:$0xff] %v899_v9  ;;  %v900_v51 = vmax.f32 %v868_v61, 0.0  ;;  %v1567_v62 = vld [vmem:[#allocation2 + $0xa1] sm:$0xff]  ;;  %5108 = vmatpush3.bf16.msra.mxu0 %v5967_v2  ;;  %vm6844_vm6 = vmpackc.low %vm6826_vm5, %vm6041_vm2  ;;  %v6860_v17 = vpack.c.bf16 %v1399_v28, %v1398_v58 }
 0x139   : > { %931 = vst [vmem:[#allocation2 + $0xc8] sm:$0xff] %v897_v63  ;;  %v898_v20 = vmax.f32 %v866_v6, 0.0  ;;  %v5459_v10 = vpop.f32.mrb[28].mxu0  ;;  %v6830_v4 = vpack.c.bf16 %v1567_v62, %v1566_v36  ;;  %5509 = vmatprep.subr.bf16.mxu0 %v6806_v15  ;;  %v8200_v6 = vmov 0  ;;  %v1401_v36 = vld [vmem:[#allocation2 + $0x6f] sm:$0xff]  ;;  %v1411_v49 = vld [vmem:[#allocation2 + $0xbf] sm:$0xff] }
 0x13a   : > { %934 = vst [vmem:[#allocation2 + $0xe0] sm:$0xff] %v900_v51  ;;  %v832_v61 = vmul.f32 %v5459_v10, %v6369_v50  ;;  %v780_v12 = vpop.f32.mrb[29].mxu0  ;;  %v1568_v55 = vld [vmem:[#allocation2 + $0xa9] sm:$0xff]  ;;  %v1569_v2 = vld [vmem:[#allocation2 + $0xb1] sm:$0xff]  ;;  %v8201_v6 = vsel %vm6844_vm6, 4294967295, %v8200_v6  ;;  %v6854_v62 = vpack.c.bf16 %v900_v51, %v899_v9  ;;  %v8205_v51 = vand.u32 15, %v6316_v23 }
 0x13b   : > { %932 = vst [vmem:[#allocation2 + $0xd0] sm:$0xff] %v898_v20  ;;  %v830_v10 = vmul.f32 %v6369_v50, %v780_v12  ;;  %v5460_v8 = vpop.f32.mrb[30].mxu0  ;;  %5494 = vmatmul.mubr.msk.bf16.gmra.mrb[48].mxu0 %vm6820_vm14, %v6830_v4  ;;  %v6862_v39 = vpack.c.bf16 %v1569_v2, %v1568_v55  ;;  %v6864_v41 = vpack.c.bf16 %v898_v20, %v897_v63  ;;  %vm6883_vm14 = vmpackc.low %vm6850_vm11, %vm6041_vm2  ;;  %v8206_v23 = vmov 0  ;;  %v1570_v55 = vld [vmem:[#allocation2 + $0xb9] sm:$0xff] }
 0x13c   : > { %v871_v21 = vadd.f32 %v6377_v37, %v832_v61  ;;  %v833_v48 = vmul.f32 %v5460_v8, %v6369_v50  ;;  %v783_v9 = vpop.f32.mrb[31].mxu0  ;;  %vm5867_vm5 = vcmp.ne.s32.totalorder %v8205_v51, 0  ;;  %v8207_v23 = vsel %vm6883_vm14, 4294967295, %v8206_v23 }
 0x13d   : > { %v869_v12 = vadd.f32 %v6377_v37, %v830_v10  ;;  %v831_v26 = vmul.f32 %v6369_v50, %v783_v9  ;;  %4588 = vmatmul.mubr.msk.bf16.gmra.mrb[20].mxu1 %vm6835_vm1, %v6860_v17  ;;  %5497 = vmatprep.mubr.msk.bf16.mxu0 %vm6844_vm6, %v6862_v39  ;;  %v8208_v50 = vand.u32 15, %v6319_v24  ;;  %vm6891_vm6 = vmpackc.low %vm6041_vm2, %vm5867_vm5  ;;  %v8211_v24 = vmov 0 }
 0x13e   : > { %v903_v63 = vmax.f32 %v871_v21, 0.0  ;;  %v872_v28 = vadd.f32 %v6377_v37, %v833_v48  ;;  %2150 = vmatprep.mubr.bf16.mxu1 %v6612_v22 }
 0x13f   : > { %vm5889_vm0 = vcmp.ne.s32.totalorder %v8208_v50, 15  ;;  %v901_v8 = vmax.f32 %v869_v12, 0.0  ;;  %v870_v58 = vadd.f32 %v6377_v37, %v831_v26  ;;  %v1400_v37 = vld [vmem:[#allocation2 + $0x67] sm:$0xff]  ;;  %v8213_v50 = vand.u32 15, %v6324_v27  ;;  %v1403_v27 = vld [vmem:[#allocation2 + $0x7f] sm:$0xff] }
 0x140   : > { %937 = vst [vmem:[#allocation2 + $0xf8] sm:$0xff] %v903_v63  ;;  %v904_v61 = vmax.f32 %v872_v28, 0.0  ;;  %v1571_v2 = vld [vmem:[#allocation2 + $0xc1] sm:$0xff]  ;;  %vm6898_vm11 = vmpackc.low %vm5889_vm0, %vm6041_vm2  ;;  %v6907_v51 = vpack.c.bf16 %v1401_v36, %v1400_v37 }
 0x141   : > { %935 = vst [vmem:[#allocation2 + $0xe8] sm:$0xff] %v901_v8  ;;  %v902_v10 = vmax.f32 %v870_v58, 0.0  ;;  %v6895_v21 = vpack.c.bf16 %v1571_v2, %v1570_v55  ;;  %v8212_v24 = vsel %vm6898_vm11, 4294967295, %v8211_v24  ;;  %vm5890_vm0 = vcmp.ne.s32.totalorder %v8213_v50, 15  ;;  %v1402_v2 = vld [vmem:[#allocation2 + $0x77] sm:$0xff] }
 0x142   : > { %938 = vst [vmem:[#allocation2 + $0x100] sm:$0xff] %v904_v61  ;;  %v1572_v26 = vld [vmem:[#allocation2 + $0xc9] sm:$0xff]  ;;  %v1573_v48 = vld [vmem:[#allocation2 + $0xd1] sm:$0xff]  ;;  %v6902_v9 = vpack.c.bf16 %v904_v61, %v903_v63  ;;  %v8214_v63 = vand.u32 15, %v6328_v29  ;;  %v8217_v58 = vand.u32 15, %v6331_v30  ;;  %v1574_v61 = vld [vmem:[#allocation2 + $0xd9] sm:$0xff]  ;;  %v6946_v30 = vpack.c.bf16 %v1403_v27, %v1402_v2 }
 0x143   : > { %936 = vst [vmem:[#allocation2 + $0xf0] sm:$0xff] %v902_v10  ;;  %5498 = vmatmul.mubr.msk.bf16.gmra.mrb[52].mxu0 %vm6883_vm14, %v6895_v21  ;;  %v6909_v12 = vpack.c.bf16 %v1573_v48, %v1572_v26  ;;  %v6911_v28 = vpack.c.bf16 %v902_v10, %v901_v8  ;;  %vm6925_vm14 = vmpackc.low %vm5890_vm0, %vm6041_vm2  ;;  %v8215_v8 = vmov 0  ;;  %v8220_v26 = vmov 0  ;;  %v5999_v10 = vld [vmem:[%s8033_s4 + $0x238] sm:$0xff]  }
 0x144   : > { %vm5868_vm5 = vcmp.ne.s32.totalorder %v8214_v63, 0  ;;  %v8216_v8 = vsel %vm6925_vm14, 4294967295, %v8215_v8  ;;  %vm5891_vm13 = vcmp.ne.s32.totalorder %v8217_v58, 15  ;;  %v8222_v50 = vand.u32 15, %v6336_v33 }
 0x145   : > { %4592 = vmatmul.mubr.msk.bf16.gmra.mrb[24].mxu1 %vm6891_vm6, %v6907_v51  ;;  %5501 = vmatprep.mubr.msk.bf16.mxu0 %vm6898_vm11, %v6909_v12  ;;  %vm6934_vm11 = vmpackc.low %vm6041_vm2, %vm5868_vm5  ;;  %v8223_v27 = vand.u32 15, %v6340_v35 }
 0x146   : > { %2158 = vmatprep.mubr.bf16.mxu1 %v6602_v16  ;;  %vm6939_vm0 = vmpackc.low %vm5891_vm13, %vm6041_vm2  ;;  %vm5892_vm13 = vcmp.ne.s32.totalorder %v8222_v50, 15  ;;  %v8230_v50 = vand.u32 15, %v6347_v38  ;;  %v5976_v38 = vld [vmem:[%s8033_s4 + $0x90] sm:$0xff]  }
 0x147   : > { %v8221_v26 = vsel %vm6939_vm0, 4294967295, %v8220_v26  ;;  %vm5869_vm5 = vcmp.ne.s32.totalorder %v8223_v27, 0  ;;  %v5973_v27 = vld [vmem:[%s8033_s4 + $0x88] sm:$0xff]  }
 0x148   : > { %v1575_v55 = vld [vmem:[#allocation2 + $0xe1] sm:$0xff] }
 0x149   : > { %v6931_v36 = vpack.c.bf16 %v1575_v55, %v1574_v61  ;;  %v1578_v63 = vld [vmem:[#allocation2 + $0xf9] sm:$0xff]  ;;  %v1579_v58 = vld [vmem:[#allocation2 + $0x101] sm:$0xff]  ;;  %v8224_v61 = vmov 0  ;;  %v1405_v55 = vld [vmem:[#allocation2 + $0x8f] sm:$0xff] }
 0x14a   : > { %v1576_v29 = vld [vmem:[#allocation2 + $0xe9] sm:$0xff]  ;;  %v1577_v37 = vld [vmem:[#allocation2 + $0xf1] sm:$0xff]  ;;  %v6966_v2 = vpack.c.bf16 %v1579_v58, %v1578_v63  ;;  %v1407_v58 = vld [vmem:[#allocation2 + $0x9f] sm:$0xff] }
 0x14b   : > { %5502 = vmatmul.mubr.msk.bf16.gmra.mrb[56].mxu0 %vm6925_vm14, %v6931_v36  ;;  %v6948_v48 = vpack.c.bf16 %v1577_v37, %v1576_v29  ;;  %vm6962_vm14 = vmpackc.low %vm5892_vm13, %vm6041_vm2  ;;  %v1404_v29 = vld [vmem:[#allocation2 + $0x87] sm:$0xff]  ;;  %v8101_v37 = vmov 0   ;;  %vm5870_vm13 = vcmp.ne.s32.totalorder %v8230_v50, 0  ;;  %v1406_v63 = vld [vmem:[#allocation2 + $0x97] sm:$0xff]  ;;  %v8233_v50 = vand.u32 15, %v6351_v40 }
 0x14c   : > { %v8225_v61 = vsel %vm6962_vm14, 4294967295, %v8224_v61  ;;  %8227 = vst [vmem:[#allocation22_spill] sm:$0xff] %v6966_v2  ;;  %v6976_v35 = vpack.c.bf16 %v1405_v55, %v1404_v29  ;;  %v6994_v29 = vpack.c.bf16 %v1407_v58, %v1406_v63  ;;  %v1409_v63 = vld [vmem:[#allocation2 + $0xaf] sm:$0xff]  ;;  %v5988_v40 = vld [vmem:[%s8033_s4 + $0xa0] sm:$0xff]  }
 0x14d   : > { %4596 = vmatmul.mubr.msk.bf16.gmra.mrb[28].mxu1 %vm6934_vm11, %v6946_v30  ;;  %5505 = vmatprep.mubr.msk.bf16.mxu0 %vm6939_vm0, %v6948_v48  ;;  %8226 = vst [vmem:[#allocation21_spill] sm:$0xff] %v8225_v61  ;;  %vm6969_vm0 = vmpackc.low %vm6041_vm2, %vm5869_vm5  ;;  %v8271_v55 = vld [vmem:[#allocation15_spill] sm:$0xff]  ;;  %v8273_v58 = vld [vmem:[#allocation18_spill] sm:$0xff] }
 0x14e   : > { %2166 = vmatprep.mubr.bf16.mxu1 %v6697_v1  ;;  %vm6989_vm5 = vmpackc.low %vm6041_vm2, %vm5870_vm13  ;;  %vm5871_vm13 = vcmp.ne.s32.totalorder %v8233_v50, 0 }
 0x153   : > { %5506 = vmatmul.mubr.msk.bf16.gmra.mrb[60].mxu0 %vm6962_vm14, %v6966_v2  ;;  %vm7011_vm14 = vmpackc.low %vm6041_vm2, %vm5871_vm13  ;;  %v6001_v2 = vld [vmem:[%s8036_s7 + $0x8] sm:$0xff]  }
 0x154   : > { %2568 = vmatprep.mubr.bf16.mxu0 %v8101_v37 }
 0x155   : > { %4600 = vmatmul.mubr.msk.bf16.gmra.mrb[32].mxu1 %vm6969_vm0, %v6976_v35 }
 0x156   : > { %2174 = vmatprep.mubr.bf16.mxu1 %v6687_v46 }
 0x15b   : > { %2569 = vmatmul.mubr.bf16.vlgmr.msra.gmra.mrb[64].mxu0 %v8101_v37 }
 0x15c   : > { %5510 = vmatpush3.bf16.msra.mxu0 %v6806_v15  ;;  %2576 = vmatprep.mubr.bf16.mxu0 %v6396_v34  ;;  %v5982_v34 = vld [vmem:[%s8033_s4 + $0x98] sm:$0xff]   ;;  %v1408_v15 = vld [vmem:[#allocation2 + $0xa7] sm:$0xff] }
 0x15d   : > { %4604 = vmatmul.mubr.msk.bf16.gmra.mrb[36].mxu1 %vm6989_vm5, %v6994_v29  ;;  %5511 = vmatprep.subr.bf16.mxu0 %v5973_v27  ;;  %v7018_v37 = vpack.c.bf16 %v1409_v63, %v1408_v15  ;;  %v1413_v15 = vld [vmem:[#allocation2 + $0xcf] sm:$0xff] }
 0x15e   : > { %2182 = vmatprep.mubr.bf16.mxu1 %v6782_v25 }
 0x160   : > { %5512 = vmatpush3.bf16.msra.mxu0 %v5973_v27  ;;  %v8236_v27 = vand.u32 15, %v6355_v42  ;;  %v5990_v42 = vld [vmem:[%s8033_s4 + $0xb0] sm:$0xff]  }
 0x161   : > { %5513 = vmatprep.subr.bf16.mxu0 %v5976_v38 }
 0x162   : > { %vm5872_vm13 = vcmp.ne.s32.totalorder %v8236_v27, 0  ;;  %v1412_v27 = vld [vmem:[#allocation2 + $0xc7] sm:$0xff] }
 0x163   : > { %4696 = vmatmul.mubr.msk.bf16.gmra.mrb[68].mxu0 %vm6410_vm3, %v6438_v14  ;;  %v1410_v14 = vld [vmem:[#allocation2 + $0xb7] sm:$0xff]  ;;  %vm7034_vm3 = vmpackc.low %vm6041_vm2, %vm5872_vm13 }
 0x164   : > { %2584 = vmatprep.mubr.bf16.mxu0 %v6392_v19  ;;  %5514 = vmatpush3.bf16.msra.mxu0 %v5976_v38  ;;  %v5989_v38 = vld [vmem:[%s8033_s4 + $0xa8] sm:$0xff]   ;;  %v7041_v63 = vpack.c.bf16 %v1411_v49, %v1410_v14  ;;  %v7064_v49 = vpack.c.bf16 %v1413_v15, %v1412_v27  ;;  %v1415_v15 = vld [vmem:[#allocation2 + $0xdf] sm:$0xff] }
 0x165   : > { %4608 = vmatmul.mubr.msk.bf16.gmra.mrb[40].mxu1 %vm7011_vm14, %v7018_v37  ;;  %5515 = vmatprep.subr.bf16.mxu0 %v5982_v34 }
 0x166   : > { %2190 = vmatprep.mubr.bf16.mxu1 %v6772_v5 }
 0x168   : > { %5516 = vmatpush3.bf16.msra.mxu0 %v5982_v34  ;;  %v8239_v34 = vand.u32 15, %v6359_v44  ;;  %v7073_v44 = vld [vmem:[%s8033_s4 + $0x200] sm:$0xff]  }
 0x169   : > { %5517 = vmatprep.subr.bf16.mxu0 %v5988_v40 }
 0x16a   : > { %vm5873_vm13 = vcmp.ne.s32.totalorder %v8239_v34, 0  ;;  %v1414_v34 = vld [vmem:[#allocation2 + $0xd7] sm:$0xff] }
 0x16b   : > { %4700 = vmatmul.mubr.msk.bf16.gmra.mrb[72].mxu0 %vm6469_vm8, %v6514_v7  ;;  %vm7057_vm10 = vmpackc.low %vm6041_vm2, %vm5873_vm13  ;;  %v7087_v27 = vpack.c.bf16 %v1415_v15, %v1414_v34  ;;  %v1418_v15 = vld [vmem:[#allocation2 + $0xf7] sm:$0xff] }
 0x16c   : > { %2592 = vmatprep.mubr.bf16.mxu0 %v6442_v54  ;;  %5518 = vmatpush3.bf16.msra.mxu0 %v5988_v40  ;;  %v5991_v40 = vld [vmem:[%s8033_s4 + $0xb8] sm:$0xff]  }
 0x16d   : > { %4612 = vmatmul.mubr.msk.bf16.gmra.mrb[44].mxu1 %vm7034_vm3, %v7041_v63  ;;  %5519 = vmatprep.subr.bf16.mxu0 %v5989_v38 }
 0x16e   : > { %2198 = vmatprep.mubr.bf16.mxu1 %v6864_v41 }
 0x170   : > { %5520 = vmatpush3.bf16.msra.mxu0 %v5989_v38  ;;  %v8242_v38 = vand.u32 15, %v6363_v47  ;;  %v8245_v47 = vand.u32 15, %v6372_v53  ;;  %v8248_v53 = vand.u32 15, %v6389_v43  ;;  %v8253_v43 = vld [vmem:[#allocation4_spill] sm:$0xff] }
 0x171   : > { %5521 = vmatprep.subr.bf16.mxu0 %v5990_v42 }
 0x172   : > { %vm5874_vm13 = vcmp.ne.s32.totalorder %v8242_v38, 0  ;;  %v1416_v38 = vld [vmem:[#allocation2 + $0xe7] sm:$0xff] }
 0x173   : > { %4704 = vmatmul.mubr.msk.bf16.gmra.mrb[76].mxu0 %vm6567_vm15, %v6608_v3  ;;  %vm7080_vm7 = vmpackc.low %vm6041_vm2, %vm5874_vm13  ;;  %vm5875_vm13 = vcmp.ne.s32.totalorder %v8245_v47, 0  ;;  %v1419_v47 = vld [vmem:[#allocation2 + $0xff] sm:$0xff] }
 0x174   : > { %2600 = vmatprep.mubr.bf16.mxu0 %v6435_v45  ;;  %5522 = vmatpush3.bf16.msra.mxu0 %v5990_v42  ;;  %v8243_v42 = vmov 0  ;;  %vm7097_vm4 = vmpackc.low %vm6041_vm2, %vm5875_vm13  ;;  %vm5876_vm13 = vcmp.ne.s32.totalorder %v8248_v53, 0  ;;  %v8277_v53 = vld [vmem:[#allocation19_spill] sm:$0xff] }
 0x175   : > { %4616 = vmatmul.mubr.msk.bf16.gmra.mrb[48].mxu1 %vm7057_vm10, %v7064_v49  ;;  %5523 = vmatprep.subr.bf16.mxu0 %v5991_v40  ;;  %v8244_v42 = vsel %vm7080_vm7, 4294967295, %v8243_v42 }
 0x176   : > { %2206 = vmatprep.mubr.bf16.mxu1 %v6854_v62 }
 0x178   : > { %5524 = vmatpush3.bf16.msra.mxu0 %v5991_v40  ;;  %v1417_v40 = vld [vmem:[#allocation2 + $0xef] sm:$0xff] }
 0x179   : > { %5557 = vmatprep.subr.bf16.mxu0 %v7073_v44  ;;  %v7104_v34 = vpack.c.bf16 %v1417_v40, %v1416_v38  ;;  %v7121_v40 = vpack.c.bf16 %v1419_v47, %v1418_v15  ;;  %v8276_v38 = vld [vmem:[#allocation20_spill] sm:$0xff] }
 0x17b   : > { %4708 = vmatmul.mubr.msk.bf16.gmra.mrb[80].mxu0 %vm6651_vm9, %v6693_v32 }
 0x17c   : > { %2608 = vmatprep.mubr.bf16.mxu0 %v6518_v60 }
 0x17d   : > { %4620 = vmatmul.mubr.msk.bf16.gmra.mrb[52].mxu1 %vm7080_vm7, %v7087_v27  ;;  %vm7114_vm7 = vmpackc.low %vm6041_vm2, %vm5876_vm13  ;;  %vm8251_vm2 = vnez %v8244_v42  ;;  %vm8283_vm13 = vnez %v8216_v8 }
 0x17e   : > { %2214 = vmatprep.mubr.bf16.mxu1 %v6911_v28 }
 0x183   : > { %4712 = vmatmul.mubr.msk.bf16.gmra.mrb[84].mxu0 %vm6749_vm12, %v6778_v11 }
 0x184   : > { %2616 = vmatprep.mubr.bf16.mxu0 %v6508_v52 }
 0x185   : > { %4624 = vmatmul.mubr.msk.bf16.gmra.mrb[56].mxu1 %vm7097_vm4, %v7104_v34 }
 0x186   : > { %2222 = vmatprep.mubr.bf16.mxu1 %v6902_v9 }
 0x18b   : > { %4716 = vmatmul.mubr.msk.bf16.gmra.mrb[88].mxu0 %vm6835_vm1, %v6860_v17 }
 0x18c   : > { %2624 = vmatprep.mubr.bf16.mxu0 %v6612_v22 }
 0x18d   : > { %4628 = vmatmul.mubr.msk.bf16.gmra.mrb[60].mxu1 %vm7114_vm7, %v7121_v40 }
 0x18e   : > { %3131 = vmatprep.mubr.bf16.mxu1 %v6392_v19  ;;  %v5993_v19 = vld [vmem:[%s8033_s4 + $0x208] sm:$0xff]  }
 0x193   : > { %4720 = vmatmul.mubr.msk.bf16.gmra.mrb[92].mxu0 %vm6891_vm6, %v6907_v51 }
 0x194   : > { %2632 = vmatprep.mubr.bf16.mxu0 %v6602_v16 }
 0x195   : > { %4816 = vmatmul.mubr.msk.bf16.vlgmr.msra.gmra.mrb[64].mxu1 %vm6469_vm8, %v6514_v7  ;;  %v8252_v7 = vmov 0   ;;  %vm8254_vm8 = vnez %v8253_v43 }
 0x196   : > { %3139 = vmatprep.mubr.bf16.mxu1 %v6442_v54  ;;  %v8256_v54 = vld [vmem:[#allocation5_spill] sm:$0xff] }
 0x19b   : > { %4724 = vmatmul.mubr.msk.bf16.gmra.mrb[96].mxu0 %vm6934_vm11, %v6946_v30 }
 0x19c   : > { %2640 = vmatprep.mubr.bf16.mxu0 %v6697_v1 }
 0x19d   : > { %4820 = vmatmul.mubr.msk.bf16.gmra.mrb[68].mxu1 %vm6567_vm15, %v6608_v3  ;;  %vm8257_vm15 = vnez %v8256_v54 }
 0x19e   : > { %3147 = vmatprep.mubr.bf16.mxu1 %v6435_v45  ;;  %v8255_v45 = vld [vmem:[#allocation6_spill] sm:$0xff] }
 0x1a3   : > { %4728 = vmatmul.mubr.msk.bf16.gmra.mrb[100].mxu0 %vm6969_vm0, %v6976_v35 }
 0x1a4   : > { %2648 = vmatprep.mubr.bf16.mxu0 %v6687_v46 }
 0x1a5   : > { %4824 = vmatmul.mubr.msk.bf16.gmra.mrb[72].mxu1 %vm6651_vm9, %v6693_v32 }
 0x1a6   : > { %3155 = vmatprep.mubr.bf16.mxu1 %v6518_v60  ;;  %v8262_v60 = vld [vmem:[#allocation9_spill] sm:$0xff] }
 0x1a7   : > { %vm8263_vm9 = vnez %v8262_v60 }
 0x1ab   : > { %4732 = vmatmul.mubr.msk.bf16.gmra.mrb[104].mxu0 %vm6989_vm5, %v6994_v29 }
 0x1ac   : > { %2656 = vmatprep.mubr.bf16.mxu0 %v6782_v25 }
 0x1ad   : > { %4828 = vmatmul.mubr.msk.bf16.gmra.mrb[76].mxu1 %vm6749_vm12, %v6778_v11  ;;  %vm8266_vm12 = vnez %v8265_v59 }
 0x1ae   : > { %3163 = vmatprep.mubr.bf16.mxu1 %v6508_v52  ;;  %v8261_v52 = vld [vmem:[#allocation10_spill] sm:$0xff] }
 0x1b3   : > { %4736 = vmatmul.mubr.msk.bf16.gmra.mrb[108].mxu0 %vm7011_vm14, %v7018_v37 }
 0x1b4   : > { %2664 = vmatprep.mubr.bf16.mxu0 %v6772_v5 }
 0x1b5   : > { %4832 = vmatmul.mubr.msk.bf16.gmra.mrb[80].mxu1 %vm6835_vm1, %v6860_v17  ;;  %v5998_v17 = vld [vmem:[%s8033_s4 + $0x230] sm:$0xff]  }
 0x1b6   : > { %3171 = vmatprep.mubr.bf16.mxu1 %v6612_v22  ;;  %v5994_v22 = vld [vmem:[%s8033_s4 + $0x210] sm:$0xff]  }
 0x1bb   : > { %4740 = vmatmul.mubr.msk.bf16.gmra.mrb[112].mxu0 %vm7034_vm3, %v7041_v63 }
 0x1bc   : > { %2672 = vmatprep.mubr.bf16.mxu0 %v6864_v41 }
 0x1bd   : > { %4836 = vmatmul.mubr.msk.bf16.gmra.mrb[84].mxu1 %vm6891_vm6, %v6907_v51 }
 0x1be   : > { %3179 = vmatprep.mubr.bf16.mxu1 %v6602_v16  ;;  %v8259_v16 = vld [vmem:[#allocation7_spill] sm:$0xff] }
 0x1bf   : > { %vm8260_vm6 = vnez %v8259_v16 }
 0x1c3   : > { %4744 = vmatmul.mubr.msk.bf16.gmra.mrb[116].mxu0 %vm7057_vm10, %v7064_v49 }
 0x1c4   : > { %2680 = vmatprep.mubr.bf16.mxu0 %v6854_v62 }
 0x1c5   : > { %4840 = vmatmul.mubr.msk.bf16.gmra.mrb[88].mxu1 %vm6934_vm11, %v6946_v30  ;;  %vm8278_vm11 = vnez %v8277_v53 }
 0x1c6   : > { %3187 = vmatprep.mubr.bf16.mxu1 %v6697_v1  ;;  %v8264_v1 = vld [vmem:[#allocation12_spill] sm:$0xff] }
 0x1cb   : > { %4748 = vmatmul.mubr.msk.bf16.gmra.mrb[120].mxu0 %vm8251_vm2, %v7087_v27 }
 0x1cc   : > { %2688 = vmatprep.mubr.bf16.mxu0 %v6911_v28 }
 0x1cd   : > { %4844 = vmatmul.mubr.msk.bf16.gmra.mrb[92].mxu1 %vm6969_vm0, %v6976_v35  ;;  %vm8279_vm0 = vnez %v8194_v56 }
 0x1ce   : > { %3195 = vmatprep.mubr.bf16.mxu1 %v6687_v46 }
 0x1d3   : > { %4752 = vmatmul.mubr.msk.bf16.gmra.mrb[124].mxu0 %vm7097_vm4, %v7104_v34 }
 0x1d4   : > { %5525 = vmatprep.mubr.bf16.mxu0 %v8252_v7 }
 0x1d5   : > { %4848 = vmatmul.mubr.msk.bf16.gmra.mrb[96].mxu1 %vm6989_vm5, %v6994_v29  ;;  %vm8280_vm5 = vnez %v8201_v6 }
 0x1d6   : > { %3203 = vmatprep.mubr.bf16.mxu1 %v6782_v25  ;;  %v5997_v25 = vld [vmem:[%s8033_s4 + $0x228] sm:$0xff]  }
 0x1db   : > { %5526 = vmatmul.mubr.msk.bf16.vlgmr.msra.gmra.mrb[32].mxu0 %vm8254_vm8, %v6440_v13  ;;  %v5995_v13 = vld [vmem:[%s8033_s4 + $0x218] sm:$0xff]  }
 0x1dc   : > { %5558 = vmatpush3.bf16.msra.mxu0 %v7073_v44  ;;  %5529 = vmatprep.mubr.msk.bf16.mxu0 %vm8257_vm15, %v8255_v45 }
 0x1dd   : > { %4852 = vmatmul.mubr.msk.bf16.gmra.mrb[100].mxu1 %vm7011_vm14, %v7018_v37  ;;  %5559 = vmatprep.subr.bf16.mxu0 %v5993_v19  ;;  %v8270_v37 = vld [vmem:[#allocation16_spill] sm:$0xff] }
 0x1de   : > { %3211 = vmatprep.mubr.bf16.mxu1 %v6772_v5 }
 0x1e0   : > { %5560 = vmatpush3.bf16.msra.mxu0 %v5993_v19 }
 0x1e1   : > { %5561 = vmatprep.subr.bf16.mxu0 %v5994_v22 }
 0x1e3   : > { %5530 = vmatmul.mubr.msk.bf16.gmra.mrb[36].mxu0 %vm8260_vm6, %v8258_v31 }
 0x1e4   : > { %5533 = vmatprep.mubr.msk.bf16.mxu0 %vm8263_vm9, %v8261_v52  ;;  %5562 = vmatpush3.bf16.msra.mxu0 %v5994_v22 }
 0x1e5   : > { %4856 = vmatmul.mubr.msk.bf16.gmra.mrb[104].mxu1 %vm7034_vm3, %v7041_v63  ;;  %5563 = vmatprep.subr.bf16.mxu0 %v5995_v13  ;;  %vm8281_vm3 = vnez %v8207_v23 }
 0x1e6   : > { %3219 = vmatprep.mubr.bf16.mxu1 %v6864_v41  ;;  %v8268_v41 = vld [vmem:[#allocation13_spill] sm:$0xff] }
 0x1e7   : > { %vm8269_vm14 = vnez %v8268_v41 }
 0x1e8   : > { %v4973_v3 = vpop.f32.mrb[0].mxu1  ;;  %5564 = vmatpush3.bf16.msra.mxu0 %v5995_v13 }
 0x1e9   : > { %v4974_v57 = vpop.f32.mrb[1].mxu1  ;;  %5565 = vmatprep.subr.bf16.mxu0 %v5996_v0 }
 0x1ea   : > { %v7236_v5 = vadd.f32 %v4974_v57, %v4973_v3  ;;  %v4976_v46 = vpop.f32.mrb[2].mxu1 }
 0x1eb   : > { %v4977_v32 = vpop.f32.mrb[3].mxu1  ;;  %5534 = vmatmul.mubr.msk.bf16.gmra.mrb[40].mxu0 %vm8266_vm12, %v8264_v1 }
 0x1ec   : > { %v7241_v11 = vadd.f32 %v4977_v32, %v4976_v46  ;;  %5537 = vmatprep.mubr.msk.bf16.mxu0 %vm8269_vm14, %v8267_v18  ;;  %5566 = vmatpush3.bf16.msra.mxu0 %v5996_v0 }
 0x1ed   : > { %4860 = vmatmul.mubr.msk.bf16.gmra.mrb[108].mxu1 %vm7057_vm10, %v7064_v49  ;;  %5567 = vmatprep.subr.bf16.mxu0 %v5997_v25  ;;  %vm8272_vm10 = vnez %v8271_v55 }
 0x1ee   : > { %3227 = vmatprep.mubr.bf16.mxu1 %v6854_v62  ;;  %v8274_v62 = vld [vmem:[#allocation17_spill] sm:$0xff] }
 0x1ef   : > { %vm8275_vm1 = vnez %v8274_v62 }
 0x1f0   : > { %v4979_v20 = vpop.f32.mrb[4].mxu1  ;;  %5568 = vmatpush3.bf16.msra.mxu0 %v5997_v25 }
 0x1f1   : > { %v4980_v51 = vpop.f32.mrb[5].mxu1  ;;  %5569 = vmatprep.subr.bf16.mxu0 %v5998_v17 }
 0x1f2   : > { %v7256_v30 = vadd.f32 %v4980_v51, %v4979_v20  ;;  %v4982_v33 = vpop.f32.mrb[6].mxu1 }
 0x1f3   : > { %v4983_v35 = vpop.f32.mrb[7].mxu1  ;;  %5538 = vmatmul.mubr.msk.bf16.gmra.mrb[44].mxu0 %vm8272_vm10, %v8270_v37 }
 0x1f4   : > { %v7261_v29 = vadd.f32 %v4983_v35, %v4982_v33  ;;  %5541 = vmatprep.mubr.msk.bf16.mxu0 %vm8275_vm1, %v8273_v58  ;;  %5570 = vmatpush3.bf16.msra.mxu0 %v5998_v17 }
 0x1f5   : > { %4864 = vmatmul.mubr.msk.bf16.gmra.mrb[112].mxu1 %vm8251_vm2, %v7087_v27  ;;  %5571 = vmatprep.subr.bf16.mxu0 %v5999_v10 }
 0x1f6   : > { %3235 = vmatprep.mubr.bf16.mxu1 %v6911_v28  ;;  %v6000_v28 = vld [vmem:[%s8036_s7] sm:$0xff]  }
 0x1f7   : > { %5605 = vmatprep.subr.bf16.mxu1 %v6000_v28 }
 0x1f8   : > { %v4985_v50 = vpop.f32.mrb[8].mxu1  ;;  %5572 = vmatpush3.bf16.msra.mxu0 %v5999_v10  ;;  %5606 = vmatpush3.bf16.msra.mxu1 %v6000_v28 }
 0x1f9   : > { %v4986_v63 = vpop.f32.mrb[9].mxu1  ;;  %5607 = vmatprep.subr.bf16.mxu1 %v6001_v2 }
 0x1fa   : > { %v7270_v14 = vadd.f32 %v4986_v63, %v4985_v50  ;;  %v4988_v49 = vpop.f32.mrb[10].mxu1 }
 0x1fb   : > { %v4989_v44 = vpop.f32.mrb[11].mxu1  ;;  %5542 = vmatmul.mubr.msk.bf16.gmra.mrb[48].mxu0 %vm8278_vm11, %v8276_v38 }
 0x1fc   : > { %v7275_v15 = vadd.f32 %v4989_v44, %v4988_v49  ;;  %5545 = vmatprep.mubr.msk.bf16.mxu0 %vm8279_vm0, %v6830_v4  ;;  %5608 = vmatpush3.bf16.msra.mxu1 %v6001_v2 }
 0x1fd   : > { %4868 = vmatmul.mubr.msk.bf16.gmra.mrb[116].mxu1 %vm7097_vm4, %v7104_v34  ;;  %vm8282_vm4 = vnez %v8212_v24 }
 0x1fe   : > { %3243 = vmatprep.mubr.bf16.mxu1 %v6902_v9 }
 0x200   : > { %v4991_v42 = vpop.f32.mrb[12].mxu1 }
 0x201   : > { %v4992_v27 = vpop.f32.mrb[13].mxu1 }
 0x202   : > { %v7287_v47 = vadd.f32 %v4992_v27, %v4991_v42  ;;  %v4994_v19 = vpop.f32.mrb[14].mxu1 }
 0x203   : > { %v4995_v43 = vpop.f32.mrb[15].mxu1  ;;  %5546 = vmatmul.mubr.msk.bf16.gmra.mrb[52].mxu0 %vm8280_vm5, %v6862_v39 }
 0x204   : > { %v7292_v22 = vadd.f32 %v4995_v43, %v4994_v19  ;;  %5549 = vmatprep.mubr.msk.bf16.mxu0 %vm8281_vm3, %v6895_v21 }
 0x205   : > { %4872 = vmatmul.mubr.msk.bf16.gmra.mrb[120].mxu1 %vm7114_vm7, %v7121_v40  ;;  %vm8284_vm7 = vnez %v8221_v26 }
 0x206   : > { %3251 = vmatprep.mubr.bf16.mxu1 %v8252_v7 }
 0x208   : > { %v4997_v9 = vpop.f32.mrb[16].mxu1 }
 0x209   : > { %v4998_v61 = vpop.f32.mrb[17].mxu1 }
 0x20a   : > { %v7301_v34 = vadd.f32 %v4998_v61, %v4997_v9  ;;  %v5000_v13 = vpop.f32.mrb[18].mxu1 }
 0x20b   : > { %v5001_v0 = vpop.f32.mrb[19].mxu1  ;;  %5550 = vmatmul.mubr.msk.bf16.gmra.mrb[56].mxu0 %vm8282_vm4, %v6909_v12 }
 0x20c   : > { %v7306_v3 = vadd.f32 %v5001_v0, %v5000_v13  ;;  %5553 = vmatprep.mubr.msk.bf16.mxu0 %vm8283_vm13, %v6931_v36 }
 0x20d   : > { %3252 = vmatmul.mubr.bf16.gmra.mrb[124].mxu1 %v8252_v7 }
 0x210   : > { %v5003_v40 = vpop.f32.mrb[20].mxu1 }
 0x211   : > { %v5004_v57 = vpop.f32.mrb[21].mxu1 }
 0x212   : > { %v7315_v25 = vadd.f32 %v5004_v57, %v5003_v40  ;;  %v5006_v46 = vpop.f32.mrb[22].mxu1 }
 0x213   : > { %v5007_v32 = vpop.f32.mrb[23].mxu1  ;;  %5554 = vmatmul.mubr.msk.bf16.gmra.mrb[60].mxu0 %vm8284_vm7, %v6948_v48 }
 0x214   : > { %v7320_v17 = vadd.f32 %v5007_v32, %v5006_v46  ;;  %5573 = vmatprep.mubr.msk.bf16.mxu0 %vm8257_vm15, %v8255_v45  ;;  %v6002_v45 = vld [vmem:[%s8036_s7 + $0x10] sm:$0xff]  }
 0x215   : > { %5609 = vmatprep.subr.bf16.mxu1 %v6002_v45 }
 0x216   : > { %5610 = vmatpush3.bf16.msra.mxu1 %v6002_v45 }
 0x218   : > { %v5009_v20 = vpop.f32.mrb[24].mxu1 }
 0x219   : > { %v5010_v51 = vpop.f32.mrb[25].mxu1 }
 0x21a   : > { %v7325_v10 = vadd.f32 %v5010_v51, %v5009_v20  ;;  %v5012_v33 = vpop.f32.mrb[26].mxu1 }
 0x21b   : > { %v5013_v35 = vpop.f32.mrb[27].mxu1  ;;  %5574 = vmatmul.mubr.msk.bf16.vlgmr.msra.gmra.mrb[32].mxu0 %vm8260_vm6, %v8258_v31 }
 0x21c   : > { %v7330_v50 = vadd.f32 %v5013_v35, %v5012_v33  ;;  %5577 = vmatprep.mubr.msk.bf16.mxu0 %vm8263_vm9, %v8261_v52 }
 0x220   : > { %v5015_v54 = vpop.f32.mrb[28].mxu1 }
 0x221   : > { %v5016_v63 = vpop.f32.mrb[29].mxu1 }
 0x222   : > { %v7338_v49 = vadd.f32 %v5016_v63, %v5015_v54  ;;  %v5018_v44 = vpop.f32.mrb[30].mxu1 }
 0x223   : > { %v5019_v28 = vpop.f32.mrb[31].mxu1  ;;  %5578 = vmatmul.mubr.msk.bf16.gmra.mrb[36].mxu0 %vm8266_vm12, %v8264_v1  ;;  %v6003_v1 = vld [vmem:[%s8036_s7 + $0x18] sm:$0xff]  }
 0x224   : > { %v7343_v31 = vadd.f32 %v5019_v28, %v5018_v44  ;;  %5581 = vmatprep.mubr.msk.bf16.mxu0 %vm8269_vm14, %v8267_v18  ;;  %5611 = vmatprep.subr.bf16.mxu1 %v6003_v1 }
 0x225   : > { %5612 = vmatpush3.bf16.msra.mxu1 %v6003_v1 }
 0x228   : > { %v5021_v16 = vpop.f32.mrb[32].mxu1 }
 0x229   : > { %v5022_v52 = vpop.f32.mrb[33].mxu1 }
 0x22a   : > { %v7348_v60 = vadd.f32 %v5022_v52, %v5021_v16  ;;  %v5024_v42 = vpop.f32.mrb[34].mxu1 }
 0x22b   : > { %v5025_v27 = vpop.f32.mrb[35].mxu1  ;;  %5582 = vmatmul.mubr.msk.bf16.gmra.mrb[40].mxu0 %vm8272_vm10, %v8270_v37 }
 0x22c   : > { %v7353_v19 = vadd.f32 %v5025_v27, %v5024_v42  ;;  %5585 = vmatprep.mubr.msk.bf16.mxu0 %vm8275_vm1, %v8273_v58 }
 0x22e   : > { %v5109_v59 = vpop.f32.mrb[64].mxu0 }
 0x22f   : > { %v5110_v18 = vpop.f32.mrb[65].mxu0 }
 0x230   : > { %v5111_v41 = vadd.f32 %v5110_v18, %v5109_v59  ;;  %v5027_v43 = vpop.f32.mrb[36].mxu1  ;;  %v5112_v9 = vpop.f32.mrb[66].mxu0 }
 0x231   : > { %v5028_v61 = vpop.f32.mrb[37].mxu1  ;;  %v5113_v55 = vpop.f32.mrb[67].mxu0 }
 0x232   : > { %v7362_v37 = vadd.f32 %v5111_v41, %v7236_v5  ;;  %v7364_v13 = vadd.f32 %v5028_v61, %v5027_v43  ;;  %v5114_v62 = vadd.f32 %v5113_v55, %v5112_v9  ;;  %v5030_v58 = vpop.f32.mrb[38].mxu1 }
 0x233   : > { %v5031_v0 = vpop.f32.mrb[39].mxu1  ;;  %5586 = vmatmul.mubr.msk.bf16.gmra.mrb[44].mxu0 %vm8278_vm11, %v8276_v38 }
 0x234   : > { %v7370_v2 = vadd.f32 %v5114_v62, %v7241_v11  ;;  %v7372_v40 = vadd.f32 %v5031_v0, %v5030_v58  ;;  %5589 = vmatprep.mubr.msk.bf16.mxu0 %vm8279_vm0, %v6830_v4  ;;  %v8285_v58 = vld [vmem:[#allocation22_spill] sm:$0xff]  ;;  %v8286_v0 = vld [vmem:[#allocation21_spill] sm:$0xff] }
 0x235   : > { %vm8287_vm2 = vnez %v8286_v0 }
 0x236   : > { %v5115_v5 = vpop.f32.mrb[68].mxu0 }
 0x237   : > { %v5116_v57 = vpop.f32.mrb[69].mxu0 }
 0x238   : > { %v5117_v46 = vadd.f32 %v5116_v57, %v5115_v5  ;;  %v5033_v32 = vpop.f32.mrb[40].mxu1  ;;  %v5118_v20 = vpop.f32.mrb[70].mxu0 }
 0x239   : > { %v5034_v51 = vpop.f32.mrb[41].mxu1  ;;  %v5119_v33 = vpop.f32.mrb[71].mxu0 }
 0x23a   : > { %v7378_v35 = vadd.f32 %v5117_v46, %v7256_v30  ;;  %v7380_v38 = vadd.f32 %v5034_v51, %v5033_v32  ;;  %v5120_v11 = vadd.f32 %v5119_v33, %v5118_v20  ;;  %v5036_v53 = vpop.f32.mrb[42].mxu1  ;;  %v6004_v30 = vld [vmem:[%s8036_s7 + $0x20] sm:$0xff]  }
 0x23b   : > { %v5037_v45 = vpop.f32.mrb[43].mxu1  ;;  %5590 = vmatmul.mubr.msk.bf16.gmra.mrb[48].mxu0 %vm8280_vm5, %v6862_v39  ;;  %5613 = vmatprep.subr.bf16.mxu1 %v6004_v30 }
 0x23c   : > { %v7386_v56 = vadd.f32 %v5120_v11, %v7261_v29  ;;  %v7388_v4 = vadd.f32 %v5037_v45, %v5036_v53  ;;  %5593 = vmatprep.mubr.msk.bf16.mxu0 %vm8281_vm3, %v6895_v21  ;;  %5614 = vmatpush3.bf16.msra.mxu1 %v6004_v30 }
 0x23e   : > { %v5121_v54 = vpop.f32.mrb[72].mxu0 }
 0x23f   : > { %v5122_v63 = vpop.f32.mrb[73].mxu0 }
 0x240   : > { %v5123_v44 = vadd.f32 %v5122_v63, %v5121_v54  ;;  %v5039_v6 = vpop.f32.mrb[44].mxu1  ;;  %v5124_v39 = vpop.f32.mrb[74].mxu0 }
 0x241   : > { %v5040_v28 = vpop.f32.mrb[45].mxu1  ;;  %v5125_v29 = vpop.f32.mrb[75].mxu0 }
 0x242   : > { %v7397_v16 = vadd.f32 %v5123_v44, %v7270_v14  ;;  %v7399_v52 = vadd.f32 %v5040_v28, %v5039_v6  ;;  %v5126_v23 = vadd.f32 %v5125_v29, %v5124_v39  ;;  %v5042_v21 = vpop.f32.mrb[46].mxu1 }
 0x243   : > { %v5043_v42 = vpop.f32.mrb[47].mxu1  ;;  %5594 = vmatmul.mubr.msk.bf16.gmra.mrb[52].mxu0 %vm8282_vm4, %v6909_v12 }
 0x244   : > { %v7405_v27 = vadd.f32 %v5126_v23, %v7275_v15  ;;  %v7407_v1 = vadd.f32 %v5043_v42, %v5042_v21  ;;  %5597 = vmatprep.mubr.msk.bf16.mxu0 %vm8283_vm13, %v6931_v36 }
 0x246   : > { %v5127_v14 = vpop.f32.mrb[76].mxu0 }
 0x247   : > { %v5128_v59 = vpop.f32.mrb[77].mxu0 }
 0x248   : > { %v5129_v18 = vadd.f32 %v5128_v59, %v5127_v14  ;;  %v5045_v41 = vpop.f32.mrb[48].mxu1  ;;  %v5130_v43 = vpop.f32.mrb[78].mxu0  ;;  %v6006_v59 = vld [vmem:[%s8036_s7 + $0x30] sm:$0xff]  }
 0x249   : > { %v5046_v9 = vpop.f32.mrb[49].mxu1  ;;  %v5131_v61 = vpop.f32.mrb[79].mxu0 }
 0x24a   : > { %v7413_v55 = vadd.f32 %v5129_v18, %v7287_v47  ;;  %v7415_v24 = vadd.f32 %v5046_v9, %v5045_v41  ;;  %v5132_v12 = vadd.f32 %v5131_v61, %v5130_v43  ;;  %v5048_v15 = vpop.f32.mrb[50].mxu1  ;;  %v6005_v47 = vld [vmem:[%s8036_s7 + $0x28] sm:$0xff]  }
 0x24b   : > { %v5049_v62 = vpop.f32.mrb[51].mxu1  ;;  %5598 = vmatmul.mubr.msk.bf16.gmra.mrb[56].mxu0 %vm8284_vm7, %v6948_v48  ;;  %5615 = vmatprep.subr.bf16.mxu1 %v6005_v47 }
 0x24c   : > { %v7421_v8 = vadd.f32 %v5132_v12, %v7292_v22  ;;  %v7423_v36 = vadd.f32 %v5049_v62, %v5048_v15  ;;  %5601 = vmatprep.mubr.msk.bf16.mxu0 %vm8287_vm2, %v8285_v58  ;;  %5616 = vmatpush3.bf16.msra.mxu1 %v6005_v47 }
 0x24d   : > { %5617 = vmatprep.subr.bf16.mxu1 %v6006_v59 }
 0x24e   : > { %v5133_v5 = vpop.f32.mrb[80].mxu0 }
 0x24f   : > { %v5134_v57 = vpop.f32.mrb[81].mxu0 }
 0x250   : > { %v5135_v46 = vadd.f32 %v5134_v57, %v5133_v5  ;;  %v5051_v26 = vpop.f32.mrb[52].mxu1  ;;  %v5136_v48 = vpop.f32.mrb[82].mxu0  ;;  %5618 = vmatpush3.bf16.msra.mxu1 %v6006_v59  ;;  %v6007_v57 = vld [vmem:[%s8036_s7 + $0x38] sm:$0xff]  }
 0x251   : > { %v5052_v32 = vpop.f32.mrb[53].mxu1  ;;  %v5137_v22 = vpop.f32.mrb[83].mxu0  ;;  %5619 = vmatprep.subr.bf16.mxu1 %v6007_v57 }
 0x252   : > { %v7432_v20 = vadd.f32 %v5135_v46, %v7301_v34  ;;  %v7434_v51 = vadd.f32 %v5052_v32, %v5051_v26  ;;  %v5138_v33 = vadd.f32 %v5137_v22, %v5136_v48  ;;  %v5054_v11 = vpop.f32.mrb[54].mxu1 }
 0x253   : > { %v5055_v53 = vpop.f32.mrb[55].mxu1  ;;  %5602 = vmatmul.mubr.bf16.gmra.mrb[60].mxu0 %v8252_v7 }
 0x254   : > { %v7438_v45 = vadd.f32 %v5138_v33, %v7306_v3  ;;  %v7440_v30 = vadd.f32 %v5055_v53, %v5054_v11  ;;  %5620 = vmatpush3.bf16.msra.mxu1 %v6007_v57 }
 0x256   : > { %v5139_v54 = vpop.f32.mrb[84].mxu0 }
 0x257   : > { %v5140_v63 = vpop.f32.mrb[85].mxu0 }
 0x258   : > { %v5141_v44 = vadd.f32 %v5140_v63, %v5139_v54  ;;  %v5057_v6 = vpop.f32.mrb[56].mxu1  ;;  %v5142_v39 = vpop.f32.mrb[86].mxu0 }
 0x259   : > { %v5058_v28 = vpop.f32.mrb[57].mxu1  ;;  %v5143_v34 = vpop.f32.mrb[87].mxu0 }
 0x25a   : > { %v7443_v29 = vadd.f32 %v5141_v44, %v7315_v25  ;;  %v7445_v23 = vadd.f32 %v5058_v28, %v5057_v6  ;;  %v5144_v21 = vadd.f32 %v5143_v34, %v5142_v39  ;;  %v5060_v42 = vpop.f32.mrb[58].mxu1 }
 0x25b   : > { %v5061_v7 = vpop.f32.mrb[59].mxu1 }
 0x25c   : > { %v7448_v3 = vadd.f32 %v5144_v21, %v7320_v17  ;;  %v7450_v14 = vadd.f32 %v5061_v7, %v5060_v42 }
 0x25e   : > { %v5145_v18 = vpop.f32.mrb[88].mxu0 }
 0x25f   : > { %v5146_v41 = vpop.f32.mrb[89].mxu0 }
 0x260   : > { %v5147_v25 = vadd.f32 %v5146_v41, %v5145_v18  ;;  %v5063_v43 = vpop.f32.mrb[60].mxu1  ;;  %v5148_v9 = vpop.f32.mrb[90].mxu0 }
 0x261   : > { %v5064_v61 = vpop.f32.mrb[61].mxu1  ;;  %v5149_v12 = vpop.f32.mrb[91].mxu0 }
 0x262   : > { %v7456_v15 = vadd.f32 %v5147_v25, %v7325_v10  ;;  %v7458_v17 = vadd.f32 %v5064_v61, %v5063_v43  ;;  %v5150_v62 = vadd.f32 %v5149_v12, %v5148_v9  ;;  %v5066_v58 = vpop.f32.mrb[62].mxu1 }
 0x263   : > { %v5067_v0 = vpop.f32.mrb[63].mxu1 }
 0x264   : > { %v7461_v47 = vadd.f32 %v5150_v62, %v7330_v50  ;;  %v7463_v5 = vadd.f32 %v5067_v0, %v5066_v58 }
 0x266   : > { %v5151_v46 = vpop.f32.mrb[92].mxu0 }
 0x267   : > { %v5152_v26 = vpop.f32.mrb[93].mxu0 }
 0x268   : > { %v5153_v10 = vadd.f32 %v5152_v26, %v5151_v46  ;;  %v5154_v48 = vpop.f32.mrb[94].mxu0  ;;  %v5245_v32 = vpop.f32.mrb[64].mxu1 }
 0x269   : > { %v5155_v22 = vpop.f32.mrb[95].mxu0  ;;  %v5246_v33 = vpop.f32.mrb[65].mxu1 }
 0x26a   : > { %v7469_v11 = vadd.f32 %v5153_v10, %v7338_v49  ;;  %v5156_v50 = vadd.f32 %v5155_v22, %v5154_v48  ;;  %v5247_v53 = vadd.f32 %v5246_v33, %v5245_v32  ;;  %v5248_v54 = vpop.f32.mrb[66].mxu1 }
 0x26b   : > { %v5249_v63 = vpop.f32.mrb[67].mxu1 }
 0x26c   : > { %v7472_v44 = vadd.f32 %v5156_v50, %v7343_v31  ;;  %v5250_v6 = vadd.f32 %v5249_v63, %v5248_v54  ;;  %v7475_v39 = vadd.f32 %v7362_v37, %v5247_v53 }
 0x26e   : > { %v5157_v28 = vpop.f32.mrb[96].mxu0  ;;  %v7478_v34 = vadd.f32 %v7370_v2, %v5250_v6 }
 0x26f   : > { %v5158_v21 = vpop.f32.mrb[97].mxu0 }
 0x270   : > { %v5159_v42 = vadd.f32 %v5158_v21, %v5157_v28  ;;  %v5160_v7 = vpop.f32.mrb[98].mxu0  ;;  %v5251_v49 = vpop.f32.mrb[68].mxu1  ;;  %v7507_v28 = vld [vmem:[%s8039_s10] sm:$0xff]  }
 0x271   : > { %v5161_v59 = vpop.f32.mrb[99].mxu0  ;;  %v5252_v18 = vpop.f32.mrb[69].mxu1  ;;  %5653 = vmatprep.subr.bf16.mxu1 %v7507_v28 }
 0x272   : > { %v7481_v41 = vadd.f32 %v5159_v42, %v7348_v60  ;;  %v5162_v25 = vadd.f32 %v5161_v59, %v5160_v7  ;;  %v5253_v31 = vadd.f32 %v5252_v18, %v5251_v49  ;;  %v5254_v43 = vpop.f32.mrb[70].mxu1 }
 0x273   : > { %v5255_v9 = vpop.f32.mrb[71].mxu1 }
 0x274   : > { %v7484_v37 = vadd.f32 %v5162_v25, %v7353_v19  ;;  %v5256_v61 = vadd.f32 %v5255_v9, %v5254_v43  ;;  %v7487_v2 = vadd.f32 %v7378_v35, %v5253_v31 }
 0x276   : > { %v5163_v12 = vpop.f32.mrb[100].mxu0  ;;  %v7490_v62 = vadd.f32 %v7386_v56, %v5256_v61 }
 0x277   : > { %v5164_v58 = vpop.f32.mrb[101].mxu0 }
 0x278   : > { %v5165_v0 = vadd.f32 %v5164_v58, %v5163_v12  ;;  %v5166_v57 = vpop.f32.mrb[102].mxu0  ;;  %v5257_v60 = vpop.f32.mrb[72].mxu1 }
 0x279   : > { %v5167_v46 = vpop.f32.mrb[103].mxu0  ;;  %v5258_v26 = vpop.f32.mrb[73].mxu1 }
 0x27a   : > { %v7493_v10 = vadd.f32 %v5165_v0, %v7364_v13  ;;  %v5168_v48 = vadd.f32 %v5167_v46, %v5166_v57  ;;  %v5259_v19 = vadd.f32 %v5258_v26, %v5257_v60  ;;  %v5260_v32 = vpop.f32.mrb[74].mxu1 }
 0x27b   : > { %v5261_v22 = vpop.f32.mrb[75].mxu1 }
 0x27c   : > { %v7496_v35 = vadd.f32 %v5168_v48, %v7372_v40  ;;  %v5262_v33 = vadd.f32 %v5261_v22, %v5260_v32  ;;  %v7499_v56 = vadd.f32 %v7397_v16, %v5259_v19 }
 0x27e   : > { %v5169_v50 = vpop.f32.mrb[104].mxu0  ;;  %v7502_v53 = vadd.f32 %v7405_v27, %v5262_v33 }
 0x27f   : > { %v5170_v54 = vpop.f32.mrb[105].mxu0 }
 0x280   : > { %v5171_v63 = vadd.f32 %v5170_v54, %v5169_v50  ;;  %v5172_v6 = vpop.f32.mrb[106].mxu0  ;;  %v5263_v13 = vpop.f32.mrb[76].mxu1 }
 0x281   : > { %v5173_v21 = vpop.f32.mrb[107].mxu0  ;;  %v5264_v40 = vpop.f32.mrb[77].mxu1 }
 0x282   : > { %v7510_v42 = vadd.f32 %v5171_v63, %v7380_v38  ;;  %v5174_v16 = vadd.f32 %v5173_v21, %v5172_v6  ;;  %v5265_v7 = vadd.f32 %v5264_v40, %v5263_v13  ;;  %v5266_v49 = vpop.f32.mrb[78].mxu1 }
 0x283   : > { %v5267_v27 = vpop.f32.mrb[79].mxu1 }
 0x284   : > { %v7514_v59 = vadd.f32 %v5174_v16, %v7388_v4  ;;  %v5268_v18 = vadd.f32 %v5267_v27, %v5266_v49  ;;  %v7517_v25 = vadd.f32 %v7413_v55, %v5265_v7 }
 0x286   : > { %v5175_v31 = vpop.f32.mrb[108].mxu0  ;;  %v7520_v43 = vadd.f32 %v7421_v8, %v5268_v18 }
 0x287   : > { %v5176_v9 = vpop.f32.mrb[109].mxu0 }
 0x288   : > { %v5177_v38 = vadd.f32 %v5176_v9, %v5175_v31  ;;  %v5178_v61 = vpop.f32.mrb[110].mxu0  ;;  %v5269_v12 = vpop.f32.mrb[80].mxu1 }
 0x289   : > { %v5179_v58 = vpop.f32.mrb[111].mxu0  ;;  %v5270_v0 = vpop.f32.mrb[81].mxu1 }
 0x28a   : > { %v7523_v57 = vadd.f32 %v5177_v38, %v7399_v52  ;;  %v5180_v60 = vadd.f32 %v5179_v58, %v5178_v61  ;;  %v5271_v4 = vadd.f32 %v5270_v0, %v5269_v12  ;;  %v5272_v46 = vpop.f32.mrb[82].mxu1 }
 0x28b   : > { %v5273_v26 = vpop.f32.mrb[83].mxu1 }
 0x28c   : > { %v7526_v55 = vadd.f32 %v5180_v60, %v7407_v1  ;;  %v5274_v48 = vadd.f32 %v5273_v26, %v5272_v46  ;;  %v7529_v8 = vadd.f32 %v7432_v20, %v5271_v4 }
 0x28e   : > { %v5181_v19 = vpop.f32.mrb[112].mxu0  ;;  %v7532_v32 = vadd.f32 %v7438_v45, %v5274_v48 }
 0x28f   : > { %v5182_v22 = vpop.f32.mrb[113].mxu0 }
 0x290   : > { %v5183_v33 = vadd.f32 %v5182_v22, %v5181_v19  ;;  %v5184_v50 = vpop.f32.mrb[114].mxu0  ;;  %v5275_v52 = vpop.f32.mrb[84].mxu1 }
 0x291   : > { %v5185_v54 = vpop.f32.mrb[115].mxu0  ;;  %v5276_v63 = vpop.f32.mrb[85].mxu1 }
 0x292   : > { %v7535_v6 = vadd.f32 %v5183_v33, %v7415_v24  ;;  %v5186_v13 = vadd.f32 %v5185_v54, %v5184_v50  ;;  %v5277_v1 = vadd.f32 %v5276_v63, %v5275_v52  ;;  %v5278_v21 = vpop.f32.mrb[86].mxu1 }
 0x293   : > { %v5279_v40 = vpop.f32.mrb[87].mxu1 }
 0x294   : > { %v7538_v20 = vadd.f32 %v5186_v13, %v7423_v36  ;;  %v5280_v16 = vadd.f32 %v5279_v40, %v5278_v21  ;;  %v7541_v45 = vadd.f32 %v7443_v29, %v5277_v1 }
 0x296   : > { %v5187_v7 = vpop.f32.mrb[116].mxu0  ;;  %v7544_v49 = vadd.f32 %v7448_v3, %v5280_v16 }
 0x297   : > { %v5188_v27 = vpop.f32.mrb[117].mxu0 }
 0x298   : > { %v5189_v18 = vadd.f32 %v5188_v27, %v5187_v7  ;;  %v5190_v31 = vpop.f32.mrb[118].mxu0  ;;  %v5281_v24 = vpop.f32.mrb[88].mxu1 }
 0x299   : > { %v5191_v9 = vpop.f32.mrb[119].mxu0  ;;  %v5282_v38 = vpop.f32.mrb[89].mxu1 }
 0x29a   : > { %v7547_v61 = vadd.f32 %v5189_v18, %v7434_v51  ;;  %v5192_v12 = vadd.f32 %v5191_v9, %v5190_v31  ;;  %v5283_v36 = vadd.f32 %v5282_v38, %v5281_v24  ;;  %v5284_v58 = vpop.f32.mrb[90].mxu1 }
 0x29b   : > { %v5285_v0 = vpop.f32.mrb[91].mxu1 }
 0x29c   : > { %v7550_v29 = vadd.f32 %v5192_v12, %v7440_v30  ;;  %v5286_v60 = vadd.f32 %v5285_v0, %v5284_v58  ;;  %v7553_v3 = vadd.f32 %v7456_v15, %v5283_v36 }
 0x29e   : > { %v5193_v4 = vpop.f32.mrb[120].mxu0  ;;  %v7556_v46 = vadd.f32 %v7461_v47, %v5286_v60 }
 0x29f   : > { %v5194_v26 = vpop.f32.mrb[121].mxu0 }
 0x2a0   : > { %v5195_v48 = vadd.f32 %v5194_v26, %v5193_v4  ;;  %v5196_v19 = vpop.f32.mrb[122].mxu0  ;;  %v5287_v51 = vpop.f32.mrb[92].mxu1 }
 0x2a1   : > { %v5197_v22 = vpop.f32.mrb[123].mxu0  ;;  %v5288_v33 = vpop.f32.mrb[93].mxu1 }
 0x2a2   : > { %v7559_v50 = vadd.f32 %v5195_v48, %v7445_v23  ;;  %v5198_v52 = vadd.f32 %v5197_v22, %v5196_v19  ;;  %v5289_v30 = vadd.f32 %v5288_v33, %v5287_v51  ;;  %v5290_v54 = vpop.f32.mrb[94].mxu1 }
 0x2a3   : > { %v5291_v63 = vpop.f32.mrb[95].mxu1 }
 0x2a4   : > { %v7562_v15 = vadd.f32 %v5198_v52, %v7450_v14  ;;  %v5292_v13 = vadd.f32 %v5291_v63, %v5290_v54  ;;  %v7565_v47 = vadd.f32 %v7469_v11, %v5289_v30 }
 0x2a6   : > { %v5199_v1 = vpop.f32.mrb[124].mxu0  ;;  %v7568_v21 = vadd.f32 %v7472_v44, %v5292_v13 }
 0x2a7   : > { %v5200_v40 = vpop.f32.mrb[125].mxu0 }
 0x2a8   : > { %v5201_v16 = vadd.f32 %v5200_v40, %v5199_v1  ;;  %v5202_v7 = vpop.f32.mrb[126].mxu0  ;;  %v5293_v23 = vpop.f32.mrb[96].mxu1 }
 0x2a9   : > { %v5203_v27 = vpop.f32.mrb[127].mxu0  ;;  %v5294_v18 = vpop.f32.mrb[97].mxu1 }
 0x2aa   : > { %v7571_v31 = vadd.f32 %v5201_v16, %v7458_v17  ;;  %v5204_v24 = vadd.f32 %v5203_v27, %v5202_v7  ;;  %v5295_v14 = vadd.f32 %v5294_v18, %v5293_v23  ;;  %v5296_v9 = vpop.f32.mrb[98].mxu1 }
 0x2ab   : > { %v5297_v38 = vpop.f32.mrb[99].mxu1 }
 0x2ac   : > { %v5791_v11 = vadd.f32 %v5204_v24, %v7463_v5  ;;  %v5298_v12 = vadd.f32 %v5297_v38, %v5296_v9  ;;  %v7575_v36 = vadd.f32 %v7481_v41, %v5295_v14 }
 0x2ae   : > { %v7578_v44 = vadd.f32 %v7484_v37, %v5298_v12 }
 0x2b0   : > { %v5299_v58 = vpop.f32.mrb[100].mxu1 }
 0x2b1   : > { %v5300_v0 = vpop.f32.mrb[101].mxu1 }
 0x2b2   : > { %v5301_v60 = vadd.f32 %v5300_v0, %v5299_v58  ;;  %v5302_v4 = vpop.f32.mrb[102].mxu1 }
 0x2b3   : > { %v5303_v26 = vpop.f32.mrb[103].mxu1 }
 0x2b4   : > { %v5304_v17 = vadd.f32 %v5303_v26, %v5302_v4  ;;  %v7581_v48 = vadd.f32 %v7493_v10, %v5301_v60 }
 0x2b6   : > { %v7584_v19 = vadd.f32 %v7496_v35, %v5304_v17 }
 0x2b8   : > { %v5305_v5 = vpop.f32.mrb[104].mxu1 }
 0x2b9   : > { %v5306_v51 = vpop.f32.mrb[105].mxu1 }
 0x2ba   : > { %v5307_v22 = vadd.f32 %v5306_v51, %v5305_v5  ;;  %v5308_v41 = vpop.f32.mrb[106].mxu1 }
 0x2bb   : > { %v5309_v33 = vpop.f32.mrb[107].mxu1 }
 0x2bc   : > { %v5310_v52 = vadd.f32 %v5309_v33, %v5308_v41  ;;  %v7587_v37 = vadd.f32 %v7510_v42, %v5307_v22 }
 0x2be   : > { %v7590_v30 = vadd.f32 %v7514_v59, %v5310_v52 }
 0x2c0   : > { %v5311_v54 = vpop.f32.mrb[108].mxu1 }
 0x2c1   : > { %v5312_v63 = vpop.f32.mrb[109].mxu1 }
 0x2c2   : > { %v5313_v13 = vadd.f32 %v5312_v63, %v5311_v54  ;;  %v5314_v10 = vpop.f32.mrb[110].mxu1 }
 0x2c3   : > { %v5315_v1 = vpop.f32.mrb[111].mxu1 }
 0x2c4   : > { %v5316_v40 = vadd.f32 %v5315_v1, %v5314_v10  ;;  %v7593_v35 = vadd.f32 %v7523_v57, %v5313_v13 }
 0x2c6   : > { %v7596_v16 = vadd.f32 %v7526_v55, %v5316_v40  ;;  %v7630_v40 = vld [vmem:[%s8035_s6] ss:$0 sm:$0xff] }
 0x2c8   : > { %v5317_v7 = vpop.f32.mrb[112].mxu1 }
 0x2c9   : > { %v5318_v23 = vpop.f32.mrb[113].mxu1 }
 0x2ca   : > { %v5319_v27 = vadd.f32 %v5318_v23, %v5317_v7  ;;  %v5320_v42 = vpop.f32.mrb[114].mxu1 }
 0x2cb   : > { %v5321_v18 = vpop.f32.mrb[115].mxu1 }
 0x2cc   : > { %v5322_v24 = vadd.f32 %v5321_v18, %v5320_v42  ;;  %v7599_v59 = vadd.f32 %v7535_v6, %v5319_v27 }
 0x2ce   : > { %v7602_v14 = vadd.f32 %v7538_v20, %v5322_v24 }
 0x2d0   : > { %v5323_v9 = vpop.f32.mrb[116].mxu1 }
 0x2d1   : > { %v5324_v38 = vpop.f32.mrb[117].mxu1 }
 0x2d2   : > { %v5325_v12 = vadd.f32 %v5324_v38, %v5323_v9  ;;  %v5326_v57 = vpop.f32.mrb[118].mxu1 }
 0x2d3   : > { %v5327_v58 = vpop.f32.mrb[119].mxu1 }
 0x2d4   : > { %v5328_v0 = vadd.f32 %v5327_v58, %v5326_v57  ;;  %v7605_v55 = vadd.f32 %v7547_v61, %v5325_v12 }
 0x2d6   : > { %v7608_v60 = vadd.f32 %v7550_v29, %v5328_v0 }
 0x2d8   : > { %v5329_v4 = vpop.f32.mrb[120].mxu1 }
 0x2d9   : > { %v5330_v26 = vpop.f32.mrb[121].mxu1 }
 0x2da   : > { %v5331_v17 = vadd.f32 %v5330_v26, %v5329_v4  ;;  %v5332_v6 = vpop.f32.mrb[122].mxu1 }
 0x2db   : > { %v5333_v5 = vpop.f32.mrb[123].mxu1 }
 0x2dc   : > { %v5334_v51 = vadd.f32 %v5333_v5, %v5332_v6  ;;  %v7611_v20 = vadd.f32 %v7559_v50, %v5331_v17  ;;  %v7624_v50 = vld [vmem:[%s8034_s5] ss:$0 sm:$0xff] }
 0x2de   : > { %v7614_v22 = vadd.f32 %v7562_v15, %v5334_v51 }
 0x2e0   : > { %v5335_v41 = vpop.f32.mrb[124].mxu1 }
 0x2e1   : > { %v5336_v33 = vpop.f32.mrb[125].mxu1 }
 0x2e2   : > { %v5337_v52 = vadd.f32 %v5336_v33, %v5335_v41  ;;  %v5338_v61 = vpop.f32.mrb[126].mxu1 }
 0x2e3   : > { %v5339_v54 = vpop.f32.mrb[127].mxu1 }
 0x2e4   : > { %v5340_v63 = vadd.f32 %v5339_v54, %v5338_v61  ;;  %v7617_v29 = vadd.f32 %v7571_v31, %v5337_v52 }
 0x2e6   : > { %v7619_v13 = vadd.f32 %v5791_v11, %v5340_v63 }
 0x2ee   : > { %v5575_v10 = vpop.f32.mrb[32].mxu0 }
 0x2ef   : > { %v5703_v15 = vadd.f32 %v7487_v2, %v5575_v10  ;;  %v3294_v1 = vpop.f32.mrb[33].mxu0 }
 0x2f0   : > { %v5706_v7 = vadd.f32 %v7475_v39, %v3294_v1  ;;  %v5576_v31 = vpop.f32.mrb[34].mxu0 }
 0x2f1   : > { %v3462_v11 = vmul.f32 %v5703_v15, %v7624_v50  ;;  %v5709_v23 = vadd.f32 %v7490_v62, %v5576_v31  ;;  %v3297_v27 = vpop.f32.mrb[35].mxu0 }
 0x2f2   : > { %v3460_v42 = vmul.f32 %v5706_v7, %v7624_v50  ;;  %v5712_v18 = vadd.f32 %v7478_v34, %v3297_v27  ;;  %v6010_v27 = vld [vmem:[%s8039_s10 + $0x10] sm:$0xff]  }
 0x2f3   : > { %v3501_v2 = vadd.f32 %v7630_v40, %v3462_v11  ;;  %v3463_v24 = vmul.f32 %v5709_v23, %v7624_v50 }
 0x2f4   : > { %v3499_v9 = vadd.f32 %v7630_v40, %v3460_v42  ;;  %v3461_v38 = vmul.f32 %v5712_v18, %v7624_v50 }
 0x2f5   : > { %v3502_v39 = vadd.f32 %v7630_v40, %v3463_v24  ;;  %v3533_v58 = vmax.f32 %v3501_v2, 0.0 }
 0x2f6   : > { %v3500_v12 = vadd.f32 %v7630_v40, %v3461_v38  ;;  %v5579_v57 = vpop.f32.mrb[36].mxu0  ;;  %v3531_v26 = vmax.f32 %v3499_v9, 0.0 }
 0x2f7   : > { %v3534_v62 = vmax.f32 %v3502_v39, 0.0  ;;  %v5715_v0 = vadd.f32 %v7517_v25, %v5579_v57  ;;  %v3310_v4 = vpop.f32.mrb[37].mxu0 }
 0x2f8   : > { %v3532_v34 = vmax.f32 %v3500_v12, 0.0  ;;  %v5718_v17 = vadd.f32 %v7499_v56, %v3310_v4  ;;  %v5580_v6 = vpop.f32.mrb[38].mxu0  ;;  %v6009_v56 = vld [vmem:[%s8039_s10 + $0x8] sm:$0xff]  }
 0x2f9   : > { %v3564_v5 = vpack.c.bf16 %v3534_v62, %v3533_v58  ;;  %v3466_v51 = vmul.f32 %v5715_v0, %v7624_v50  ;;  %v5721_v41 = vadd.f32 %v7520_v43, %v5580_v6  ;;  %v3313_v33 = vpop.f32.mrb[39].mxu0 }
 0x2fa   : > { %v3464_v52 = vmul.f32 %v5718_v17, %v7624_v50  ;;  %v5724_v61 = vadd.f32 %v7502_v53, %v3313_v33  ;;  %v3563_v54 = vpack.c.bf16 %v3532_v34, %v3531_v26 }
 0x2fb   : > { %v3505_v63 = vadd.f32 %v7630_v40, %v3466_v51  ;;  %v3467_v25 = vmul.f32 %v5721_v41, %v7624_v50  ;;  %v6012_v51 = vld [vmem:[%s8039_s10 + $0x20] sm:$0xff]  }
 0x2fc   : > { %v3503_v10 = vadd.f32 %v7630_v40, %v3464_v52  ;;  %v3465_v15 = vmul.f32 %v5724_v61, %v7624_v50  ;;  %5621 = vmatprep.mubr.bf16.mxu1 %v3563_v54 }
 0x2fd   : > { %v3506_v43 = vadd.f32 %v7630_v40, %v3467_v25  ;;  %5622 = vmatmul.mubr.bf16.vlgmr.msra.gmra.mrb[128].mxu1 %v3564_v5  ;;  %v3537_v7 = vmax.f32 %v3505_v63, 0.0 }
 0x2fe   : > { %v3504_v1 = vadd.f32 %v7630_v40, %v3465_v15  ;;  %5654 = vmatpush3.bf16.msra.mxu1 %v7507_v28  ;;  %v5583_v53 = vpop.f32.mrb[40].mxu0  ;;  %v3535_v42 = vmax.f32 %v3503_v10, 0.0 }
 0x2ff   : > { %v3538_v31 = vmax.f32 %v3506_v43, 0.0  ;;  %v5727_v11 = vadd.f32 %v7541_v45, %v5583_v53  ;;  %v3326_v23 = vpop.f32.mrb[41].mxu0  ;;  %5655 = vmatprep.subr.bf16.mxu1 %v6009_v56 }
 0x300   : > { %v3536_v18 = vmax.f32 %v3504_v1, 0.0  ;;  %v5730_v2 = vadd.f32 %v7529_v8, %v3326_v23  ;;  %v5584_v24 = vpop.f32.mrb[42].mxu0  ;;  %v6011_v8 = vld [vmem:[%s8039_s10 + $0x18] sm:$0xff]  }
 0x301   : > { %v3470_v9 = vmul.f32 %v5727_v11, %v7624_v50  ;;  %v5733_v28 = vadd.f32 %v7544_v49, %v5584_v24  ;;  %v3329_v38 = vpop.f32.mrb[43].mxu0  ;;  %v3566_v39 = vpack.c.bf16 %v3538_v31, %v3537_v7 }
 0x302   : > { %v3468_v12 = vmul.f32 %v5730_v2, %v7624_v50  ;;  %v5736_v45 = vadd.f32 %v7532_v32, %v3329_v38  ;;  %v3565_v57 = vpack.c.bf16 %v3536_v18, %v3535_v42  ;;  %5656 = vmatpush3.bf16.msra.mxu1 %v6009_v56  ;;  %v6014_v18 = vld [vmem:[%s8039_s10 + $0x30] sm:$0xff]  }
 0x303   : > { %v3509_v58 = vadd.f32 %v7630_v40, %v3470_v9  ;;  %v3471_v62 = vmul.f32 %v5733_v28, %v7624_v50  ;;  %5657 = vmatprep.subr.bf16.mxu1 %v6010_v27 }
 0x304   : > { %v3507_v0 = vadd.f32 %v7630_v40, %v3468_v12  ;;  %v3469_v49 = vmul.f32 %v5736_v45, %v7624_v50  ;;  %5625 = vmatprep.mubr.bf16.mxu1 %v3565_v57 }
 0x305   : > { %v3510_v4 = vadd.f32 %v7630_v40, %v3471_v62  ;;  %5626 = vmatmul.mubr.bf16.gmra.mrb[132].mxu1 %v3566_v39  ;;  %v3541_v34 = vmax.f32 %v3509_v58, 0.0 }
 0x306   : > { %v3508_v32 = vadd.f32 %v7630_v40, %v3469_v49  ;;  %v5587_v26 = vpop.f32.mrb[44].mxu0  ;;  %5658 = vmatpush3.bf16.msra.mxu1 %v6010_v27  ;;  %v3539_v41 = vmax.f32 %v3507_v0, 0.0 }
 0x307   : > { %v3542_v17 = vmax.f32 %v3510_v4, 0.0  ;;  %v5739_v6 = vadd.f32 %v7565_v47, %v5587_v26  ;;  %v3342_v5 = vpop.f32.mrb[45].mxu0  ;;  %5659 = vmatprep.subr.bf16.mxu1 %v6011_v8 }
 0x308   : > { %v3540_v33 = vmax.f32 %v3508_v32, 0.0  ;;  %v5742_v52 = vadd.f32 %v7553_v3, %v3342_v5  ;;  %v5588_v61 = vpop.f32.mrb[46].mxu0  ;;  %v6013_v3 = vld [vmem:[%s8039_s10 + $0x28] sm:$0xff]  }
 0x309   : > { %v3474_v54 = vmul.f32 %v5739_v6, %v7624_v50  ;;  %v5745_v63 = vadd.f32 %v7568_v21, %v5588_v61  ;;  %v3345_v25 = vpop.f32.mrb[47].mxu0  ;;  %v3568_v56 = vpack.c.bf16 %v3542_v17, %v3541_v34 }
 0x30a   : > { %v3472_v10 = vmul.f32 %v5742_v52, %v7624_v50  ;;  %v5748_v47 = vadd.f32 %v7556_v46, %v3345_v25  ;;  %v3567_v15 = vpack.c.bf16 %v3540_v33, %v3539_v41  ;;  %5660 = vmatpush3.bf16.msra.mxu1 %v6011_v8 }
 0x30b   : > { %v3513_v43 = vadd.f32 %v7630_v40, %v3474_v54  ;;  %v3475_v1 = vmul.f32 %v5745_v63, %v7624_v50  ;;  %5661 = vmatprep.subr.bf16.mxu1 %v6012_v51 }
 0x30c   : > { %v3511_v53 = vadd.f32 %v7630_v40, %v3472_v10  ;;  %v3473_v21 = vmul.f32 %v5748_v47, %v7624_v50  ;;  %5629 = vmatprep.mubr.bf16.mxu1 %v3567_v15 }
 0x30d   : > { %v3514_v7 = vadd.f32 %v7630_v40, %v3475_v1  ;;  %5630 = vmatmul.mubr.bf16.gmra.mrb[136].mxu1 %v3568_v56  ;;  %v3545_v11 = vmax.f32 %v3513_v43, 0.0 }
 0x30e   : > { %v3512_v46 = vadd.f32 %v7630_v40, %v3473_v21  ;;  %v5591_v31 = vpop.f32.mrb[48].mxu0  ;;  %5662 = vmatpush3.bf16.msra.mxu1 %v6012_v51  ;;  %v3543_v2 = vmax.f32 %v3511_v53, 0.0 }
 0x30f   : > { %v3546_v23 = vmax.f32 %v3514_v7, 0.0  ;;  %v5751_v27 = vadd.f32 %v7581_v48, %v5591_v31  ;;  %v3358_v42 = vpop.f32.mrb[49].mxu0  ;;  %5663 = vmatprep.subr.bf16.mxu1 %v6013_v3 }
 0x310   : > { %v3544_v24 = vmax.f32 %v3512_v46, 0.0  ;;  %v5754_v9 = vadd.f32 %v7575_v36, %v3358_v42  ;;  %v5592_v28 = vpop.f32.mrb[50].mxu0  ;;  %v6015_v36 = vld [vmem:[%s8039_s10 + $0x38] sm:$0xff]  }
 0x311   : > { %v3478_v38 = vmul.f32 %v5751_v27, %v7624_v50  ;;  %v5757_v39 = vadd.f32 %v7584_v19, %v5592_v28  ;;  %v3361_v12 = vpop.f32.mrb[51].mxu0  ;;  %v3570_v45 = vpack.c.bf16 %v3546_v23, %v3545_v11 }
 0x312   : > { %v3476_v57 = vmul.f32 %v5754_v9, %v7624_v50  ;;  %v5760_v48 = vadd.f32 %v7578_v44, %v3361_v12  ;;  %v3569_v58 = vpack.c.bf16 %v3544_v24, %v3543_v2  ;;  %5664 = vmatpush3.bf16.msra.mxu1 %v6013_v3 }
 0x313   : > { %v3517_v62 = vadd.f32 %v7630_v40, %v3478_v38  ;;  %v3479_v8 = vmul.f32 %v5757_v39, %v7624_v50  ;;  %5665 = vmatprep.subr.bf16.mxu1 %v6014_v18 }
 0x314   : > { %v3515_v0 = vadd.f32 %v7630_v40, %v3476_v57  ;;  %v3477_v19 = vmul.f32 %v5760_v48, %v7624_v50  ;;  %5633 = vmatprep.mubr.bf16.mxu1 %v3569_v58 }
 0x315   : > { %v3518_v49 = vadd.f32 %v7630_v40, %v3479_v8  ;;  %5634 = vmatmul.mubr.bf16.gmra.mrb[140].mxu1 %v3570_v45  ;;  %v3549_v32 = vmax.f32 %v3517_v62, 0.0 }
 0x316   : > { %v3516_v44 = vadd.f32 %v7630_v40, %v3477_v19  ;;  %v5595_v4 = vpop.f32.mrb[52].mxu0  ;;  %5666 = vmatpush3.bf16.msra.mxu1 %v6014_v18  ;;  %v3547_v6 = vmax.f32 %v3515_v0, 0.0 }
 0x317   : > { %v3550_v26 = vmax.f32 %v3518_v49, 0.0  ;;  %v5763_v34 = vadd.f32 %v7593_v35, %v5595_v4  ;;  %v3374_v17 = vpop.f32.mrb[53].mxu0  ;;  %5667 = vmatprep.subr.bf16.mxu1 %v6015_v36 }
 0x318   : > { %v3548_v5 = vmax.f32 %v3516_v44, 0.0  ;;  %v5766_v51 = vadd.f32 %v7587_v37, %v3374_v17  ;;  %v5596_v41 = vpop.f32.mrb[54].mxu0 }
 0x319   : > { %v3482_v33 = vmul.f32 %v5763_v34, %v7624_v50  ;;  %v5769_v52 = vadd.f32 %v7596_v16, %v5596_v41  ;;  %v3377_v61 = vpop.f32.mrb[55].mxu0  ;;  %v3572_v54 = vpack.c.bf16 %v3550_v26, %v3549_v32 }
 0x31a   : > { %v3480_v63 = vmul.f32 %v5766_v51, %v7624_v50  ;;  %v5772_v25 = vadd.f32 %v7590_v30, %v3377_v61  ;;  %v3571_v56 = vpack.c.bf16 %v3548_v5, %v3547_v6  ;;  %5668 = vmatpush3.bf16.msra.mxu1 %v6015_v36  ;;  %v6018_v61 = vld [vmem:[%s6136_s19 + $0x10] sm:$0xff]  }
 0x31b   : > { %v3521_v35 = vadd.f32 %v7630_v40, %v3482_v33  ;;  %v3483_v10 = vmul.f32 %v5769_v52, %v7624_v50  ;;  %v6017_v52 = vld [vmem:[%s6136_s19 + $0x8] sm:$0xff]  }
 0x31c   : > { %v3519_v47 = vadd.f32 %v7630_v40, %v3480_v63  ;;  %v3481_v37 = vmul.f32 %v5772_v25, %v7624_v50  ;;  %5637 = vmatprep.mubr.bf16.mxu1 %v3571_v56  ;;  %v6021_v63 = vld [vmem:[%s6136_s19 + $0x28] sm:$0xff]   ;;  %v6022_v25 = vld [vmem:[%s6136_s19 + $0x30] sm:$0xff]   ;;  %v6023_v56 = vld [vmem:[%s6136_s19 + $0x38] sm:$0xff]  }
 0x31d   : > { %v3522_v15 = vadd.f32 %v7630_v40, %v3483_v10  ;;  %5638 = vmatmul.mubr.bf16.gmra.mrb[144].mxu1 %v3572_v54  ;;  %v3553_v1 = vmax.f32 %v3521_v35, 0.0  ;;  %v6020_v54 = vld [vmem:[%s6136_s19 + $0x20] sm:$0xff]   ;;  %v6025_v10 = vld [vmem:[%s6136_s19 + $0x48] sm:$0xff]  }
 0x31e   : > { %v3520_v16 = vadd.f32 %v7630_v40, %v3481_v37  ;;  %v5599_v43 = vpop.f32.mrb[56].mxu0  ;;  %v3551_v21 = vmax.f32 %v3519_v47, 0.0  ;;  %v6024_v35 = vld [vmem:[%s6136_s19 + $0x40] sm:$0xff]   ;;  %v6026_v47 = vld [vmem:[%s6136_s19 + $0x50] sm:$0xff]   ;;  %v6027_v37 = vld [vmem:[%s6136_s19 + $0x58] sm:$0xff]  }
 0x31f   : > { %v3554_v3 = vmax.f32 %v3522_v15, 0.0  ;;  %v5775_v30 = vadd.f32 %v7605_v55, %v5599_v43  ;;  %v3390_v53 = vpop.f32.mrb[57].mxu0  ;;  %v6028_v15 = vld [vmem:[%s6136_s19 + $0x60] sm:$0xff]   ;;  %v6030_v43 = vld [vmem:[%s6136_s19 + $0x70] sm:$0xff]  }
 0x320   : > { %v3552_v7 = vmax.f32 %v3520_v16, 0.0  ;;  %v5778_v46 = vadd.f32 %v7599_v59, %v3390_v53  ;;  %v5600_v31 = vpop.f32.mrb[58].mxu0  ;;  %v6029_v16 = vld [vmem:[%s6136_s19 + $0x68] sm:$0xff]  }
 0x321   : > { %v3486_v11 = vmul.f32 %v5775_v30, %v7624_v50  ;;  %v5781_v23 = vadd.f32 %v7608_v60, %v5600_v31  ;;  %v3393_v27 = vpop.f32.mrb[59].mxu0  ;;  %v3574_v42 = vpack.c.bf16 %v3554_v3, %v3553_v1  ;;  %v6031_v1 = vld [vmem:[%s6136_s19 + $0x78] sm:$0xff]  }
 0x322   : > { %v3484_v18 = vmul.f32 %v5778_v46, %v7624_v50  ;;  %v5784_v2 = vadd.f32 %v7602_v14, %v3393_v27  ;;  %v3573_v24 = vpack.c.bf16 %v3552_v7, %v3551_v21 }
 0x323   : > { %v3525_v9 = vadd.f32 %v7630_v40, %v3486_v11  ;;  %v3487_v55 = vmul.f32 %v5781_v23, %v7624_v50 }
 0x324   : > { %v3523_v28 = vadd.f32 %v7630_v40, %v3484_v18  ;;  %v3485_v59 = vmul.f32 %v5784_v2, %v7624_v50  ;;  %5641 = vmatprep.mubr.bf16.mxu1 %v3573_v24 }
 0x325   : > { %v3526_v38 = vadd.f32 %v7630_v40, %v3487_v55  ;;  %5642 = vmatmul.mubr.bf16.gmra.mrb[148].mxu1 %v3574_v42  ;;  %v3557_v12 = vmax.f32 %v3525_v9, 0.0 }
 0x326   : > { %v3524_v60 = vadd.f32 %v7630_v40, %v3485_v59  ;;  %v5603_v39 = vpop.f32.mrb[60].mxu0  ;;  %v3555_v48 = vmax.f32 %v3523_v28, 0.0 }
 0x327   : > { %v3558_v45 = vmax.f32 %v3526_v38, 0.0  ;;  %v5787_v14 = vadd.f32 %v7617_v29, %v5603_v39  ;;  %v3406_v57 = vpop.f32.mrb[61].mxu0 }
 0x328   : > { %v3556_v58 = vmax.f32 %v3524_v60, 0.0  ;;  %v5790_v62 = vadd.f32 %v7611_v20, %v3406_v57  ;;  %v5604_v8 = vpop.f32.mrb[62].mxu0 }
 0x329   : > { %v3490_v36 = vmul.f32 %v5787_v14, %v7624_v50  ;;  %v5793_v0 = vadd.f32 %v7619_v13, %v5604_v8  ;;  %v3409_v19 = vpop.f32.mrb[63].mxu0  ;;  %v3576_v49 = vpack.c.bf16 %v3558_v45, %v3557_v12 }
 0x32a   : > { %v3488_v44 = vmul.f32 %v5790_v62, %v7624_v50  ;;  %v5796_v4 = vadd.f32 %v7614_v22, %v3409_v19  ;;  %v3575_v32 = vpack.c.bf16 %v3556_v58, %v3555_v48 }
 0x32b   : > { %v3529_v26 = vadd.f32 %v7630_v40, %v3490_v36  ;;  %v3491_v29 = vmul.f32 %v5793_v0, %v7624_v50 }
 0x32c   : > { %v3527_v34 = vadd.f32 %v7630_v40, %v3488_v44  ;;  %v3489_v20 = vmul.f32 %v5796_v4, %v7624_v50  ;;  %5645 = vmatprep.mubr.bf16.mxu1 %v3575_v32  ;;  %v6016_v50 = vld [vmem:[%s6136_s19] sm:$0xff]  }
 0x32d   : > { %v3530_v13 = vadd.f32 %v7630_v40, %v3491_v29  ;;  %5646 = vmatmul.mubr.bf16.gmra.mrb[152].mxu1 %v3576_v49  ;;  %v3561_v22 = vmax.f32 %v3529_v26, 0.0  ;;  %v7818_v49 = vld [vmem:[%s8037_s8] ss:$0 sm:$0xff] }
 0x32e   : > { %v3528_v17 = vadd.f32 %v7630_v40, %v3489_v20  ;;  %v3559_v5 = vmax.f32 %v3527_v34, 0.0  ;;  %v6019_v40 = vld [vmem:[%s6136_s19 + $0x18] sm:$0xff]   ;;  %v7823_v44 = vld [vmem:[%s8040_s11] ss:$0 sm:$0xff] }
 0x32f   : > { %v3562_v6 = vmax.f32 %v3530_v13, 0.0  ;;  %v7829_v32 = vld [vmem:[%s8038_s9] ss:$0 sm:$0xff] }
 0x330   : > { %v3560_v51 = vmax.f32 %v3528_v17, 0.0  ;;  %v7835_v34 = vld [vmem:[%s8041_s12] ss:$0 sm:$0xff] }
 0x331   : > { %v3578_v41 = vpack.c.bf16 %v3562_v6, %v3561_v22 }
 0x332   : > { %v3577_v33 = vpack.c.bf16 %v3560_v51, %v3559_v5 }
 0x334   : > { %5649 = vmatprep.mubr.bf16.mxu1 %v3577_v33 }
 0x335   : > { %5650 = vmatmul.mubr.bf16.gmra.mrb[156].mxu1 %v3578_v41 }
 0x336   : > { %5669 = vmatprep.mubr.bf16.mxu1 %v6016_v50 }
 0x33d   : > { %5670 = vmatmul.mubr.bf16.vlgmr.msra.gmra.mrb[160].mxu1 %v6017_v52 }
 0x33e   : > { %5673 = vmatprep.mubr.bf16.mxu1 %v6018_v61 }
 0x345   : > { %5674 = vmatmul.mubr.bf16.gmra.mrb[164].mxu1 %v6019_v40 }
 0x346   : > { %5677 = vmatprep.mubr.bf16.mxu1 %v6020_v54 }
 0x34d   : > { %5678 = vmatmul.mubr.bf16.gmra.mrb[168].mxu1 %v6021_v63 }
 0x34e   : > { %5681 = vmatprep.mubr.bf16.mxu1 %v6022_v25 }
 0x355   : > { %5682 = vmatmul.mubr.bf16.gmra.mrb[172].mxu1 %v6023_v56 }
 0x356   : > { %5685 = vmatprep.mubr.bf16.mxu1 %v6024_v35 }
 0x35d   : > { %5686 = vmatmul.mubr.bf16.gmra.mrb[176].mxu1 %v6025_v10 }
 0x35e   : > { %5689 = vmatprep.mubr.bf16.mxu1 %v6026_v47 }
 0x365   : > { %5690 = vmatmul.mubr.bf16.gmra.mrb[180].mxu1 %v6027_v37 }
 0x366   : > { %5693 = vmatprep.mubr.bf16.mxu1 %v6028_v15 }
 0x36d   : > { %5694 = vmatmul.mubr.bf16.gmra.mrb[184].mxu1 %v6029_v16 }
 0x36e   : > { %5697 = vmatprep.mubr.bf16.mxu1 %v6030_v43 }
 0x375   : > { %5698 = vmatmul.mubr.bf16.gmra.mrb[188].mxu1 %v6031_v1 }
 0x3d0   : > { %v5623_v3 = vpop.f32.mrb[128].mxu1 }
 0x3d1   : > { %v3677_v30 = vpop.f32.mrb[129].mxu1  ;;  %v3813_v4 = vmul.f32 %v5623_v3, %v7818_v49 }
 0x3d2   : > { %v5624_v53 = vpop.f32.mrb[130].mxu1  ;;  %v3811_v26 = vmul.f32 %v7818_v49, %v3677_v30 }
 0x3d3   : > { %v3680_v21 = vpop.f32.mrb[131].mxu1  ;;  %v3814_v20 = vmul.f32 %v5624_v53, %v7818_v49  ;;  %v3852_v51 = vadd.f32 %v7829_v32, %v3813_v4 }
 0x3d4   : > { %v3812_v22 = vmul.f32 %v7818_v49, %v3680_v21  ;;  %v3850_v52 = vadd.f32 %v7829_v32, %v3811_v26 }
 0x3d5   : > { %v3853_v54 = vadd.f32 %v7829_v32, %v3814_v20 }
 0x3d6   : > { %v3851_v56 = vadd.f32 %v7829_v32, %v3812_v22 }
 0x3d8   : > { %v5627_v7 = vpop.f32.mrb[132].mxu1 }
 0x3d9   : > { %v3693_v46 = vpop.f32.mrb[133].mxu1  ;;  %v3817_v47 = vmul.f32 %v5627_v7, %v7818_v49 }
 0x3da   : > { %v5628_v31 = vpop.f32.mrb[134].mxu1  ;;  %v3815_v16 = vmul.f32 %v7818_v49, %v3693_v46 }
 0x3db   : > { %v7765_v11 = vpop.f32.mrb[135].mxu1  ;;  %v3818_v30 = vmul.f32 %v5628_v31, %v7818_v49  ;;  %v3856_v46 = vadd.f32 %v7829_v32, %v3817_v47 }
 0x3dc   : > { %v3816_v26 = vmul.f32 %v7818_v49, %v7765_v11  ;;  %v3854_v22 = vadd.f32 %v7829_v32, %v3815_v16 }
 0x3e0   : > { %v7767_v23 = vpop.f32.mrb[136].mxu1 }
 0x3e1   : > { %v7769_v27 = vpop.f32.mrb[137].mxu1 }
 0x3e2   : > { %v7771_v42 = vpop.f32.mrb[138].mxu1 }
 0x3e3   : > { %v7773_v18 = vpop.f32.mrb[139].mxu1 }
 0x3e8   : > { %v7775_v2 = vpop.f32.mrb[140].mxu1 }
 0x3e9   : > { %v7777_v24 = vpop.f32.mrb[141].mxu1 }
 0x3ea   : > { %v7779_v9 = vpop.f32.mrb[142].mxu1 }
 0x3eb   : > { %v7781_v55 = vpop.f32.mrb[143].mxu1 }
 0x3f0   : > { %v7783_v28 = vpop.f32.mrb[144].mxu1 }
 0x3f1   : > { %v7785_v59 = vpop.f32.mrb[145].mxu1 }
 0x3f2   : > { %v7787_v38 = vpop.f32.mrb[146].mxu1 }
 0x3f3   : > { %v7789_v60 = vpop.f32.mrb[147].mxu1 }
 0x3f8   : > { %v7791_v39 = vpop.f32.mrb[148].mxu1 }
 0x3f9   : > { %v7793_v12 = vpop.f32.mrb[149].mxu1 }
 0x3fa   : > { %v7795_v45 = vpop.f32.mrb[150].mxu1 }
 0x3fb   : > { %v7797_v14 = vpop.f32.mrb[151].mxu1 }
 0x400   : > { %v7799_v57 = vpop.f32.mrb[152].mxu1 }
 0x401   : > { %v7801_v48 = vpop.f32.mrb[153].mxu1 }
 0x402   : > { %v7803_v58 = vpop.f32.mrb[154].mxu1 }
 0x403   : > { %v7805_v62 = vpop.f32.mrb[155].mxu1 }
 0x408   : > { %v7807_v8 = vpop.f32.mrb[156].mxu1 }
 0x409   : > { %v7809_v36 = vpop.f32.mrb[157].mxu1 }
 0x40a   : > { %v7811_v0 = vpop.f32.mrb[158].mxu1 }
 0x40b   : > { %v7813_v19 = vpop.f32.mrb[159].mxu1 }
 0x410   : > { %v5671_v29 = vpop.f32.mrb[160].mxu1 }
 0x411   : > { %v4116_v13 = vmul.f32 %v5671_v29, %v7823_v44  ;;  %v3980_v17 = vpop.f32.mrb[161].mxu1 }
 0x412   : > { %v4114_v6 = vmul.f32 %v7823_v44, %v3980_v17  ;;  %v5672_v5 = vpop.f32.mrb[162].mxu1 }
 0x413   : > { %v4155_v41 = vadd.f32 %v7835_v34, %v4116_v13  ;;  %v4117_v33 = vmul.f32 %v5672_v5, %v7823_v44  ;;  %v3983_v50 = vpop.f32.mrb[163].mxu1  ;;  %v3857_v5 = vadd.f32 %v7829_v32, %v3818_v30 }
 0x414   : > { %v4153_v61 = vadd.f32 %v7835_v34, %v4114_v6  ;;  %v4115_v40 = vmul.f32 %v7823_v44, %v3983_v50 }
 0x415   : > { %v4187_v63 = vadd.f32 %v4155_v41, %v3852_v51  ;;  %v4156_v25 = vadd.f32 %v7835_v34, %v4117_v33  ;;  %v3855_v33 = vadd.f32 %v7829_v32, %v3816_v26 }
 0x416   : > { %v4185_v35 = vadd.f32 %v4153_v61, %v3850_v52  ;;  %v4154_v10 = vadd.f32 %v7835_v34, %v4115_v40  ;;  %v3821_v61 = vmul.f32 %v7767_v23, %v7818_v49  ;;  %v3820_v23 = vmul.f32 %v7818_v49, %v7773_v18 }
 0x417   : > { %v4219_v37 = vmax.f32 %v4187_v63, 0.0  ;;  %v4188_v15 = vadd.f32 %v4156_v25, %v3853_v54  ;;  %v3819_v63 = vmul.f32 %v7818_v49, %v7769_v27 }
 0x418   : > { %v4217_v43 = vmax.f32 %v4185_v35, 0.0  ;;  %v4186_v1 = vadd.f32 %v4154_v10, %v3851_v56  ;;  %v5675_v3 = vpop.f32.mrb[164].mxu1  ;;  %v3822_v10 = vmul.f32 %v7771_v42, %v7818_v49 }
 0x419   : > { %4251 = vst [vmem:[%s7854_s29 + $0x10] sm:$0xff] %v4219_v37  ;;  %v4220_v53 = vmax.f32 %v4188_v15, 0.0  ;;  %v4120_v21 = vmul.f32 %v5675_v3, %v7823_v44  ;;  %v3996_v4 = vpop.f32.mrb[165].mxu1 }
 0x41a   : > { %4249 = vst [vmem:[%s7854_s29] sm:$0xff] %v4217_v43  ;;  %v4218_v7 = vmax.f32 %v4186_v1, 0.0  ;;  %v4118_v29 = vmul.f32 %v7823_v44, %v3996_v4  ;;  %v5676_v20 = vpop.f32.mrb[166].mxu1  ;;  %v3860_v1 = vadd.f32 %v7829_v32, %v3821_v61  ;;  %v3861_v4 = vadd.f32 %v7829_v32, %v3822_v10 }
 0x41b   : > { %4252 = vst [vmem:[%s7854_s29 + $0x18] sm:$0xff] %v4220_v53  ;;  %v4159_v13 = vadd.f32 %v7835_v34, %v4120_v21  ;;  %v4121_v31 = vmul.f32 %v5676_v20, %v7823_v44  ;;  %v3999_v17 = vpop.f32.mrb[167].mxu1  ;;  %v3858_v53 = vadd.f32 %v7829_v32, %v3819_v63 }
 0x41c   : > { %4250 = vst [vmem:[%s7854_s29 + $0x8] sm:$0xff] %v4218_v7  ;;  %v4157_v6 = vadd.f32 %v7835_v34, %v4118_v29  ;;  %v4119_v11 = vmul.f32 %v7823_v44, %v3999_v17  ;;  %v3859_v29 = vadd.f32 %v7829_v32, %v3820_v23 }
 0x41d   : > { %v4191_v51 = vadd.f32 %v4159_v13, %v3856_v46  ;;  %v4160_v41 = vadd.f32 %v7835_v34, %v4121_v31  ;;  %v3825_v13 = vmul.f32 %v7775_v2, %v7818_v49  ;;  %v3824_v2 = vmul.f32 %v7818_v49, %v7781_v55 }
 0x41e   : > { %v4189_v50 = vadd.f32 %v4157_v6, %v3854_v22  ;;  %v4158_v52 = vadd.f32 %v7835_v34, %v4119_v11  ;;  %v3823_v22 = vmul.f32 %v7818_v49, %v7777_v24 }
 0x41f   : > { %v4223_v40 = vmax.f32 %v4191_v51, 0.0  ;;  %v4192_v54 = vadd.f32 %v4160_v41, %v3857_v5  ;;  %v3826_v51 = vmul.f32 %v7779_v9, %v7818_v49 }
 0x420   : > { %v4221_v25 = vmax.f32 %v4189_v50, 0.0  ;;  %v4190_v56 = vadd.f32 %v4158_v52, %v3855_v33  ;;  %v5679_v35 = vpop.f32.mrb[168].mxu1 }
 0x421   : > { %4255 = vst [vmem:[%s7854_s29 + $0x30] sm:$0xff] %v4223_v40  ;;  %v4224_v47 = vmax.f32 %v4192_v54, 0.0  ;;  %v4124_v37 = vmul.f32 %v5679_v35, %v7823_v44  ;;  %v4012_v15 = vpop.f32.mrb[169].mxu1  ;;  %v3864_v40 = vadd.f32 %v7829_v32, %v3825_v13  ;;  %v3865_v35 = vadd.f32 %v7829_v32, %v3826_v51 }
 0x422   : > { %4253 = vst [vmem:[%s7854_s29 + $0x20] sm:$0xff] %v4221_v25  ;;  %v4222_v16 = vmax.f32 %v4190_v56, 0.0  ;;  %v4122_v43 = vmul.f32 %v7823_v44, %v4012_v15  ;;  %v5680_v27 = vpop.f32.mrb[170].mxu1  ;;  %v3862_v25 = vadd.f32 %v7829_v32, %v3823_v22 }
 0x423   : > { %4256 = vst [vmem:[%s7854_s29 + $0x38] sm:$0xff] %v4224_v47  ;;  %v4163_v3 = vadd.f32 %v7835_v34, %v4124_v37  ;;  %v4125_v42 = vmul.f32 %v5680_v27, %v7823_v44  ;;  %v4015_v30 = vpop.f32.mrb[171].mxu1  ;;  %v3863_v37 = vadd.f32 %v7829_v32, %v3824_v2  ;;  %v3831_v2 = vmul.f32 %v7818_v49, %v7793_v12 }
 0x424   : > { %4254 = vst [vmem:[%s7854_s29 + $0x28] sm:$0xff] %v4222_v16  ;;  %v4161_v21 = vadd.f32 %v7835_v34, %v4122_v43  ;;  %v4123_v18 = vmul.f32 %v7823_v44, %v4015_v30  ;;  %v3829_v16 = vmul.f32 %v7783_v28, %v7818_v49  ;;  %v3828_v28 = vmul.f32 %v7818_v49, %v7789_v60 }
 0x425   : > { %v4195_v26 = vadd.f32 %v4163_v3, %v3860_v1  ;;  %v4164_v7 = vadd.f32 %v7835_v34, %v4125_v42  ;;  %v3827_v1 = vmul.f32 %v7818_v49, %v7785_v59 }
 0x426   : > { %v4193_v20 = vadd.f32 %v4161_v21, %v3858_v53  ;;  %v4162_v46 = vadd.f32 %v7835_v34, %v4123_v18  ;;  %v3830_v53 = vmul.f32 %v7787_v38, %v7818_v49 }
 0x427   : > { %v4227_v31 = vmax.f32 %v4195_v26, 0.0  ;;  %v4196_v17 = vadd.f32 %v4164_v7, %v3861_v4  ;;  %v3866_v13 = vadd.f32 %v7829_v32, %v3827_v1 }
 0x428   : > { %v4225_v6 = vmax.f32 %v4193_v20, 0.0  ;;  %v4194_v11 = vadd.f32 %v4162_v46, %v3859_v29  ;;  %v5683_v5 = vpop.f32.mrb[172].mxu1  ;;  %v3868_v29 = vadd.f32 %v7829_v32, %v3829_v16 }
 0x429   : > { %4259 = vst [vmem:[%s7854_s29 + $0x50] sm:$0xff] %v4227_v31  ;;  %v4228_v41 = vmax.f32 %v4196_v17, 0.0  ;;  %v4128_v33 = vmul.f32 %v5683_v5, %v7823_v44  ;;  %v4028_v50 = vpop.f32.mrb[173].mxu1  ;;  %v3869_v17 = vadd.f32 %v7829_v32, %v3830_v53  ;;  %v3835_v53 = vmul.f32 %v7818_v49, %v7801_v48 }
 0x42a   : > { %4257 = vst [vmem:[%s7854_s29 + $0x40] sm:$0xff] %v4225_v6  ;;  %v4226_v52 = vmax.f32 %v4194_v11, 0.0  ;;  %v4126_v61 = vmul.f32 %v7823_v44, %v4028_v50  ;;  %v5684_v24 = vpop.f32.mrb[174].mxu1  ;;  %v3867_v11 = vadd.f32 %v7829_v32, %v3828_v28  ;;  %v3838_v28 = vmul.f32 %v7803_v58, %v7818_v49 }
 0x42b   : > { %4260 = vst [vmem:[%s7854_s29 + $0x58] sm:$0xff] %v4228_v41  ;;  %v4167_v54 = vadd.f32 %v7835_v34, %v4128_v33  ;;  %v4129_v9 = vmul.f32 %v5684_v24, %v7823_v44  ;;  %v4031_v63 = vpop.f32.mrb[175].mxu1  ;;  %v3833_v41 = vmul.f32 %v7791_v39, %v7818_v49  ;;  %v3832_v39 = vmul.f32 %v7818_v49, %v7797_v14 }
 0x42c   : > { %4258 = vst [vmem:[%s7854_s29 + $0x48] sm:$0xff] %v4226_v52  ;;  %v4165_v56 = vadd.f32 %v7835_v34, %v4126_v61  ;;  %v4127_v55 = vmul.f32 %v7823_v44, %v4031_v63 }
 0x42d   : > { %v4199_v10 = vadd.f32 %v4167_v54, %v3864_v40  ;;  %v4168_v47 = vadd.f32 %v7835_v34, %v4129_v9  ;;  %v3834_v40 = vmul.f32 %v7795_v45, %v7818_v49 }
 0x42e   : > { %v4197_v15 = vadd.f32 %v4165_v56, %v3862_v25  ;;  %v4166_v23 = vadd.f32 %v7835_v34, %v4127_v55  ;;  %v3872_v55 = vadd.f32 %v7829_v32, %v3833_v41  ;;  %v3841_v41 = vmul.f32 %v7807_v8, %v7818_v49 }
 0x42f   : > { %v4231_v43 = vmax.f32 %v4199_v10, 0.0  ;;  %v4200_v27 = vadd.f32 %v4168_v47, %v3865_v35  ;;  %v3870_v47 = vadd.f32 %v7829_v32, %v3831_v2  ;;  %v3839_v2 = vmul.f32 %v7818_v49, %v7809_v36 }
 0x430   : > { %v4229_v3 = vmax.f32 %v4197_v15, 0.0  ;;  %v4198_v42 = vadd.f32 %v4166_v23, %v3863_v37  ;;  %v5687_v30 = vpop.f32.mrb[176].mxu1  ;;  %v3873_v15 = vadd.f32 %v7829_v32, %v3834_v40  ;;  %v3842_v40 = vmul.f32 %v7811_v0, %v7818_v49 }
 0x431   : > { %4263 = vst [vmem:[%s7854_s29 + $0x70] sm:$0xff] %v4231_v43  ;;  %v4232_v21 = vmax.f32 %v4200_v27, 0.0  ;;  %v4132_v18 = vmul.f32 %v5687_v30, %v7823_v44  ;;  %v4044_v4 = vpop.f32.mrb[177].mxu1  ;;  %v3871_v43 = vadd.f32 %v7829_v32, %v3832_v39  ;;  %v3840_v8 = vmul.f32 %v7818_v49, %v7813_v19 }
 0x432   : > { %4261 = vst [vmem:[%s7854_s29 + $0x60] sm:$0xff] %v4229_v3  ;;  %v4230_v26 = vmax.f32 %v4198_v42, 0.0  ;;  %v4130_v7 = vmul.f32 %v7823_v44, %v4044_v4  ;;  %v5688_v59 = vpop.f32.mrb[178].mxu1  ;;  %v3837_v3 = vmul.f32 %v7799_v57, %v7818_v49  ;;  %v3836_v57 = vmul.f32 %v7818_v49, %v7805_v62 }
 0x433   : > { %4264 = vst [vmem:[%s7854_s29 + $0x78] sm:$0xff] %v4232_v21  ;;  %v4171_v20 = vadd.f32 %v7835_v34, %v4132_v18  ;;  %v4133_v38 = vmul.f32 %v5688_v59, %v7823_v44  ;;  %v4047_v46 = vpop.f32.mrb[179].mxu1 }
 0x434   : > { %4262 = vst [vmem:[%s7854_s29 + $0x68] sm:$0xff] %v4230_v26  ;;  %v4169_v31 = vadd.f32 %v7835_v34, %v4130_v7  ;;  %v4131_v60 = vmul.f32 %v7823_v44, %v4047_v46 }
 0x435   : > { %v4203_v22 = vadd.f32 %v4171_v20, %v3868_v29  ;;  %v4172_v6 = vadd.f32 %v7835_v34, %v4133_v38  ;;  %v3876_v38 = vadd.f32 %v7829_v32, %v3837_v3 }
 0x436   : > { %v4201_v5 = vadd.f32 %v4169_v31, %v3866_v13  ;;  %v4170_v51 = vadd.f32 %v7835_v34, %v4131_v60  ;;  %v3874_v31 = vadd.f32 %v7829_v32, %v3835_v53 }
 0x437   : > { %v4235_v33 = vmax.f32 %v4203_v22, 0.0  ;;  %v4204_v50 = vadd.f32 %v4172_v6, %v3869_v17  ;;  %v3877_v17 = vadd.f32 %v7829_v32, %v3838_v28 }
 0x438   : > { %v4233_v52 = vmax.f32 %v4201_v5, 0.0  ;;  %v4202_v61 = vadd.f32 %v4170_v51, %v3867_v11  ;;  %v5691_v24 = vpop.f32.mrb[180].mxu1  ;;  %v3875_v11 = vadd.f32 %v7829_v32, %v3836_v57 }
 0x439   : > { %4267 = vst [vmem:[%s7854_s29 + $0x90] sm:$0xff] %v4235_v33  ;;  %v4236_v54 = vmax.f32 %v4204_v50, 0.0  ;;  %v4136_v9 = vmul.f32 %v5691_v24, %v7823_v44  ;;  %v4060_v63 = vpop.f32.mrb[181].mxu1 }
 0x43a   : > { %4265 = vst [vmem:[%s7854_s29 + $0x80] sm:$0xff] %v4233_v52  ;;  %v4234_v25 = vmax.f32 %v4202_v61, 0.0  ;;  %v4134_v56 = vmul.f32 %v7823_v44, %v4060_v63  ;;  %v5692_v12 = vpop.f32.mrb[182].mxu1 }
 0x43b   : > { %4268 = vst [vmem:[%s7854_s29 + $0x98] sm:$0xff] %v4236_v54  ;;  %v4175_v35 = vadd.f32 %v7835_v34, %v4136_v9  ;;  %v4137_v45 = vmul.f32 %v5692_v12, %v7823_v44  ;;  %v4063_v10 = vpop.f32.mrb[183].mxu1 }
 0x43c   : > { %4266 = vst [vmem:[%s7854_s29 + $0x88] sm:$0xff] %v4234_v25  ;;  %v4173_v37 = vadd.f32 %v7835_v34, %v4134_v56  ;;  %v4135_v14 = vmul.f32 %v7823_v44, %v4063_v10  ;;  %v3880_v56 = vadd.f32 %v7829_v32, %v3841_v41 }
 0x43d   : > { %v4207_v23 = vadd.f32 %v4175_v35, %v3872_v55  ;;  %v4176_v16 = vadd.f32 %v7835_v34, %v4137_v45  ;;  %v3878_v35 = vadd.f32 %v7829_v32, %v3839_v2  ;;  %v3881_v45 = vadd.f32 %v7829_v32, %v3842_v40 }
 0x43e   : > { %v4205_v27 = vadd.f32 %v4173_v37, %v3870_v47  ;;  %v4174_v1 = vadd.f32 %v7835_v34, %v4135_v14  ;;  %v3879_v37 = vadd.f32 %v7829_v32, %v3840_v8 }
 0x43f   : > { %v4239_v42 = vmax.f32 %v4207_v23, 0.0  ;;  %v4208_v30 = vadd.f32 %v4176_v16, %v3873_v15 }
 0x440   : > { %v4237_v21 = vmax.f32 %v4205_v27, 0.0  ;;  %v4206_v18 = vadd.f32 %v4174_v1, %v3871_v43  ;;  %v5695_v4 = vpop.f32.mrb[184].mxu1 }
 0x441   : > { %4271 = vst [vmem:[%s7854_s29 + $0xb0] sm:$0xff] %v4239_v42  ;;  %v4240_v26 = vmax.f32 %v4208_v30, 0.0  ;;  %v4140_v7 = vmul.f32 %v5695_v4, %v7823_v44  ;;  %v4076_v59 = vpop.f32.mrb[185].mxu1 }
 0x442   : > { %4269 = vst [vmem:[%s7854_s29 + $0xa0] sm:$0xff] %v4237_v21  ;;  %v4238_v29 = vmax.f32 %v4206_v18, 0.0  ;;  %v4138_v20 = vmul.f32 %v7823_v44, %v4076_v59  ;;  %v5696_v48 = vpop.f32.mrb[186].mxu1 }
 0x443   : > { %4272 = vst [vmem:[%s7854_s29 + $0xb8] sm:$0xff] %v4240_v26  ;;  %v4179_v46 = vadd.f32 %v7835_v34, %v4140_v7  ;;  %v4141_v58 = vmul.f32 %v5696_v48, %v7823_v44  ;;  %v4079_v13 = vpop.f32.mrb[187].mxu1 }
 0x444   : > { %4270 = vst [vmem:[%s7854_s29 + $0xa8] sm:$0xff] %v4238_v29  ;;  %v4177_v60 = vadd.f32 %v7835_v34, %v4138_v20  ;;  %v4139_v62 = vmul.f32 %v7823_v44, %v4079_v13 }
 0x445   : > { %v4211_v22 = vadd.f32 %v4179_v46, %v3876_v38  ;;  %v4180_v6 = vadd.f32 %v7835_v34, %v4141_v58 }
 0x446   : > { %v4209_v5 = vadd.f32 %v4177_v60, %v3874_v31  ;;  %v4178_v51 = vadd.f32 %v7835_v34, %v4139_v62 }
 0x447   : > { %v4243_v33 = vmax.f32 %v4211_v22, 0.0  ;;  %v4212_v50 = vadd.f32 %v4180_v6, %v3877_v17 }
 0x448   : > { %v4241_v52 = vmax.f32 %v4209_v5, 0.0  ;;  %v4210_v61 = vadd.f32 %v4178_v51, %v3875_v11  ;;  %v5699_v24 = vpop.f32.mrb[188].mxu1 }
 0x449   : > { %4275 = vst [vmem:[%s7854_s29 + $0xd0] sm:$0xff] %v4243_v33  ;;  %v4244_v54 = vmax.f32 %v4212_v50, 0.0  ;;  %v4144_v9 = vmul.f32 %v5699_v24, %v7823_v44  ;;  %v4092_v63 = vpop.f32.mrb[189].mxu1 }
 0x44a   : > { %4273 = vst [vmem:[%s7854_s29 + $0xc0] sm:$0xff] %v4241_v52  ;;  %v4242_v39 = vmax.f32 %v4210_v61, 0.0  ;;  %v4142_v25 = vmul.f32 %v7823_v44, %v4092_v63  ;;  %v5700_v36 = vpop.f32.mrb[190].mxu1 }
 0x44b   : > { %4276 = vst [vmem:[%s7854_s29 + $0xd8] sm:$0xff] %v4244_v54  ;;  %v4183_v12 = vadd.f32 %v7835_v34, %v4144_v9  ;;  %v4145_v0 = vmul.f32 %v5700_v36, %v7823_v44  ;;  %v4095_v55 = vpop.f32.mrb[191].mxu1 }
 0x44c   : > { %4274 = vst [vmem:[%s7854_s29 + $0xc8] sm:$0xff] %v4242_v39  ;;  %v4181_v19 = vadd.f32 %v7835_v34, %v4142_v25  ;;  %v4143_v49 = vmul.f32 %v7823_v44, %v4095_v55 }
 0x44d   : > { %v4215_v10 = vadd.f32 %v4183_v12, %v3880_v56  ;;  %v4184_v47 = vadd.f32 %v7835_v34, %v4145_v0 }
 0x44e   : > { %v4213_v14 = vadd.f32 %v4181_v19, %v3878_v35  ;;  %v4182_v15 = vadd.f32 %v7835_v34, %v4143_v49 }
 0x44f   : > { %v4247_v23 = vmax.f32 %v4215_v10, 0.0  ;;  %v4216_v16 = vadd.f32 %v4184_v47, %v3881_v45 }
 0x450   : > { %v4245_v43 = vmax.f32 %v4213_v14, 0.0  ;;  %v4214_v27 = vadd.f32 %v4182_v15, %v3879_v37 }
 0x451   : > { %4279 = vst [vmem:[%s7854_s29 + $0xf0] sm:$0xff] %v4247_v23  ;;  %v4248_v1 = vmax.f32 %v4216_v16, 0.0 }
 0x452   : > { %4277 = vst [vmem:[%s7854_s29 + $0xe0] sm:$0xff] %v4245_v43  ;;  %v4246_v3 = vmax.f32 %v4214_v27, 0.0 }
 0x453   : > { %4280 = vst [vmem:[%s7854_s29 + $0xf8] sm:$0xff] %v4248_v1 }
 0x454   : > { %4278 = vst [vmem:[%s7854_s29 + $0xe8] sm:$0xff] %v4246_v3 }
 0x455 PF: > { %s23_s25 = sadd.s32 1, %s6038_s25  }
 0x456   : > { %p20_p4 = scmp.ge.s32.totalorder %s23_s25, 4  }
 0x458   :  { %22 = sbr.rel (!%p20_p4) target bundleno = 1 (0x1), region = 104 }

</bundles_post_ra>
